<compile_context>
chip_gen: v7x
topology: tpu7x:2x2x1
jax: 0.10.0
libtpu: 0.0.40
codegen_flags: <defaults>
</compile_context>

<pallas_src>
import jax
import jax.numpy as jnp
from jax.experimental import pallas as pl
from jax.experimental.pallas import tpu as pltpu


# ----------------------------------------------------------------------------
# Fused encoder+decoder kernel (one branch, one batch element per grid step)
# ----------------------------------------------------------------------------

def _make_fused_kernel(layer_count, H, W, enc_out_ch):
    HW = H * W

    def kernel(*refs):
        it = iter(refs)
        x_ref = next(it)
        enc_convs = [(next(it), next(it)) for _ in range(layer_count)]
        enc_fc_w_ref = next(it)
        enc_fc_b_ref = next(it)
        dec_fc_w_ref = next(it)
        dec_fc_b_ref = next(it)
        dec_convs = [(next(it), next(it)) for _ in range(layer_count)]
        y_ref = next(it)

        # Column-validity masks for horizontal taps; built once and shared by
        # every conv layer (hoisted broadcasts).
        col = jax.lax.broadcasted_iota(jnp.int32, (1, HW), 1) % W
        mask_left = col >= 1           # input column col-1 is in-bounds
        mask_right = col <= W - 2      # input column col+1 is in-bounds

        def conv3x3(h, w_ref, b_ref, act):
            """3x3 stride-1 'same' conv as ONE im2col matmul.

            h:     (Cin, H*W) f32 activations (channel-major, spatial on lanes)
            w_ref: (Cout, 9*Cin) bf16, rows ordered tap-major / Cin-minor
            b_ref: (Cout, 1) f32
            """
            cin = h.shape[0]
            # Flat zero pad of W+1 columns on each side: vertical out-of-image
            # taps land inside the zero pad; horizontal wrap is masked below.
            zpad = jnp.zeros((cin, W + 1), jnp.float32)
            hp = jnp.concatenate([zpad, h, zpad], axis=1)    # (Cin, HW+2W+2)
            taps = []
            for dy in (-1, 0, 1):
                for dx in (-1, 0, 1):
                    start = (W + 1) + dy * W + dx
                    t = jax.lax.slice_in_dim(hp, start, start + HW, axis=1)
                    if dx == -1:
                        t = jnp.where(mask_left, t, 0.0)
                    elif dx == 1:
                        t = jnp.where(mask_right, t, 0.0)
                    taps.append(t)
            patches = jnp.concatenate(taps, axis=0)          # (9*Cin, HW)
            y = jnp.dot(w_ref[...], patches.astype(jnp.bfloat16),
                        preferred_element_type=jnp.float32)  # (Cout, HW)
            y = y + b_ref[...]                               # (Cout, 1) bcast
            if act == "relu":
                y = jnp.maximum(y, 0.0)
            elif act == "sigmoid":
                y = jax.nn.sigmoid(y)
            return y

        # ------------------------------ encoder ------------------------------
        h = x_ref[...]                                       # (C_in, HW) f32
        for (w_ref, b_ref) in enc_convs:
            h = conv3x3(h, w_ref, b_ref, "relu")
        # TODO(synk): dropout (p=dropout_odds) omitted — eval-mode identity.

        # Encoder fc.  The flatten is implicit: h is (C, H*W) in NCHW
        # (channel-major) order, matching torch.flatten.  The fc weight is
        # stored as (C, H*W, latent) and contracted one channel-chunk at a
        # time (the same pattern K-tiles the fc for large SPATIAL).
        hb = h.astype(jnp.bfloat16)
        z = enc_fc_b_ref[...]                                # (1, latent) f32
        for c in range(enc_out_ch):
            z = z + jnp.dot(hb[c:c + 1, :], enc_fc_w_ref[c],
                            preferred_element_type=jnp.float32)

        # ------------------------------ decoder ------------------------------
        # Decoder fc (latent -> C*H*W) + ReLU, produced directly in the
        # channel-major (C, H*W) layout (weight pre-shaped to (C, latent, H*W)).
        zb = z.astype(jnp.bfloat16)                          # (1, latent)
        rows = [jnp.dot(zb, dec_fc_w_ref[c],
                        preferred_element_type=jnp.float32)  # (1, HW)
                for c in range(enc_out_ch)]
        h = jnp.concatenate(rows, axis=0) + dec_fc_b_ref[...]  # (C, HW)
        h = jnp.maximum(h, 0.0)

        for i, (w_ref, b_ref) in enumerate(dec_convs):
            act = "sigmoid" if i == layer_count - 1 else "relu"
            h = conv3x3(h, w_ref, b_ref, act)

        y_ref[...] = h.astype(y_ref.dtype)                   # (C_out, HW)

    return kernel


# ----------------------------------------------------------------------------
# pallas_call wrapper
# ----------------------------------------------------------------------------

def _full_block_spec(arr):
    zero = (0,) * arr.ndim
    return pl.BlockSpec(arr.shape, lambda n, _z=zero: _z)


def deepfaker_forward(params, meta, x_nchw):
    """Runs the fused encoderA->decoderA branch once and returns (yA, yB).

    yB is bit-identical to yA in the reference (same encoderA/decoderA path,
    eval-mode dropout), so the duplicate pass is eliminated.
    """
    N, c_in, H, W = x_nchw.shape
    HW = H * W
    layer_count = meta["layer_count"]
    enc_out_ch = meta["enc_out_ch"]

    enc = params["encoderA"]
    dec = params["decoderA"]
    out_ch = dec["convs"][-1][0].shape[0]

    # NCHW -> (N, C, H*W): channel-major, spatial on the 128-lane axis.
    x_flat = x_nchw.reshape(N, c_in, HW)

    operands = [x_flat]
    in_specs = [pl.BlockSpec((None, c_in, HW), lambda n: (n, 0, 0))]

    def add(arr):
        operands.append(arr)
        in_specs.append(_full_block_spec(arr))

    for (w, b) in enc["convs"]:
        add(w)
        add(b)
    add(enc["fc_w"])
    add(enc["fc_b"])
    add(dec["fc_w"])
    add(dec["fc_b"])
    for (w, b) in dec["convs"]:
        add(w)
        add(b)

    kernel = _make_fused_kernel(layer_count, H, W, enc_out_ch)

    y_flat = pl.pallas_call(
        kernel,
        out_shape=jax.ShapeDtypeStruct((N, out_ch, HW), jnp.float32),
        grid=(N,),
        in_specs=in_specs,
        out_specs=pl.BlockSpec((None, out_ch, HW), lambda n: (n, 0, 0)),
        compiler_params=pltpu.CompilerParams(
            dimension_semantics=("parallel",),
            vmem_limit_bytes=32 * 1024 * 1024),
    )(*operands)

    y = y_flat.reshape(N, out_ch, H, W)
    return y, y


# ----------------------------------------------------------------------------
# Parameter construction (deterministic, synthetic)
# ----------------------------------------------------------------------------

def _conv_params(key, cin, cout):
    kw, kb = jax.random.split(key)
    # PyTorch Conv2d weight layout (Cout, Cin, 3, 3), pre-flattened to
    # (Cout, 9*Cin) with rows ordered tap-major / Cin-minor to match the
    # kernel's im2col patch ordering.  Weights stored bf16 for the MXU.
    w_pt = 0.05 * jax.random.normal(kw, (cout, cin, 3, 3), jnp.float32)
    w_mat = jnp.transpose(w_pt, (0, 2, 3, 1)).reshape(cout, 9 * cin)
    b = 0.05 * jax.random.normal(kb, (cout, 1), jnp.float32)
    return w_mat.astype(jnp.bfloat16), b


def init_deepfaker_params(key, *, layer_count, latent_dim, flat_start, in_ch,
                          spatial):
    enc_chs = [in_ch] + [flat_start * (2 ** i) for i in range(layer_count)]
    enc_out_ch = enc_chs[-1]
    HW = spatial * spatial

    def make_encoder(k):
        ks = jax.random.split(k, layer_count + 1)
        convs = [_conv_params(ks[i], enc_chs[i], enc_chs[i + 1])
                 for i in range(layer_count)]
        kw, kb = jax.random.split(ks[-1])
        # Linear(feat -> latent), feat flattened in NCHW (channel-major) order;
        # stored as (C, H*W, latent) so the kernel contracts per channel chunk.
        fc_w = 0.05 * jax.random.normal(kw, (enc_out_ch, HW, latent_dim),
                                        jnp.float32).astype(jnp.bfloat16)
        fc_b = 0.05 * jax.random.normal(kb, (1, latent_dim), jnp.float32)
        return {"convs": convs, "fc_w": fc_w, "fc_b": fc_b}

    def make_decoder(k):
        ks = jax.random.split(k, layer_count + 1)
        kw, kb = jax.random.split(ks[0])
        # Linear(latent -> C*H*W); stored as (C, latent, H*W), bias as (C, H*W)
        # so decoder activations come out directly in (C, H*W) layout.
        fc_w = 0.05 * jax.random.normal(kw, (enc_out_ch, latent_dim, HW),
                                        jnp.float32).astype(jnp.bfloat16)
        fc_b = 0.05 * jax.random.normal(kb, (enc_out_ch, HW), jnp.float32)
        dec_chs = list(reversed(enc_chs))
        convs = [_conv_params(ks[i + 1], dec_chs[i], dec_chs[i + 1])
                 for i in range(layer_count)]
        return {"convs": convs, "fc_w": fc_w, "fc_b": fc_b}

    kA, kB, kC, kD = jax.random.split(key, 4)
    params = {
        "encoderA": make_encoder(kA),
        "encoderB": make_encoder(kB),   # created for module fidelity; unused in fwd
        "decoderA": make_decoder(kC),
        "decoderB": make_decoder(kD),   # created for module fidelity; unused in fwd
    }
    meta = {"enc_out_ch": enc_out_ch, "spatial": spatial,
            "layer_count": layer_count, "latent_dim": latent_dim}
    return params, meta


# ----------------------------------------------------------------------------
# Main
# ----------------------------------------------------------------------------

if __name__ == "__main__":
    LAYER_COUNT = 2
    LATENT_DIM = 32
    FLAT_START = 8
    IN_CH = 3
    SPATIAL = 16          # module default input_dim is 256; kept small for test
    BATCH = 2

    key = jax.random.PRNGKey(0)
    k_params, k_x = jax.random.split(key)

    params, meta = init_deepfaker_params(
        k_params, layer_count=LAYER_COUNT, latent_dim=LATENT_DIM,
        flat_start=FLAT_START, in_ch=IN_CH, spatial=SPATIAL)

    x = jax.random.normal(k_x, (BATCH, IN_CH, SPATIAL, SPATIAL), jnp.float32)

    fwd = jax.jit(lambda xx: deepfaker_forward(params, meta, xx))
    yA, yB = fwd(x)
    jax.block_until_ready((yA, yB))

    assert yA.shape == (BATCH, IN_CH, SPATIAL, SPATIAL)
    assert yB.shape == (BATCH, IN_CH, SPATIAL, SPATIAL)
    print("KERNEL_OK")
</pallas_src>

<mosaic_0001>
module attributes {stable_mosaic.version = 11 : i64} {
  func.func @kernel(%arg0: i32, %arg1: memref<1x3x256xf32, #tpu.memory_space<vmem>>, %arg2: memref<8x27xbf16, #tpu.memory_space<vmem>>, %arg3: memref<8x1xf32, #tpu.memory_space<vmem>>, %arg4: memref<16x72xbf16, #tpu.memory_space<vmem>>, %arg5: memref<16x1xf32, #tpu.memory_space<vmem>>, %arg6: memref<16x256x32xbf16, #tpu.memory_space<vmem>>, %arg7: memref<1x32xf32, #tpu.memory_space<vmem>>, %arg8: memref<16x32x256xbf16, #tpu.memory_space<vmem>>, %arg9: memref<16x256xf32, #tpu.memory_space<vmem>>, %arg10: memref<8x144xbf16, #tpu.memory_space<vmem>>, %arg11: memref<8x1xf32, #tpu.memory_space<vmem>>, %arg12: memref<3x72xbf16, #tpu.memory_space<vmem>>, %arg13: memref<3x1xf32, #tpu.memory_space<vmem>>, %arg14: memref<1x3x256xf32, #tpu.memory_space<vmem>>) attributes {dimension_semantics = [#tpu.dimension_semantics<parallel>], iteration_bounds = array<i64: 2>, scalar_prefetch = 0 : i64, scratch_operands = 0 : i64, tpu.core_type = #tpu.core_type<tc>, window_params = [{transform_indices = @transform_0, window_bounds = array<i64: 1, 3, 256>}, {pipeline_mode = #tpu.pipeline_mode<synchronous>, transform_indices = @transform_1, window_bounds = array<i64: 8, 27>}, {pipeline_mode = #tpu.pipeline_mode<synchronous>, transform_indices = @transform_2, window_bounds = array<i64: 8, 1>}, {pipeline_mode = #tpu.pipeline_mode<synchronous>, transform_indices = @transform_3, window_bounds = array<i64: 16, 72>}, {pipeline_mode = #tpu.pipeline_mode<synchronous>, transform_indices = @transform_4, window_bounds = array<i64: 16, 1>}, {pipeline_mode = #tpu.pipeline_mode<synchronous>, transform_indices = @transform_5, window_bounds = array<i64: 16, 256, 32>}, {pipeline_mode = #tpu.pipeline_mode<synchronous>, transform_indices = @transform_6, window_bounds = array<i64: 1, 32>}, {pipeline_mode = #tpu.pipeline_mode<synchronous>, transform_indices = @transform_7, window_bounds = array<i64: 16, 32, 256>}, {pipeline_mode = #tpu.pipeline_mode<synchronous>, transform_indices = @transform_8, window_bounds = array<i64: 16, 256>}, {pipeline_mode = #tpu.pipeline_mode<synchronous>, transform_indices = @transform_9, window_bounds = array<i64: 8, 144>}, {pipeline_mode = #tpu.pipeline_mode<synchronous>, transform_indices = @transform_10, window_bounds = array<i64: 8, 1>}, {pipeline_mode = #tpu.pipeline_mode<synchronous>, transform_indices = @transform_11, window_bounds = array<i64: 3, 72>}, {pipeline_mode = #tpu.pipeline_mode<synchronous>, transform_indices = @transform_12, window_bounds = array<i64: 3, 1>}, {transform_indices = @transform_13, window_bounds = array<i64: 1, 3, 256>}]} {
    %0 = tpu.iota {dimensions = array<i32: 1>} : vector<1x256xi32>
    %c16_i32 = arith.constant 16 : i32
    %c0_i32 = arith.constant 0 : i32
    %1 = arith.cmpi eq, %c16_i32, %c0_i32 : i32
    %c1_i32 = arith.constant 1 : i32
    %2 = arith.select %1, %c1_i32, %c16_i32 : i32
    %3 = vector.broadcast %2 : i32 to vector<1x256xi32>
    %4 = arith.remsi %0, %3 : vector<1x256xi32>
    %c0_i32_0 = arith.constant 0 : i32
    %5 = vector.broadcast %c0_i32_0 : i32 to vector<1x256xi32>
    %6 = arith.cmpi ne, %4, %5 : vector<1x256xi32>
    %c0_i32_1 = arith.constant 0 : i32
    %7 = vector.broadcast %c0_i32_1 : i32 to vector<1x256xi32>
    %8 = arith.cmpi slt, %4, %7 : vector<1x256xi32>
    %c0_i32_2 = arith.constant 0 : i32
    %9 = arith.cmpi slt, %2, %c0_i32_2 : i32
    %10 = vector.broadcast %9 : i1 to vector<1x256xi1>
    %11 = vector.broadcast %10 : vector<1x256xi1> to vector<1x256xi1>
    %12 = arith.xori %8, %11 : vector<1x256xi1>
    %13 = arith.andi %12, %6 : vector<1x256xi1>
    %14 = vector.broadcast %2 : i32 to vector<1x256xi32>
    %15 = arith.addi %4, %14 : vector<1x256xi32>
    %16 = arith.select %13, %15, %4 : vector<1x256xi1>, vector<1x256xi32>
    %c1_i32_3 = arith.constant 1 : i32
    %17 = vector.broadcast %c1_i32_3 : i32 to vector<1x256xi32>
    %18 = arith.cmpi sge, %16, %17 : vector<1x256xi32>
    %c14_i32 = arith.constant 14 : i32
    %19 = vector.broadcast %c14_i32 : i32 to vector<1x256xi32>
    %20 = arith.cmpi sle, %16, %19 : vector<1x256xi32>
    %c0 = arith.constant 0 : index
    %c0_4 = arith.constant 0 : index
    %c0_5 = arith.constant 0 : index
    %21 = vector.load %arg1[%c0, %c0_4, %c0_5] : memref<1x3x256xf32, #tpu.memory_space<vmem>>, vector<1x3x256xf32>
    %22 = vector.shape_cast %21 : vector<1x3x256xf32> to vector<3x256xf32>
    %cst = arith.constant 0.000000e+00 : f32
    %23 = vector.broadcast %cst : f32 to vector<3x17xf32>
    %24 = tpu.concatenate %23, %22, %23 in 1 : vector<3x17xf32>, vector<3x256xf32>, vector<3x17xf32> -> vector<3x290xf32>
    %25 = vector.extract_strided_slice %24 {offsets = [0, 0], sizes = [3, 256], strides = [1, 1]} : vector<3x290xf32> to vector<3x256xf32>
    %cst_6 = arith.constant 0.000000e+00 : f32
    %26 = vector.shape_cast %18 : vector<1x256xi1> to vector<1x256xi1>
    %27 = vector.broadcast %26 : vector<1x256xi1> to vector<3x256xi1>
    %28 = vector.broadcast %cst_6 : f32 to vector<3x256xf32>
    %29 = arith.select %27, %25, %28 : vector<3x256xi1>, vector<3x256xf32>
    %30 = vector.extract_strided_slice %24 {offsets = [0, 1], sizes = [3, 256], strides = [1, 1]} : vector<3x290xf32> to vector<3x256xf32>
    %31 = vector.extract_strided_slice %24 {offsets = [0, 2], sizes = [3, 256], strides = [1, 1]} : vector<3x290xf32> to vector<3x256xf32>
    %cst_7 = arith.constant 0.000000e+00 : f32
    %32 = vector.shape_cast %20 : vector<1x256xi1> to vector<1x256xi1>
    %33 = vector.broadcast %32 : vector<1x256xi1> to vector<3x256xi1>
    %34 = vector.broadcast %cst_7 : f32 to vector<3x256xf32>
    %35 = arith.select %33, %31, %34 : vector<3x256xi1>, vector<3x256xf32>
    %36 = vector.extract_strided_slice %24 {offsets = [0, 16], sizes = [3, 256], strides = [1, 1]} : vector<3x290xf32> to vector<3x256xf32>
    %cst_8 = arith.constant 0.000000e+00 : f32
    %37 = vector.shape_cast %18 : vector<1x256xi1> to vector<1x256xi1>
    %38 = vector.broadcast %37 : vector<1x256xi1> to vector<3x256xi1>
    %39 = vector.broadcast %cst_8 : f32 to vector<3x256xf32>
    %40 = arith.select %38, %36, %39 : vector<3x256xi1>, vector<3x256xf32>
    %41 = vector.extract_strided_slice %24 {offsets = [0, 17], sizes = [3, 256], strides = [1, 1]} : vector<3x290xf32> to vector<3x256xf32>
    %42 = vector.extract_strided_slice %24 {offsets = [0, 18], sizes = [3, 256], strides = [1, 1]} : vector<3x290xf32> to vector<3x256xf32>
    %cst_9 = arith.constant 0.000000e+00 : f32
    %43 = vector.shape_cast %20 : vector<1x256xi1> to vector<1x256xi1>
    %44 = vector.broadcast %43 : vector<1x256xi1> to vector<3x256xi1>
    %45 = vector.broadcast %cst_9 : f32 to vector<3x256xf32>
    %46 = arith.select %44, %42, %45 : vector<3x256xi1>, vector<3x256xf32>
    %47 = vector.extract_strided_slice %24 {offsets = [0, 32], sizes = [3, 256], strides = [1, 1]} : vector<3x290xf32> to vector<3x256xf32>
    %cst_10 = arith.constant 0.000000e+00 : f32
    %48 = vector.shape_cast %18 : vector<1x256xi1> to vector<1x256xi1>
    %49 = vector.broadcast %48 : vector<1x256xi1> to vector<3x256xi1>
    %50 = vector.broadcast %cst_10 : f32 to vector<3x256xf32>
    %51 = arith.select %49, %47, %50 : vector<3x256xi1>, vector<3x256xf32>
    %52 = vector.extract_strided_slice %24 {offsets = [0, 33], sizes = [3, 256], strides = [1, 1]} : vector<3x290xf32> to vector<3x256xf32>
    %53 = vector.extract_strided_slice %24 {offsets = [0, 34], sizes = [3, 256], strides = [1, 1]} : vector<3x290xf32> to vector<3x256xf32>
    %cst_11 = arith.constant 0.000000e+00 : f32
    %54 = vector.shape_cast %20 : vector<1x256xi1> to vector<1x256xi1>
    %55 = vector.broadcast %54 : vector<1x256xi1> to vector<3x256xi1>
    %56 = vector.broadcast %cst_11 : f32 to vector<3x256xf32>
    %57 = arith.select %55, %53, %56 : vector<3x256xi1>, vector<3x256xf32>
    %58 = tpu.concatenate %29, %30, %35, %40, %41, %46, %51, %52, %57 in 0 : vector<3x256xf32>, vector<3x256xf32>, vector<3x256xf32>, vector<3x256xf32>, vector<3x256xf32>, vector<3x256xf32>, vector<3x256xf32>, vector<3x256xf32>, vector<3x256xf32> -> vector<27x256xf32>
    %c0_12 = arith.constant 0 : index
    %c0_13 = arith.constant 0 : index
    %59 = vector.load %arg2[%c0_12, %c0_13] : memref<8x27xbf16, #tpu.memory_space<vmem>>, vector<8x27xbf16>
    %60 = arith.truncf %58 : vector<27x256xf32> to vector<27x256xbf16>
    %cst_14 = arith.constant dense<0.000000e+00> : vector<8x256xf32>
    %61 = tpu.matmul %59, %60, %cst_14 {dimension_numbers = #tpu.dot_dimension_numbers<[1], [0], [0], [1], [0, 0, 1, 1], [], []>} : vector<8x27xbf16>, vector<27x256xbf16>, vector<8x256xf32> -> vector<8x256xf32>
    %c0_15 = arith.constant 0 : index
    %c0_16 = arith.constant 0 : index
    %62 = vector.load %arg3[%c0_15, %c0_16] : memref<8x1xf32, #tpu.memory_space<vmem>>, vector<8x1xf32>
    %63 = vector.broadcast %62 : vector<8x1xf32> to vector<8x256xf32>
    %64 = arith.addf %61, %63 : vector<8x256xf32>
    %cst_17 = arith.constant 0.000000e+00 : f32
    %65 = vector.broadcast %cst_17 : f32 to vector<8x256xf32>
    %66 = arith.maximumf %64, %65 : vector<8x256xf32>
    %cst_18 = arith.constant 0.000000e+00 : f32
    %67 = vector.broadcast %cst_18 : f32 to vector<8x17xf32>
    %68 = tpu.concatenate %67, %66, %67 in 1 : vector<8x17xf32>, vector<8x256xf32>, vector<8x17xf32> -> vector<8x290xf32>
    %69 = vector.extract_strided_slice %68 {offsets = [0, 0], sizes = [8, 256], strides = [1, 1]} : vector<8x290xf32> to vector<8x256xf32>
    %cst_19 = arith.constant 0.000000e+00 : f32
    %70 = vector.shape_cast %18 : vector<1x256xi1> to vector<1x256xi1>
    %71 = vector.broadcast %70 : vector<1x256xi1> to vector<8x256xi1>
    %72 = vector.broadcast %cst_19 : f32 to vector<8x256xf32>
    %73 = arith.select %71, %69, %72 : vector<8x256xi1>, vector<8x256xf32>
    %74 = vector.extract_strided_slice %68 {offsets = [0, 1], sizes = [8, 256], strides = [1, 1]} : vector<8x290xf32> to vector<8x256xf32>
    %75 = vector.extract_strided_slice %68 {offsets = [0, 2], sizes = [8, 256], strides = [1, 1]} : vector<8x290xf32> to vector<8x256xf32>
    %cst_20 = arith.constant 0.000000e+00 : f32
    %76 = vector.shape_cast %20 : vector<1x256xi1> to vector<1x256xi1>
    %77 = vector.broadcast %76 : vector<1x256xi1> to vector<8x256xi1>
    %78 = vector.broadcast %cst_20 : f32 to vector<8x256xf32>
    %79 = arith.select %77, %75, %78 : vector<8x256xi1>, vector<8x256xf32>
    %80 = vector.extract_strided_slice %68 {offsets = [0, 16], sizes = [8, 256], strides = [1, 1]} : vector<8x290xf32> to vector<8x256xf32>
    %cst_21 = arith.constant 0.000000e+00 : f32
    %81 = vector.shape_cast %18 : vector<1x256xi1> to vector<1x256xi1>
    %82 = vector.broadcast %81 : vector<1x256xi1> to vector<8x256xi1>
    %83 = vector.broadcast %cst_21 : f32 to vector<8x256xf32>
    %84 = arith.select %82, %80, %83 : vector<8x256xi1>, vector<8x256xf32>
    %85 = vector.extract_strided_slice %68 {offsets = [0, 17], sizes = [8, 256], strides = [1, 1]} : vector<8x290xf32> to vector<8x256xf32>
    %86 = vector.extract_strided_slice %68 {offsets = [0, 18], sizes = [8, 256], strides = [1, 1]} : vector<8x290xf32> to vector<8x256xf32>
    %cst_22 = arith.constant 0.000000e+00 : f32
    %87 = vector.shape_cast %20 : vector<1x256xi1> to vector<1x256xi1>
    %88 = vector.broadcast %87 : vector<1x256xi1> to vector<8x256xi1>
    %89 = vector.broadcast %cst_22 : f32 to vector<8x256xf32>
    %90 = arith.select %88, %86, %89 : vector<8x256xi1>, vector<8x256xf32>
    %91 = vector.extract_strided_slice %68 {offsets = [0, 32], sizes = [8, 256], strides = [1, 1]} : vector<8x290xf32> to vector<8x256xf32>
    %cst_23 = arith.constant 0.000000e+00 : f32
    %92 = vector.shape_cast %18 : vector<1x256xi1> to vector<1x256xi1>
    %93 = vector.broadcast %92 : vector<1x256xi1> to vector<8x256xi1>
    %94 = vector.broadcast %cst_23 : f32 to vector<8x256xf32>
    %95 = arith.select %93, %91, %94 : vector<8x256xi1>, vector<8x256xf32>
    %96 = vector.extract_strided_slice %68 {offsets = [0, 33], sizes = [8, 256], strides = [1, 1]} : vector<8x290xf32> to vector<8x256xf32>
    %97 = vector.extract_strided_slice %68 {offsets = [0, 34], sizes = [8, 256], strides = [1, 1]} : vector<8x290xf32> to vector<8x256xf32>
    %cst_24 = arith.constant 0.000000e+00 : f32
    %98 = vector.shape_cast %20 : vector<1x256xi1> to vector<1x256xi1>
    %99 = vector.broadcast %98 : vector<1x256xi1> to vector<8x256xi1>
    %100 = vector.broadcast %cst_24 : f32 to vector<8x256xf32>
    %101 = arith.select %99, %97, %100 : vector<8x256xi1>, vector<8x256xf32>
    %102 = tpu.concatenate %73, %74, %79, %84, %85, %90, %95, %96, %101 in 0 : vector<8x256xf32>, vector<8x256xf32>, vector<8x256xf32>, vector<8x256xf32>, vector<8x256xf32>, vector<8x256xf32>, vector<8x256xf32>, vector<8x256xf32>, vector<8x256xf32> -> vector<72x256xf32>
    %c0_25 = arith.constant 0 : index
    %c0_26 = arith.constant 0 : index
    %103 = vector.load %arg4[%c0_25, %c0_26] : memref<16x72xbf16, #tpu.memory_space<vmem>>, vector<16x72xbf16>
    %104 = arith.truncf %102 : vector<72x256xf32> to vector<72x256xbf16>
    %cst_27 = arith.constant dense<0.000000e+00> : vector<16x256xf32>
    %105 = tpu.matmul %103, %104, %cst_27 {dimension_numbers = #tpu.dot_dimension_numbers<[1], [0], [0], [1], [0, 0, 1, 1], [], []>} : vector<16x72xbf16>, vector<72x256xbf16>, vector<16x256xf32> -> vector<16x256xf32>
    %c0_28 = arith.constant 0 : index
    %c0_29 = arith.constant 0 : index
    %106 = vector.load %arg5[%c0_28, %c0_29] : memref<16x1xf32, #tpu.memory_space<vmem>>, vector<16x1xf32>
    %107 = vector.broadcast %106 : vector<16x1xf32> to vector<16x256xf32>
    %108 = arith.addf %105, %107 : vector<16x256xf32>
    %cst_30 = arith.constant 0.000000e+00 : f32
    %109 = vector.broadcast %cst_30 : f32 to vector<16x256xf32>
    %110 = arith.maximumf %108, %109 : vector<16x256xf32>
    %111 = arith.truncf %110 : vector<16x256xf32> to vector<16x256xbf16>
    %c0_31 = arith.constant 0 : index
    %c0_32 = arith.constant 0 : index
    %112 = vector.load %arg7[%c0_31, %c0_32] : memref<1x32xf32, #tpu.memory_space<vmem>>, vector<1x32xf32>
    %113 = vector.extract_strided_slice %111 {offsets = [0, 0], sizes = [1, 256], strides = [1, 1]} : vector<16x256xbf16> to vector<1x256xbf16>
    %c0_33 = arith.constant 0 : index
    %c0_34 = arith.constant 0 : index
    %c0_35 = arith.constant 0 : index
    %114 = vector.load %arg6[%c0_33, %c0_34, %c0_35] : memref<16x256x32xbf16, #tpu.memory_space<vmem>>, vector<1x256x32xbf16>
    %115 = vector.shape_cast %114 : vector<1x256x32xbf16> to vector<256x32xbf16>
    %cst_36 = arith.constant dense<0.000000e+00> : vector<1x32xf32>
    %116 = tpu.matmul %113, %115, %cst_36 {dimension_numbers = #tpu.dot_dimension_numbers<[1], [0], [0], [1], [0, 0, 1, 1], [], []>} : vector<1x256xbf16>, vector<256x32xbf16>, vector<1x32xf32> -> vector<1x32xf32>
    %117 = arith.addf %112, %116 : vector<1x32xf32>
    %118 = vector.extract_strided_slice %111 {offsets = [1, 0], sizes = [1, 256], strides = [1, 1]} : vector<16x256xbf16> to vector<1x256xbf16>
    %c1 = arith.constant 1 : index
    %c0_37 = arith.constant 0 : index
    %c0_38 = arith.constant 0 : index
    %119 = vector.load %arg6[%c1, %c0_37, %c0_38] : memref<16x256x32xbf16, #tpu.memory_space<vmem>>, vector<1x256x32xbf16>
    %120 = vector.shape_cast %119 : vector<1x256x32xbf16> to vector<256x32xbf16>
    %cst_39 = arith.constant dense<0.000000e+00> : vector<1x32xf32>
    %121 = tpu.matmul %118, %120, %cst_39 {dimension_numbers = #tpu.dot_dimension_numbers<[1], [0], [0], [1], [0, 0, 1, 1], [], []>} : vector<1x256xbf16>, vector<256x32xbf16>, vector<1x32xf32> -> vector<1x32xf32>
    %122 = arith.addf %117, %121 : vector<1x32xf32>
    %123 = vector.extract_strided_slice %111 {offsets = [2, 0], sizes = [1, 256], strides = [1, 1]} : vector<16x256xbf16> to vector<1x256xbf16>
    %c2 = arith.constant 2 : index
    %c0_40 = arith.constant 0 : index
    %c0_41 = arith.constant 0 : index
    %124 = vector.load %arg6[%c2, %c0_40, %c0_41] : memref<16x256x32xbf16, #tpu.memory_space<vmem>>, vector<1x256x32xbf16>
    %125 = vector.shape_cast %124 : vector<1x256x32xbf16> to vector<256x32xbf16>
    %cst_42 = arith.constant dense<0.000000e+00> : vector<1x32xf32>
    %126 = tpu.matmul %123, %125, %cst_42 {dimension_numbers = #tpu.dot_dimension_numbers<[1], [0], [0], [1], [0, 0, 1, 1], [], []>} : vector<1x256xbf16>, vector<256x32xbf16>, vector<1x32xf32> -> vector<1x32xf32>
    %127 = arith.addf %122, %126 : vector<1x32xf32>
    %128 = vector.extract_strided_slice %111 {offsets = [3, 0], sizes = [1, 256], strides = [1, 1]} : vector<16x256xbf16> to vector<1x256xbf16>
    %c3 = arith.constant 3 : index
    %c0_43 = arith.constant 0 : index
    %c0_44 = arith.constant 0 : index
    %129 = vector.load %arg6[%c3, %c0_43, %c0_44] : memref<16x256x32xbf16, #tpu.memory_space<vmem>>, vector<1x256x32xbf16>
    %130 = vector.shape_cast %129 : vector<1x256x32xbf16> to vector<256x32xbf16>
    %cst_45 = arith.constant dense<0.000000e+00> : vector<1x32xf32>
    %131 = tpu.matmul %128, %130, %cst_45 {dimension_numbers = #tpu.dot_dimension_numbers<[1], [0], [0], [1], [0, 0, 1, 1], [], []>} : vector<1x256xbf16>, vector<256x32xbf16>, vector<1x32xf32> -> vector<1x32xf32>
    %132 = arith.addf %127, %131 : vector<1x32xf32>
    %133 = vector.extract_strided_slice %111 {offsets = [4, 0], sizes = [1, 256], strides = [1, 1]} : vector<16x256xbf16> to vector<1x256xbf16>
    %c4 = arith.constant 4 : index
    %c0_46 = arith.constant 0 : index
    %c0_47 = arith.constant 0 : index
    %134 = vector.load %arg6[%c4, %c0_46, %c0_47] : memref<16x256x32xbf16, #tpu.memory_space<vmem>>, vector<1x256x32xbf16>
    %135 = vector.shape_cast %134 : vector<1x256x32xbf16> to vector<256x32xbf16>
    %cst_48 = arith.constant dense<0.000000e+00> : vector<1x32xf32>
    %136 = tpu.matmul %133, %135, %cst_48 {dimension_numbers = #tpu.dot_dimension_numbers<[1], [0], [0], [1], [0, 0, 1, 1], [], []>} : vector<1x256xbf16>, vector<256x32xbf16>, vector<1x32xf32> -> vector<1x32xf32>
    %137 = arith.addf %132, %136 : vector<1x32xf32>
    %138 = vector.extract_strided_slice %111 {offsets = [5, 0], sizes = [1, 256], strides = [1, 1]} : vector<16x256xbf16> to vector<1x256xbf16>
    %c5 = arith.constant 5 : index
    %c0_49 = arith.constant 0 : index
    %c0_50 = arith.constant 0 : index
    %139 = vector.load %arg6[%c5, %c0_49, %c0_50] : memref<16x256x32xbf16, #tpu.memory_space<vmem>>, vector<1x256x32xbf16>
    %140 = vector.shape_cast %139 : vector<1x256x32xbf16> to vector<256x32xbf16>
    %cst_51 = arith.constant dense<0.000000e+00> : vector<1x32xf32>
    %141 = tpu.matmul %138, %140, %cst_51 {dimension_numbers = #tpu.dot_dimension_numbers<[1], [0], [0], [1], [0, 0, 1, 1], [], []>} : vector<1x256xbf16>, vector<256x32xbf16>, vector<1x32xf32> -> vector<1x32xf32>
    %142 = arith.addf %137, %141 : vector<1x32xf32>
    %143 = vector.extract_strided_slice %111 {offsets = [6, 0], sizes = [1, 256], strides = [1, 1]} : vector<16x256xbf16> to vector<1x256xbf16>
    %c6 = arith.constant 6 : index
    %c0_52 = arith.constant 0 : index
    %c0_53 = arith.constant 0 : index
    %144 = vector.load %arg6[%c6, %c0_52, %c0_53] : memref<16x256x32xbf16, #tpu.memory_space<vmem>>, vector<1x256x32xbf16>
    %145 = vector.shape_cast %144 : vector<1x256x32xbf16> to vector<256x32xbf16>
    %cst_54 = arith.constant dense<0.000000e+00> : vector<1x32xf32>
    %146 = tpu.matmul %143, %145, %cst_54 {dimension_numbers = #tpu.dot_dimension_numbers<[1], [0], [0], [1], [0, 0, 1, 1], [], []>} : vector<1x256xbf16>, vector<256x32xbf16>, vector<1x32xf32> -> vector<1x32xf32>
    %147 = arith.addf %142, %146 : vector<1x32xf32>
    %148 = vector.extract_strided_slice %111 {offsets = [7, 0], sizes = [1, 256], strides = [1, 1]} : vector<16x256xbf16> to vector<1x256xbf16>
    %c7 = arith.constant 7 : index
    %c0_55 = arith.constant 0 : index
    %c0_56 = arith.constant 0 : index
    %149 = vector.load %arg6[%c7, %c0_55, %c0_56] : memref<16x256x32xbf16, #tpu.memory_space<vmem>>, vector<1x256x32xbf16>
    %150 = vector.shape_cast %149 : vector<1x256x32xbf16> to vector<256x32xbf16>
    %cst_57 = arith.constant dense<0.000000e+00> : vector<1x32xf32>
    %151 = tpu.matmul %148, %150, %cst_57 {dimension_numbers = #tpu.dot_dimension_numbers<[1], [0], [0], [1], [0, 0, 1, 1], [], []>} : vector<1x256xbf16>, vector<256x32xbf16>, vector<1x32xf32> -> vector<1x32xf32>
    %152 = arith.addf %147, %151 : vector<1x32xf32>
    %153 = vector.extract_strided_slice %111 {offsets = [8, 0], sizes = [1, 256], strides = [1, 1]} : vector<16x256xbf16> to vector<1x256xbf16>
    %c8 = arith.constant 8 : index
    %c0_58 = arith.constant 0 : index
    %c0_59 = arith.constant 0 : index
    %154 = vector.load %arg6[%c8, %c0_58, %c0_59] : memref<16x256x32xbf16, #tpu.memory_space<vmem>>, vector<1x256x32xbf16>
    %155 = vector.shape_cast %154 : vector<1x256x32xbf16> to vector<256x32xbf16>
    %cst_60 = arith.constant dense<0.000000e+00> : vector<1x32xf32>
    %156 = tpu.matmul %153, %155, %cst_60 {dimension_numbers = #tpu.dot_dimension_numbers<[1], [0], [0], [1], [0, 0, 1, 1], [], []>} : vector<1x256xbf16>, vector<256x32xbf16>, vector<1x32xf32> -> vector<1x32xf32>
    %157 = arith.addf %152, %156 : vector<1x32xf32>
    %158 = vector.extract_strided_slice %111 {offsets = [9, 0], sizes = [1, 256], strides = [1, 1]} : vector<16x256xbf16> to vector<1x256xbf16>
    %c9 = arith.constant 9 : index
    %c0_61 = arith.constant 0 : index
    %c0_62 = arith.constant 0 : index
    %159 = vector.load %arg6[%c9, %c0_61, %c0_62] : memref<16x256x32xbf16, #tpu.memory_space<vmem>>, vector<1x256x32xbf16>
    %160 = vector.shape_cast %159 : vector<1x256x32xbf16> to vector<256x32xbf16>
    %cst_63 = arith.constant dense<0.000000e+00> : vector<1x32xf32>
    %161 = tpu.matmul %158, %160, %cst_63 {dimension_numbers = #tpu.dot_dimension_numbers<[1], [0], [0], [1], [0, 0, 1, 1], [], []>} : vector<1x256xbf16>, vector<256x32xbf16>, vector<1x32xf32> -> vector<1x32xf32>
    %162 = arith.addf %157, %161 : vector<1x32xf32>
    %163 = vector.extract_strided_slice %111 {offsets = [10, 0], sizes = [1, 256], strides = [1, 1]} : vector<16x256xbf16> to vector<1x256xbf16>
    %c10 = arith.constant 10 : index
    %c0_64 = arith.constant 0 : index
    %c0_65 = arith.constant 0 : index
    %164 = vector.load %arg6[%c10, %c0_64, %c0_65] : memref<16x256x32xbf16, #tpu.memory_space<vmem>>, vector<1x256x32xbf16>
    %165 = vector.shape_cast %164 : vector<1x256x32xbf16> to vector<256x32xbf16>
    %cst_66 = arith.constant dense<0.000000e+00> : vector<1x32xf32>
    %166 = tpu.matmul %163, %165, %cst_66 {dimension_numbers = #tpu.dot_dimension_numbers<[1], [0], [0], [1], [0, 0, 1, 1], [], []>} : vector<1x256xbf16>, vector<256x32xbf16>, vector<1x32xf32> -> vector<1x32xf32>
    %167 = arith.addf %162, %166 : vector<1x32xf32>
    %168 = vector.extract_strided_slice %111 {offsets = [11, 0], sizes = [1, 256], strides = [1, 1]} : vector<16x256xbf16> to vector<1x256xbf16>
    %c11 = arith.constant 11 : index
    %c0_67 = arith.constant 0 : index
    %c0_68 = arith.constant 0 : index
    %169 = vector.load %arg6[%c11, %c0_67, %c0_68] : memref<16x256x32xbf16, #tpu.memory_space<vmem>>, vector<1x256x32xbf16>
    %170 = vector.shape_cast %169 : vector<1x256x32xbf16> to vector<256x32xbf16>
    %cst_69 = arith.constant dense<0.000000e+00> : vector<1x32xf32>
    %171 = tpu.matmul %168, %170, %cst_69 {dimension_numbers = #tpu.dot_dimension_numbers<[1], [0], [0], [1], [0, 0, 1, 1], [], []>} : vector<1x256xbf16>, vector<256x32xbf16>, vector<1x32xf32> -> vector<1x32xf32>
    %172 = arith.addf %167, %171 : vector<1x32xf32>
    %173 = vector.extract_strided_slice %111 {offsets = [12, 0], sizes = [1, 256], strides = [1, 1]} : vector<16x256xbf16> to vector<1x256xbf16>
    %c12 = arith.constant 12 : index
    %c0_70 = arith.constant 0 : index
    %c0_71 = arith.constant 0 : index
    %174 = vector.load %arg6[%c12, %c0_70, %c0_71] : memref<16x256x32xbf16, #tpu.memory_space<vmem>>, vector<1x256x32xbf16>
    %175 = vector.shape_cast %174 : vector<1x256x32xbf16> to vector<256x32xbf16>
    %cst_72 = arith.constant dense<0.000000e+00> : vector<1x32xf32>
    %176 = tpu.matmul %173, %175, %cst_72 {dimension_numbers = #tpu.dot_dimension_numbers<[1], [0], [0], [1], [0, 0, 1, 1], [], []>} : vector<1x256xbf16>, vector<256x32xbf16>, vector<1x32xf32> -> vector<1x32xf32>
    %177 = arith.addf %172, %176 : vector<1x32xf32>
    %178 = vector.extract_strided_slice %111 {offsets = [13, 0], sizes = [1, 256], strides = [1, 1]} : vector<16x256xbf16> to vector<1x256xbf16>
    %c13 = arith.constant 13 : index
    %c0_73 = arith.constant 0 : index
    %c0_74 = arith.constant 0 : index
    %179 = vector.load %arg6[%c13, %c0_73, %c0_74] : memref<16x256x32xbf16, #tpu.memory_space<vmem>>, vector<1x256x32xbf16>
    %180 = vector.shape_cast %179 : vector<1x256x32xbf16> to vector<256x32xbf16>
    %cst_75 = arith.constant dense<0.000000e+00> : vector<1x32xf32>
    %181 = tpu.matmul %178, %180, %cst_75 {dimension_numbers = #tpu.dot_dimension_numbers<[1], [0], [0], [1], [0, 0, 1, 1], [], []>} : vector<1x256xbf16>, vector<256x32xbf16>, vector<1x32xf32> -> vector<1x32xf32>
    %182 = arith.addf %177, %181 : vector<1x32xf32>
    %183 = vector.extract_strided_slice %111 {offsets = [14, 0], sizes = [1, 256], strides = [1, 1]} : vector<16x256xbf16> to vector<1x256xbf16>
    %c14 = arith.constant 14 : index
    %c0_76 = arith.constant 0 : index
    %c0_77 = arith.constant 0 : index
    %184 = vector.load %arg6[%c14, %c0_76, %c0_77] : memref<16x256x32xbf16, #tpu.memory_space<vmem>>, vector<1x256x32xbf16>
    %185 = vector.shape_cast %184 : vector<1x256x32xbf16> to vector<256x32xbf16>
    %cst_78 = arith.constant dense<0.000000e+00> : vector<1x32xf32>
    %186 = tpu.matmul %183, %185, %cst_78 {dimension_numbers = #tpu.dot_dimension_numbers<[1], [0], [0], [1], [0, 0, 1, 1], [], []>} : vector<1x256xbf16>, vector<256x32xbf16>, vector<1x32xf32> -> vector<1x32xf32>
    %187 = arith.addf %182, %186 : vector<1x32xf32>
    %188 = vector.extract_strided_slice %111 {offsets = [15, 0], sizes = [1, 256], strides = [1, 1]} : vector<16x256xbf16> to vector<1x256xbf16>
    %c15 = arith.constant 15 : index
    %c0_79 = arith.constant 0 : index
    %c0_80 = arith.constant 0 : index
    %189 = vector.load %arg6[%c15, %c0_79, %c0_80] : memref<16x256x32xbf16, #tpu.memory_space<vmem>>, vector<1x256x32xbf16>
    %190 = vector.shape_cast %189 : vector<1x256x32xbf16> to vector<256x32xbf16>
    %cst_81 = arith.constant dense<0.000000e+00> : vector<1x32xf32>
    %191 = tpu.matmul %188, %190, %cst_81 {dimension_numbers = #tpu.dot_dimension_numbers<[1], [0], [0], [1], [0, 0, 1, 1], [], []>} : vector<1x256xbf16>, vector<256x32xbf16>, vector<1x32xf32> -> vector<1x32xf32>
    %192 = arith.addf %187, %191 : vector<1x32xf32>
    %193 = arith.truncf %192 : vector<1x32xf32> to vector<1x32xbf16>
    %c0_82 = arith.constant 0 : index
    %c0_83 = arith.constant 0 : index
    %c0_84 = arith.constant 0 : index
    %194 = vector.load %arg8[%c0_82, %c0_83, %c0_84] : memref<16x32x256xbf16, #tpu.memory_space<vmem>>, vector<1x32x256xbf16>
    %195 = vector.shape_cast %194 : vector<1x32x256xbf16> to vector<32x256xbf16>
    %cst_85 = arith.constant dense<0.000000e+00> : vector<1x256xf32>
    %196 = tpu.matmul %193, %195, %cst_85 {dimension_numbers = #tpu.dot_dimension_numbers<[1], [0], [0], [1], [0, 0, 1, 1], [], []>} : vector<1x32xbf16>, vector<32x256xbf16>, vector<1x256xf32> -> vector<1x256xf32>
    %c1_86 = arith.constant 1 : index
    %c0_87 = arith.constant 0 : index
    %c0_88 = arith.constant 0 : index
    %197 = vector.load %arg8[%c1_86, %c0_87, %c0_88] : memref<16x32x256xbf16, #tpu.memory_space<vmem>>, vector<1x32x256xbf16>
    %198 = vector.shape_cast %197 : vector<1x32x256xbf16> to vector<32x256xbf16>
    %cst_89 = arith.constant dense<0.000000e+00> : vector<1x256xf32>
    %199 = tpu.matmul %193, %198, %cst_89 {dimension_numbers = #tpu.dot_dimension_numbers<[1], [0], [0], [1], [0, 0, 1, 1], [], []>} : vector<1x32xbf16>, vector<32x256xbf16>, vector<1x256xf32> -> vector<1x256xf32>
    %c2_90 = arith.constant 2 : index
    %c0_91 = arith.constant 0 : index
    %c0_92 = arith.constant 0 : index
    %200 = vector.load %arg8[%c2_90, %c0_91, %c0_92] : memref<16x32x256xbf16, #tpu.memory_space<vmem>>, vector<1x32x256xbf16>
    %201 = vector.shape_cast %200 : vector<1x32x256xbf16> to vector<32x256xbf16>
    %cst_93 = arith.constant dense<0.000000e+00> : vector<1x256xf32>
    %202 = tpu.matmul %193, %201, %cst_93 {dimension_numbers = #tpu.dot_dimension_numbers<[1], [0], [0], [1], [0, 0, 1, 1], [], []>} : vector<1x32xbf16>, vector<32x256xbf16>, vector<1x256xf32> -> vector<1x256xf32>
    %c3_94 = arith.constant 3 : index
    %c0_95 = arith.constant 0 : index
    %c0_96 = arith.constant 0 : index
    %203 = vector.load %arg8[%c3_94, %c0_95, %c0_96] : memref<16x32x256xbf16, #tpu.memory_space<vmem>>, vector<1x32x256xbf16>
    %204 = vector.shape_cast %203 : vector<1x32x256xbf16> to vector<32x256xbf16>
    %cst_97 = arith.constant dense<0.000000e+00> : vector<1x256xf32>
    %205 = tpu.matmul %193, %204, %cst_97 {dimension_numbers = #tpu.dot_dimension_numbers<[1], [0], [0], [1], [0, 0, 1, 1], [], []>} : vector<1x32xbf16>, vector<32x256xbf16>, vector<1x256xf32> -> vector<1x256xf32>
    %c4_98 = arith.constant 4 : index
    %c0_99 = arith.constant 0 : index
    %c0_100 = arith.constant 0 : index
    %206 = vector.load %arg8[%c4_98, %c0_99, %c0_100] : memref<16x32x256xbf16, #tpu.memory_space<vmem>>, vector<1x32x256xbf16>
    %207 = vector.shape_cast %206 : vector<1x32x256xbf16> to vector<32x256xbf16>
    %cst_101 = arith.constant dense<0.000000e+00> : vector<1x256xf32>
    %208 = tpu.matmul %193, %207, %cst_101 {dimension_numbers = #tpu.dot_dimension_numbers<[1], [0], [0], [1], [0, 0, 1, 1], [], []>} : vector<1x32xbf16>, vector<32x256xbf16>, vector<1x256xf32> -> vector<1x256xf32>
    %c5_102 = arith.constant 5 : index
    %c0_103 = arith.constant 0 : index
    %c0_104 = arith.constant 0 : index
    %209 = vector.load %arg8[%c5_102, %c0_103, %c0_104] : memref<16x32x256xbf16, #tpu.memory_space<vmem>>, vector<1x32x256xbf16>
    %210 = vector.shape_cast %209 : vector<1x32x256xbf16> to vector<32x256xbf16>
    %cst_105 = arith.constant dense<0.000000e+00> : vector<1x256xf32>
    %211 = tpu.matmul %193, %210, %cst_105 {dimension_numbers = #tpu.dot_dimension_numbers<[1], [0], [0], [1], [0, 0, 1, 1], [], []>} : vector<1x32xbf16>, vector<32x256xbf16>, vector<1x256xf32> -> vector<1x256xf32>
    %c6_106 = arith.constant 6 : index
    %c0_107 = arith.constant 0 : index
    %c0_108 = arith.constant 0 : index
    %212 = vector.load %arg8[%c6_106, %c0_107, %c0_108] : memref<16x32x256xbf16, #tpu.memory_space<vmem>>, vector<1x32x256xbf16>
    %213 = vector.shape_cast %212 : vector<1x32x256xbf16> to vector<32x256xbf16>
    %cst_109 = arith.constant dense<0.000000e+00> : vector<1x256xf32>
    %214 = tpu.matmul %193, %213, %cst_109 {dimension_numbers = #tpu.dot_dimension_numbers<[1], [0], [0], [1], [0, 0, 1, 1], [], []>} : vector<1x32xbf16>, vector<32x256xbf16>, vector<1x256xf32> -> vector<1x256xf32>
    %c7_110 = arith.constant 7 : index
    %c0_111 = arith.constant 0 : index
    %c0_112 = arith.constant 0 : index
    %215 = vector.load %arg8[%c7_110, %c0_111, %c0_112] : memref<16x32x256xbf16, #tpu.memory_space<vmem>>, vector<1x32x256xbf16>
    %216 = vector.shape_cast %215 : vector<1x32x256xbf16> to vector<32x256xbf16>
    %cst_113 = arith.constant dense<0.000000e+00> : vector<1x256xf32>
    %217 = tpu.matmul %193, %216, %cst_113 {dimension_numbers = #tpu.dot_dimension_numbers<[1], [0], [0], [1], [0, 0, 1, 1], [], []>} : vector<1x32xbf16>, vector<32x256xbf16>, vector<1x256xf32> -> vector<1x256xf32>
    %c8_114 = arith.constant 8 : index
    %c0_115 = arith.constant 0 : index
    %c0_116 = arith.constant 0 : index
    %218 = vector.load %arg8[%c8_114, %c0_115, %c0_116] : memref<16x32x256xbf16, #tpu.memory_space<vmem>>, vector<1x32x256xbf16>
    %219 = vector.shape_cast %218 : vector<1x32x256xbf16> to vector<32x256xbf16>
    %cst_117 = arith.constant dense<0.000000e+00> : vector<1x256xf32>
    %220 = tpu.matmul %193, %219, %cst_117 {dimension_numbers = #tpu.dot_dimension_numbers<[1], [0], [0], [1], [0, 0, 1, 1], [], []>} : vector<1x32xbf16>, vector<32x256xbf16>, vector<1x256xf32> -> vector<1x256xf32>
    %c9_118 = arith.constant 9 : index
    %c0_119 = arith.constant 0 : index
    %c0_120 = arith.constant 0 : index
    %221 = vector.load %arg8[%c9_118, %c0_119, %c0_120] : memref<16x32x256xbf16, #tpu.memory_space<vmem>>, vector<1x32x256xbf16>
    %222 = vector.shape_cast %221 : vector<1x32x256xbf16> to vector<32x256xbf16>
    %cst_121 = arith.constant dense<0.000000e+00> : vector<1x256xf32>
    %223 = tpu.matmul %193, %222, %cst_121 {dimension_numbers = #tpu.dot_dimension_numbers<[1], [0], [0], [1], [0, 0, 1, 1], [], []>} : vector<1x32xbf16>, vector<32x256xbf16>, vector<1x256xf32> -> vector<1x256xf32>
    %c10_122 = arith.constant 10 : index
    %c0_123 = arith.constant 0 : index
    %c0_124 = arith.constant 0 : index
    %224 = vector.load %arg8[%c10_122, %c0_123, %c0_124] : memref<16x32x256xbf16, #tpu.memory_space<vmem>>, vector<1x32x256xbf16>
    %225 = vector.shape_cast %224 : vector<1x32x256xbf16> to vector<32x256xbf16>
    %cst_125 = arith.constant dense<0.000000e+00> : vector<1x256xf32>
    %226 = tpu.matmul %193, %225, %cst_125 {dimension_numbers = #tpu.dot_dimension_numbers<[1], [0], [0], [1], [0, 0, 1, 1], [], []>} : vector<1x32xbf16>, vector<32x256xbf16>, vector<1x256xf32> -> vector<1x256xf32>
    %c11_126 = arith.constant 11 : index
    %c0_127 = arith.constant 0 : index
    %c0_128 = arith.constant 0 : index
    %227 = vector.load %arg8[%c11_126, %c0_127, %c0_128] : memref<16x32x256xbf16, #tpu.memory_space<vmem>>, vector<1x32x256xbf16>
    %228 = vector.shape_cast %227 : vector<1x32x256xbf16> to vector<32x256xbf16>
    %cst_129 = arith.constant dense<0.000000e+00> : vector<1x256xf32>
    %229 = tpu.matmul %193, %228, %cst_129 {dimension_numbers = #tpu.dot_dimension_numbers<[1], [0], [0], [1], [0, 0, 1, 1], [], []>} : vector<1x32xbf16>, vector<32x256xbf16>, vector<1x256xf32> -> vector<1x256xf32>
    %c12_130 = arith.constant 12 : index
    %c0_131 = arith.constant 0 : index
    %c0_132 = arith.constant 0 : index
    %230 = vector.load %arg8[%c12_130, %c0_131, %c0_132] : memref<16x32x256xbf16, #tpu.memory_space<vmem>>, vector<1x32x256xbf16>
    %231 = vector.shape_cast %230 : vector<1x32x256xbf16> to vector<32x256xbf16>
    %cst_133 = arith.constant dense<0.000000e+00> : vector<1x256xf32>
    %232 = tpu.matmul %193, %231, %cst_133 {dimension_numbers = #tpu.dot_dimension_numbers<[1], [0], [0], [1], [0, 0, 1, 1], [], []>} : vector<1x32xbf16>, vector<32x256xbf16>, vector<1x256xf32> -> vector<1x256xf32>
    %c13_134 = arith.constant 13 : index
    %c0_135 = arith.constant 0 : index
    %c0_136 = arith.constant 0 : index
    %233 = vector.load %arg8[%c13_134, %c0_135, %c0_136] : memref<16x32x256xbf16, #tpu.memory_space<vmem>>, vector<1x32x256xbf16>
    %234 = vector.shape_cast %233 : vector<1x32x256xbf16> to vector<32x256xbf16>
    %cst_137 = arith.constant dense<0.000000e+00> : vector<1x256xf32>
    %235 = tpu.matmul %193, %234, %cst_137 {dimension_numbers = #tpu.dot_dimension_numbers<[1], [0], [0], [1], [0, 0, 1, 1], [], []>} : vector<1x32xbf16>, vector<32x256xbf16>, vector<1x256xf32> -> vector<1x256xf32>
    %c14_138 = arith.constant 14 : index
    %c0_139 = arith.constant 0 : index
    %c0_140 = arith.constant 0 : index
    %236 = vector.load %arg8[%c14_138, %c0_139, %c0_140] : memref<16x32x256xbf16, #tpu.memory_space<vmem>>, vector<1x32x256xbf16>
    %237 = vector.shape_cast %236 : vector<1x32x256xbf16> to vector<32x256xbf16>
    %cst_141 = arith.constant dense<0.000000e+00> : vector<1x256xf32>
    %238 = tpu.matmul %193, %237, %cst_141 {dimension_numbers = #tpu.dot_dimension_numbers<[1], [0], [0], [1], [0, 0, 1, 1], [], []>} : vector<1x32xbf16>, vector<32x256xbf16>, vector<1x256xf32> -> vector<1x256xf32>
    %c15_142 = arith.constant 15 : index
    %c0_143 = arith.constant 0 : index
    %c0_144 = arith.constant 0 : index
    %239 = vector.load %arg8[%c15_142, %c0_143, %c0_144] : memref<16x32x256xbf16, #tpu.memory_space<vmem>>, vector<1x32x256xbf16>
    %240 = vector.shape_cast %239 : vector<1x32x256xbf16> to vector<32x256xbf16>
    %cst_145 = arith.constant dense<0.000000e+00> : vector<1x256xf32>
    %241 = tpu.matmul %193, %240, %cst_145 {dimension_numbers = #tpu.dot_dimension_numbers<[1], [0], [0], [1], [0, 0, 1, 1], [], []>} : vector<1x32xbf16>, vector<32x256xbf16>, vector<1x256xf32> -> vector<1x256xf32>
    %242 = tpu.concatenate %196, %199, %202, %205, %208, %211, %214, %217, %220, %223, %226, %229, %232, %235, %238, %241 in 0 : vector<1x256xf32>, vector<1x256xf32>, vector<1x256xf32>, vector<1x256xf32>, vector<1x256xf32>, vector<1x256xf32>, vector<1x256xf32>, vector<1x256xf32>, vector<1x256xf32>, vector<1x256xf32>, vector<1x256xf32>, vector<1x256xf32>, vector<1x256xf32>, vector<1x256xf32>, vector<1x256xf32>, vector<1x256xf32> -> vector<16x256xf32>
    %c0_146 = arith.constant 0 : index
    %c0_147 = arith.constant 0 : index
    %243 = vector.load %arg9[%c0_146, %c0_147] : memref<16x256xf32, #tpu.memory_space<vmem>>, vector<16x256xf32>
    %244 = arith.addf %242, %243 : vector<16x256xf32>
    %cst_148 = arith.constant 0.000000e+00 : f32
    %245 = vector.broadcast %cst_148 : f32 to vector<16x256xf32>
    %246 = arith.maximumf %244, %245 : vector<16x256xf32>
    %cst_149 = arith.constant 0.000000e+00 : f32
    %247 = vector.broadcast %cst_149 : f32 to vector<16x17xf32>
    %248 = tpu.concatenate %247, %246, %247 in 1 : vector<16x17xf32>, vector<16x256xf32>, vector<16x17xf32> -> vector<16x290xf32>
    %249 = vector.extract_strided_slice %248 {offsets = [0, 0], sizes = [16, 256], strides = [1, 1]} : vector<16x290xf32> to vector<16x256xf32>
    %cst_150 = arith.constant 0.000000e+00 : f32
    %250 = vector.shape_cast %18 : vector<1x256xi1> to vector<1x256xi1>
    %251 = vector.broadcast %250 : vector<1x256xi1> to vector<16x256xi1>
    %252 = vector.broadcast %cst_150 : f32 to vector<16x256xf32>
    %253 = arith.select %251, %249, %252 : vector<16x256xi1>, vector<16x256xf32>
    %254 = vector.extract_strided_slice %248 {offsets = [0, 1], sizes = [16, 256], strides = [1, 1]} : vector<16x290xf32> to vector<16x256xf32>
    %255 = vector.extract_strided_slice %248 {offsets = [0, 2], sizes = [16, 256], strides = [1, 1]} : vector<16x290xf32> to vector<16x256xf32>
    %cst_151 = arith.constant 0.000000e+00 : f32
    %256 = vector.shape_cast %20 : vector<1x256xi1> to vector<1x256xi1>
    %257 = vector.broadcast %256 : vector<1x256xi1> to vector<16x256xi1>
    %258 = vector.broadcast %cst_151 : f32 to vector<16x256xf32>
    %259 = arith.select %257, %255, %258 : vector<16x256xi1>, vector<16x256xf32>
    %260 = vector.extract_strided_slice %248 {offsets = [0, 16], sizes = [16, 256], strides = [1, 1]} : vector<16x290xf32> to vector<16x256xf32>
    %cst_152 = arith.constant 0.000000e+00 : f32
    %261 = vector.shape_cast %18 : vector<1x256xi1> to vector<1x256xi1>
    %262 = vector.broadcast %261 : vector<1x256xi1> to vector<16x256xi1>
    %263 = vector.broadcast %cst_152 : f32 to vector<16x256xf32>
    %264 = arith.select %262, %260, %263 : vector<16x256xi1>, vector<16x256xf32>
    %265 = vector.extract_strided_slice %248 {offsets = [0, 17], sizes = [16, 256], strides = [1, 1]} : vector<16x290xf32> to vector<16x256xf32>
    %266 = vector.extract_strided_slice %248 {offsets = [0, 18], sizes = [16, 256], strides = [1, 1]} : vector<16x290xf32> to vector<16x256xf32>
    %cst_153 = arith.constant 0.000000e+00 : f32
    %267 = vector.shape_cast %20 : vector<1x256xi1> to vector<1x256xi1>
    %268 = vector.broadcast %267 : vector<1x256xi1> to vector<16x256xi1>
    %269 = vector.broadcast %cst_153 : f32 to vector<16x256xf32>
    %270 = arith.select %268, %266, %269 : vector<16x256xi1>, vector<16x256xf32>
    %271 = vector.extract_strided_slice %248 {offsets = [0, 32], sizes = [16, 256], strides = [1, 1]} : vector<16x290xf32> to vector<16x256xf32>
    %cst_154 = arith.constant 0.000000e+00 : f32
    %272 = vector.shape_cast %18 : vector<1x256xi1> to vector<1x256xi1>
    %273 = vector.broadcast %272 : vector<1x256xi1> to vector<16x256xi1>
    %274 = vector.broadcast %cst_154 : f32 to vector<16x256xf32>
    %275 = arith.select %273, %271, %274 : vector<16x256xi1>, vector<16x256xf32>
    %276 = vector.extract_strided_slice %248 {offsets = [0, 33], sizes = [16, 256], strides = [1, 1]} : vector<16x290xf32> to vector<16x256xf32>
    %277 = vector.extract_strided_slice %248 {offsets = [0, 34], sizes = [16, 256], strides = [1, 1]} : vector<16x290xf32> to vector<16x256xf32>
    %cst_155 = arith.constant 0.000000e+00 : f32
    %278 = vector.shape_cast %20 : vector<1x256xi1> to vector<1x256xi1>
    %279 = vector.broadcast %278 : vector<1x256xi1> to vector<16x256xi1>
    %280 = vector.broadcast %cst_155 : f32 to vector<16x256xf32>
    %281 = arith.select %279, %277, %280 : vector<16x256xi1>, vector<16x256xf32>
    %282 = tpu.concatenate %253, %254, %259, %264, %265, %270, %275, %276, %281 in 0 : vector<16x256xf32>, vector<16x256xf32>, vector<16x256xf32>, vector<16x256xf32>, vector<16x256xf32>, vector<16x256xf32>, vector<16x256xf32>, vector<16x256xf32>, vector<16x256xf32> -> vector<144x256xf32>
    %c0_156 = arith.constant 0 : index
    %c0_157 = arith.constant 0 : index
    %283 = vector.load %arg10[%c0_156, %c0_157] : memref<8x144xbf16, #tpu.memory_space<vmem>>, vector<8x144xbf16>
    %284 = arith.truncf %282 : vector<144x256xf32> to vector<144x256xbf16>
    %cst_158 = arith.constant dense<0.000000e+00> : vector<8x256xf32>
    %285 = tpu.matmul %283, %284, %cst_158 {dimension_numbers = #tpu.dot_dimension_numbers<[1], [0], [0], [1], [0, 0, 1, 1], [], []>} : vector<8x144xbf16>, vector<144x256xbf16>, vector<8x256xf32> -> vector<8x256xf32>
    %c0_159 = arith.constant 0 : index
    %c0_160 = arith.constant 0 : index
    %286 = vector.load %arg11[%c0_159, %c0_160] : memref<8x1xf32, #tpu.memory_space<vmem>>, vector<8x1xf32>
    %287 = vector.broadcast %286 : vector<8x1xf32> to vector<8x256xf32>
    %288 = arith.addf %285, %287 : vector<8x256xf32>
    %cst_161 = arith.constant 0.000000e+00 : f32
    %289 = vector.broadcast %cst_161 : f32 to vector<8x256xf32>
    %290 = arith.maximumf %288, %289 : vector<8x256xf32>
    %cst_162 = arith.constant 0.000000e+00 : f32
    %291 = vector.broadcast %cst_162 : f32 to vector<8x17xf32>
    %292 = tpu.concatenate %291, %290, %291 in 1 : vector<8x17xf32>, vector<8x256xf32>, vector<8x17xf32> -> vector<8x290xf32>
    %293 = vector.extract_strided_slice %292 {offsets = [0, 0], sizes = [8, 256], strides = [1, 1]} : vector<8x290xf32> to vector<8x256xf32>
    %cst_163 = arith.constant 0.000000e+00 : f32
    %294 = vector.shape_cast %18 : vector<1x256xi1> to vector<1x256xi1>
    %295 = vector.broadcast %294 : vector<1x256xi1> to vector<8x256xi1>
    %296 = vector.broadcast %cst_163 : f32 to vector<8x256xf32>
    %297 = arith.select %295, %293, %296 : vector<8x256xi1>, vector<8x256xf32>
    %298 = vector.extract_strided_slice %292 {offsets = [0, 1], sizes = [8, 256], strides = [1, 1]} : vector<8x290xf32> to vector<8x256xf32>
    %299 = vector.extract_strided_slice %292 {offsets = [0, 2], sizes = [8, 256], strides = [1, 1]} : vector<8x290xf32> to vector<8x256xf32>
    %cst_164 = arith.constant 0.000000e+00 : f32
    %300 = vector.shape_cast %20 : vector<1x256xi1> to vector<1x256xi1>
    %301 = vector.broadcast %300 : vector<1x256xi1> to vector<8x256xi1>
    %302 = vector.broadcast %cst_164 : f32 to vector<8x256xf32>
    %303 = arith.select %301, %299, %302 : vector<8x256xi1>, vector<8x256xf32>
    %304 = vector.extract_strided_slice %292 {offsets = [0, 16], sizes = [8, 256], strides = [1, 1]} : vector<8x290xf32> to vector<8x256xf32>
    %cst_165 = arith.constant 0.000000e+00 : f32
    %305 = vector.shape_cast %18 : vector<1x256xi1> to vector<1x256xi1>
    %306 = vector.broadcast %305 : vector<1x256xi1> to vector<8x256xi1>
    %307 = vector.broadcast %cst_165 : f32 to vector<8x256xf32>
    %308 = arith.select %306, %304, %307 : vector<8x256xi1>, vector<8x256xf32>
    %309 = vector.extract_strided_slice %292 {offsets = [0, 17], sizes = [8, 256], strides = [1, 1]} : vector<8x290xf32> to vector<8x256xf32>
    %310 = vector.extract_strided_slice %292 {offsets = [0, 18], sizes = [8, 256], strides = [1, 1]} : vector<8x290xf32> to vector<8x256xf32>
    %cst_166 = arith.constant 0.000000e+00 : f32
    %311 = vector.shape_cast %20 : vector<1x256xi1> to vector<1x256xi1>
    %312 = vector.broadcast %311 : vector<1x256xi1> to vector<8x256xi1>
    %313 = vector.broadcast %cst_166 : f32 to vector<8x256xf32>
    %314 = arith.select %312, %310, %313 : vector<8x256xi1>, vector<8x256xf32>
    %315 = vector.extract_strided_slice %292 {offsets = [0, 32], sizes = [8, 256], strides = [1, 1]} : vector<8x290xf32> to vector<8x256xf32>
    %cst_167 = arith.constant 0.000000e+00 : f32
    %316 = vector.shape_cast %18 : vector<1x256xi1> to vector<1x256xi1>
    %317 = vector.broadcast %316 : vector<1x256xi1> to vector<8x256xi1>
    %318 = vector.broadcast %cst_167 : f32 to vector<8x256xf32>
    %319 = arith.select %317, %315, %318 : vector<8x256xi1>, vector<8x256xf32>
    %320 = vector.extract_strided_slice %292 {offsets = [0, 33], sizes = [8, 256], strides = [1, 1]} : vector<8x290xf32> to vector<8x256xf32>
    %321 = vector.extract_strided_slice %292 {offsets = [0, 34], sizes = [8, 256], strides = [1, 1]} : vector<8x290xf32> to vector<8x256xf32>
    %cst_168 = arith.constant 0.000000e+00 : f32
    %322 = vector.shape_cast %20 : vector<1x256xi1> to vector<1x256xi1>
    %323 = vector.broadcast %322 : vector<1x256xi1> to vector<8x256xi1>
    %324 = vector.broadcast %cst_168 : f32 to vector<8x256xf32>
    %325 = arith.select %323, %321, %324 : vector<8x256xi1>, vector<8x256xf32>
    %326 = tpu.concatenate %297, %298, %303, %308, %309, %314, %319, %320, %325 in 0 : vector<8x256xf32>, vector<8x256xf32>, vector<8x256xf32>, vector<8x256xf32>, vector<8x256xf32>, vector<8x256xf32>, vector<8x256xf32>, vector<8x256xf32>, vector<8x256xf32> -> vector<72x256xf32>
    %c0_169 = arith.constant 0 : index
    %c0_170 = arith.constant 0 : index
    %327 = vector.load %arg12[%c0_169, %c0_170] : memref<3x72xbf16, #tpu.memory_space<vmem>>, vector<3x72xbf16>
    %328 = arith.truncf %326 : vector<72x256xf32> to vector<72x256xbf16>
    %cst_171 = arith.constant dense<0.000000e+00> : vector<3x256xf32>
    %329 = tpu.matmul %327, %328, %cst_171 {dimension_numbers = #tpu.dot_dimension_numbers<[1], [0], [0], [1], [0, 0, 1, 1], [], []>} : vector<3x72xbf16>, vector<72x256xbf16>, vector<3x256xf32> -> vector<3x256xf32>
    %c0_172 = arith.constant 0 : index
    %c0_173 = arith.constant 0 : index
    %330 = vector.load %arg13[%c0_172, %c0_173] : memref<3x1xf32, #tpu.memory_space<vmem>>, vector<3x1xf32>
    %331 = vector.broadcast %330 : vector<3x1xf32> to vector<3x256xf32>
    %332 = arith.addf %329, %331 : vector<3x256xf32>
    %333 = arith.negf %332 : vector<3x256xf32>
    %334 = math.exp %333 : vector<3x256xf32>
    %cst_174 = arith.constant 1.000000e+00 : f32
    %335 = vector.broadcast %cst_174 : f32 to vector<3x256xf32>
    %336 = arith.addf %335, %334 : vector<3x256xf32>
    %337 = arith.divf %335, %336 : vector<3x256xf32>
    %c0_175 = arith.constant 0 : index
    %c0_176 = arith.constant 0 : index
    %c0_177 = arith.constant 0 : index
    %338 = vector.load %arg14[%c0_175, %c0_176, %c0_177] : memref<1x3x256xf32, #tpu.memory_space<vmem>>, vector<1x3x256xf32>
    %339 = vector.shape_cast %338 : vector<1x3x256xf32> to vector<3x256xf32>
    %340 = vector.shape_cast %337 : vector<3x256xf32> to vector<1x3x256xf32>
    tpu.vector_store %arg14[%c0_175, %c0_176, %c0_177], %340 {strides = array<i32>} : memref<1x3x256xf32, #tpu.memory_space<vmem>>, vector<1x3x256xf32>,
    return
  }
  func.func @transform_0(%arg0: i32) -> (i32, i32, i32) {
    %c0_i32 = arith.constant 0 : i32
    %c0_i32_0 = arith.constant 0 : i32
    %c0_i32_1 = arith.constant 0 : i32
    return %arg0, %c0_i32, %c0_i32_0 : i32, i32, i32
  }
  func.func @transform_1(%arg0: i32) -> (i32, i32) {
    %c0_i32 = arith.constant 0 : i32
    %c0_i32_0 = arith.constant 0 : i32
    %c0_i32_1 = arith.constant 0 : i32
    return %c0_i32, %c0_i32_0 : i32, i32
  }
  func.func @transform_2(%arg0: i32) -> (i32, i32) {
    %c0_i32 = arith.constant 0 : i32
    %c0_i32_0 = arith.constant 0 : i32
    %c0_i32_1 = arith.constant 0 : i32
    return %c0_i32, %c0_i32_0 : i32, i32
  }
  func.func @transform_3(%arg0: i32) -> (i32, i32) {
    %c0_i32 = arith.constant 0 : i32
    %c0_i32_0 = arith.constant 0 : i32
    %c0_i32_1 = arith.constant 0 : i32
    return %c0_i32, %c0_i32_0 : i32, i32
  }
  func.func @transform_4(%arg0: i32) -> (i32, i32) {
    %c0_i32 = arith.constant 0 : i32
    %c0_i32_0 = arith.constant 0 : i32
    %c0_i32_1 = arith.constant 0 : i32
    return %c0_i32, %c0_i32_0 : i32, i32
  }
  func.func @transform_5(%arg0: i32) -> (i32, i32, i32) {
    %c0_i32 = arith.constant 0 : i32
    %c0_i32_0 = arith.constant 0 : i32
    %c0_i32_1 = arith.constant 0 : i32
    %c0_i32_2 = arith.constant 0 : i32
    return %c0_i32, %c0_i32_0, %c0_i32_1 : i32, i32, i32
  }
  func.func @transform_6(%arg0: i32) -> (i32, i32) {
    %c0_i32 = arith.constant 0 : i32
    %c0_i32_0 = arith.constant 0 : i32
    %c0_i32_1 = arith.constant 0 : i32
    return %c0_i32, %c0_i32_0 : i32, i32
  }
  func.func @transform_7(%arg0: i32) -> (i32, i32, i32) {
    %c0_i32 = arith.constant 0 : i32
    %c0_i32_0 = arith.constant 0 : i32
    %c0_i32_1 = arith.constant 0 : i32
    %c0_i32_2 = arith.constant 0 : i32
    return %c0_i32, %c0_i32_0, %c0_i32_1 : i32, i32, i32
  }
  func.func @transform_8(%arg0: i32) -> (i32, i32) {
    %c0_i32 = arith.constant 0 : i32
    %c0_i32_0 = arith.constant 0 : i32
    %c0_i32_1 = arith.constant 0 : i32
    return %c0_i32, %c0_i32_0 : i32, i32
  }
  func.func @transform_9(%arg0: i32) -> (i32, i32) {
    %c0_i32 = arith.constant 0 : i32
    %c0_i32_0 = arith.constant 0 : i32
    %c0_i32_1 = arith.constant 0 : i32
    return %c0_i32, %c0_i32_0 : i32, i32
  }
  func.func @transform_10(%arg0: i32) -> (i32, i32) {
    %c0_i32 = arith.constant 0 : i32
    %c0_i32_0 = arith.constant 0 : i32
    %c0_i32_1 = arith.constant 0 : i32
    return %c0_i32, %c0_i32_0 : i32, i32
  }
  func.func @transform_11(%arg0: i32) -> (i32, i32) {
    %c0_i32 = arith.constant 0 : i32
    %c0_i32_0 = arith.constant 0 : i32
    %c0_i32_1 = arith.constant 0 : i32
    return %c0_i32, %c0_i32_0 : i32, i32
  }
  func.func @transform_12(%arg0: i32) -> (i32, i32) {
    %c0_i32 = arith.constant 0 : i32
    %c0_i32_0 = arith.constant 0 : i32
    %c0_i32_1 = arith.constant 0 : i32
    return %c0_i32, %c0_i32_0 : i32, i32
  }
  func.func @transform_13(%arg0: i32) -> (i32, i32, i32) {
    %c0_i32 = arith.constant 0 : i32
    %c0_i32_0 = arith.constant 0 : i32
    %c0_i32_1 = arith.constant 0 : i32
    return %arg0, %c0_i32, %c0_i32_0 : i32, i32, i32
  }
}

</mosaic_0001>

<bundles_post_ra>
// kernel: _lambda_.1
= control target key start
LH: loop header
LB: loop body
LE: loop exit
PB: predicated region body
PF: predicated region fallthrough
CT: control target
= control target key end

     0   :  { %18 = vsyncpa [#allocation3], 0  ;;  %s7090_s25 = smov 0   ;;  %s7951_s0 = inlined_call_operand.vmem [shape: f32[2,3,256], index: 0, kind: input, shape index: {}]   ;;  %s7952_s1 = inlined_call_operand.vmem [shape: bf16[8,27], index: 1, kind: input, shape index: {}]   ;;  %s7953_s2 = inlined_call_operand.vmem [shape: f32[8,1], index: 2, kind: input, shape index: {}]   ;;  %s7954_s3 = inlined_call_operand.vmem [shape: bf16[16,72], index: 3, kind: input, shape index: {}]   ;;  %s7955_s4 = inlined_call_operand.vmem [shape: f32[16,1], index: 4, kind: input, shape index: {}]   ;;  %s7956_s5 = inlined_call_operand.hbm [shape: bf16[16,256,32], index: 5, kind: input, shape index: {}]   ;;  %s7957_s6 = inlined_call_operand.vmem [shape: f32[1,32], index: 6, kind: input, shape index: {}]   ;;  %s7958_s7 = inlined_call_operand.vmem [shape: bf16[16,32,256], index: 7, kind: input, shape index: {}]   ;;  %s7959_s8 = inlined_call_operand.vmem [shape: f32[16,256], index: 8, kind: input, shape index: {}]   ;;  %s7960_s9 = inlined_call_operand.vmem [shape: bf16[8,144], index: 9, kind: input, shape index: {}]   ;;  %s7961_s10 = inlined_call_operand.vmem [shape: f32[8,1], index: 10, kind: input, shape index: {}]   ;;  %s7962_s11 = inlined_call_operand.vmem [shape: bf16[3,72], index: 11, kind: input, shape index: {}]   ;;  %s7963_s12 = inlined_call_operand.vmem [shape: f32[3,1], index: 12, kind: input, shape index: {}]   ;;  %s7964_s13 = inlined_call_operand.vmem [shape: f32[2,3,256], index: 13, kind: output, shape index: {}]  }
   0x1 LB: > { %s7096_s26 = sadd.s32 4294967295, %s7003_s25   ;;  %p5445_p0 = scmp.ge.s32.totalorder %s7003_s25, 1  ;;  %s7003_s25 = sphi %s7090_s25, %s24_s25  }
   0x2   : > { %p333_p1 = scmp.lt.s32.totalorder %s7003_s25, 3  ;;  %s7005_s27 = smov [#allocation2]  }
   0x3   : > { %s357_s28 = sshll.u32 %s7005_s27, 4  ;;  %p7965_p3 = scmp.eq.s32.totalorder %s7096_s26, 0  ;;  %s358_s28 = int_to_ptr.vmem [resolvable:$true] %s357_s28 }
   0x4   : > { %p7100_p2 = pnand %p5445_p0, %p333_p1  ;;  %s6965_s16 = scalar_lea.hbm %s7956_s5, 32768 }
   0x5   : > { %p6966_p6 = scmp.ne.s32.totalorder %s7956_s5, %s6965_s16  ;;  %p6972_p10 = scmp.lt.u32.totalorder %s6965_s16, %s7956_s5 }
   0x6   : > { %s7996_s29 = scalar_select %p7100_p2, 1, 0 }
   0x7   : > { %p6305_p4 = pneg %p7100_p2 }
   0x9   : > { %p7109_p5 = pnand %p7965_p3, %p6305_p4 }
   0xb   : > { %p6967_p7 = pneg %p7109_p5 }
   0xd   : > { %p6968_p8 = pnand %p6967_p7, %p6966_p6 }
   0xf   : > { %p6969_p9 = pneg %p6968_p8 }
  0x11   : > { %p6974_p11 = pnand %p6972_p10, %p6969_p9 }
  0x13   : > { %6977 = shalt.err (!%p6974_p11)
}
  0x14   : > { %s6978_s21 = scalar_lea.vmem %s358_s28, 32768  ;;  %p6986_p1 = scmp.lt.s32.totalorder %s358_s28, %s358_s28 }
  0x15   : > { %p6979_p12 = scmp.ne.s32.totalorder %s358_s28, %s6978_s21  ;;  %p6987_p4 = scmp.lt.s32.totalorder %s6978_s21, %s6978_s21 }
  0x17   : > { %p6981_p13 = pnand %p6979_p12, %p6967_p7  ;;  %p6988_p3 = por %p6987_p4, %p6986_p1 }
  0x19   : > { %p6982_p0 = pneg %p6981_p13 }
  0x1b   : > { %p6989_p2 = pnand %p6988_p3, %p6982_p0 }
  0x1d   : > { %6992 = shalt.err (!%p6989_p2)
}
  0x1e   : > { %s7006_s22 = smov 64   ;;  %s7007_s23 = smov 4  }
  0x1f   : > { %6308 = dma.hbm_to_vmem [thread:$0]  (!%p7109_p5), %s7956_s5, 32768, %s358_s28, [#allocation3], %s7006_s22, %s7006_s22, %s7007_s23  }
  0x20   : > { %p7998_p6 = scmp.ne.s32.totalorder %s7996_s29, 0 }
  0x21   : > { %p7999_p8 = scmp.eq.s32.totalorder (!%p7998_p6), %s7096_s26, 0 }
  0x22   : > { %402 = sbr.rel (%p7998_p6) target bundleno = 2789 (0xae5), region = 72 }
  0x29   : > { %6998 = dma.done.wait (%p7999_p8), [#allocation3], 32768   ;;  %p8000_p7 = pmov %p7999_p8 }
  0x2a   : > { %p446_p2 = scmp.lt.s32.totalorder %s7096_s26, 1  ;;  %s7008_s15 = smov 17   ;;  %vm7969_vm0 = vcmask 138240   ;;  %v7017_v21 = vmov 0   ;;  %v671_v23 = vld [vmem:[%s7953_s2] sm:$0xff]  ;;  %v457_v24 = vlaneseq  ;;  %vm7967_vm2 = vcmask 916480  }
  0x2b   : > { %7000 = vsyncadd (%p8000_p7), [#allocation3], 4294934528  ;;  %s7009_s16 = smov 112   ;;  %s7010_s17 = smov 126   ;;  %721 = vmatprep.mubr.bf16.mxu0 %v7017_v21  ;;  %6379 = vset.pattern.permute.xlu1 %v7017_v21  ;;  %vm7970_vm6 = vcmask 900096   ;;  %vm7968_vm7 = vcmask 785408  }
  0x2c   : > { %s8138_s26 = smov (!%p446_p2, %s7096_s26), 1  ;;  %s7987_s18 = smov 110   ;;  %909 = vmatprep.mubr.bf16.mxu1 %v7017_v21  ;;  %6425 = vset.pattern.permute.xlu0 %v7017_v21  ;;  %v458_v25 = vand.u32 127, %v457_v24  ;;  %vm7976_vm8 = vcmask 1031168   ;;  %vm7992_vm9 = vcmask 769024   ;;  %vm7971_vm10 = vcmask 908288  }
  0x2d   : > { %s7980_s30 = sshll.u32 %s8138_s26, 3  ;;  %s7985_s19 = smov 96   ;;  %vm7978_vm11 = vcmask 1040384   ;;  %vm7975_vm13 = vcmask 1044480   ;;  %vm7979_vm14 = vcmask 1043456   ;;  %vm7993_vm15 = vcmask 777216  }
  0x2e   : > { %s450_s29 = scalar_lea.vmem %s7951_s0, %s7980_s30  ;;  %s7013_s20 = smov 127   ;;  %v459_v28 = vadd.s32 128, %v458_v25  ;;  %v464_v32 = vand.u32 15, %v458_v25  ;;  %vm7972_vm12 = vcmask 1046528  }
  0x2f   : > { %v488_v0 = vld [vmem:[%s450_s29] sm:$0x77]  ;;  %s7014_s21 = smov 111   ;;  %s7981_s22 = smov 94  }
  0x30   : > { %v490_v1 = vcombine.high %v488_v0, %v488_v0  ;;  %s7983_s23 = smov 95   ;;  %v471_v31 = vand.u32 15, %v459_v28  ;;  %vm7192_vm3 = vcmp.ge.s32.totalorder %v464_v32, 1  ;;  %vm7196_vm4 = vcmp.le.s32.totalorder %v464_v32, 14  ;;  %s8072_s14 = smov 95  }
  0x32   : > { %v6334_v2 = vpack.i.bf16 %v490_v1, %v488_v0  ;;  %vm7188_vm1 = vcmp.ge.s32.totalorder %v471_v31, 1  ;;  %vm7200_vm5 = vcmp.le.s32.totalorder %v471_v31, 14 }
  0x34   : > { %6335 = vrot.lane.b32.xlu0 %v6334_v2, %s7008_s15 }
  0xa6   : > { %v6336_v3 = vpop.permute.xlu0 %6335 }
  0xa7   : > { %v6338_v4 = vunpack.i.h.bf16 %v6336_v3  ;;  %v6337_v5 = vunpack.i.l.bf16 %v6336_v3 }
  0xa9   : > { %v501_v6 = vsel %vm7969_vm0, %v6338_v4, 0.0  ;;  %v7148_v7 = vsel %vm7969_vm0, %v6337_v5, %v6338_v4  ;;  %v7151_v8 = vsel %vm7969_vm0, 0.0, %v6337_v5  ;;  %vm7974_vm0 = vcmask 1045504  }
  0xaa   : > { %527 = vrot.lane.b32.xlu0 %v7151_v8, %s7009_s16  ;;  %514 = vrot.lane.b32.xlu1 %v7151_v8, %s7010_s17  ;;  %v6344_v9 = vpack.i.bf16 %v501_v6, %v7148_v7  ;;  %v579_v10 = vrot.slane %v7151_v8, 5  ;;  %v605_v11 = vrot.slane %v7151_v8, 4  ;;  %v606_v12 = vrot.slane %v7148_v7, 4 }
  0xab   : > { %v607_v13 = vrot.slane %v501_v6, 4  ;;  %v632_v14 = vrot.slane %v7148_v7, 3  ;;  %v633_v15 = vrot.slane %v501_v6, 3  ;;  %v580_v16 = vrot.slane %v7148_v7, 5 }
  0xac   : > { %v581_v18 = vrot.slane %v501_v6, 5  ;;  %v631_v22 = vrot.slane %v7151_v8, 3  ;;  %v507_v46 = vsel %vm7188_vm1, %v7148_v7, 0.0  ;;  %v506_v52 = vsel %vm7192_vm3, %v7151_v8, 0.0 }
  0xad   : > { %v6369_v17 = vpack.i.bf16 %v607_v13, %v606_v12  ;;  %v6374_v19 = vpack.i.bf16 %v633_v15, %v632_v14 }
  0xae   : > { %540 = vrot.lane.b32.xlu0 %v7151_v8, %s7987_s18  ;;  %6345 = vrot.lane.b32.xlu1 %v6344_v9, %s7009_s16  ;;  %v6364_v20 = vpack.i.bf16 %v581_v18, %v580_v16 }
  0xb2   : > { %553 = vrot.lane.b32.xlu0 %v7151_v8, %s7985_s19  ;;  %6350 = vrot.lane.b32.xlu1 %v6344_v9, %s7987_s18 }
  0xb6   : > { %6355 = vrot.lane.b32.xlu1 %v6344_v9, %s7985_s19  ;;  %6340 = vrot.lane.b32.xlu0 %v6344_v9, %s7010_s17 }
  0xba   : > { %582 = vrot.lane.b32.xlu1 %v579_v10, %s7013_s20  ;;  %608 = vrot.lane.b32.xlu0 %v605_v11, %s7014_s21 }
  0xbe   : > { %6360 = vrot.lane.b32.xlu1 %v6344_v9, %s7981_s22  ;;  %6370 = vrot.lane.b32.xlu0 %v6369_v17, %s7014_s21 }
  0xc2   : > { %6375 = vrot.lane.b32.xlu0 %v6374_v19, %s7983_s23  ;;  %6365 = vrot.lane.b32.xlu1 %v6364_v20, %s7013_s20  ;;  %v7018_v20 = vmov 65535  }
  0xc6   : > { %634 = vrot.lane.b32.xlu0 %v631_v22, %s7983_s23  ;;  %566 = vrot.lane.b32.xlu1 %v7151_v8, %s7981_s22  ;;  %v681_v22 = vsel %vm7975_vm13, 4294967295, %v7018_v20 }
  0xca   : > { %674 = vperm.xlu1 %6379, %v671_v23  }
 0x11c   : > { %v528_v26 = vpop.permute.xlu0 %527  ;;  %v515_v27 = vpop.permute.xlu1 %514 }
 0x120   : > { %v541_v29 = vpop.permute.xlu0 %540  ;;  %v6346_v30 = vpop.permute.xlu1 %6345 }
 0x121   : > { %v6348_v33 = vunpack.i.h.bf16 %v6346_v30  ;;  %v6347_v34 = vunpack.i.l.bf16 %v6346_v30 }
 0x123   : > { %v534_v41 = vsel %vm7967_vm2, %v528_v26, %v6347_v34  ;;  %v535_v42 = vsel %vm7967_vm2, %v6347_v34, %v6348_v33  ;;  %vm7973_vm2 = vcmask 1039360  }
 0x124   : > { %v554_v35 = vpop.permute.xlu0 %553  ;;  %v6351_v36 = vpop.permute.xlu1 %6350  ;;  %v538_v53 = vsel %vm7192_vm3, %v534_v41, 0.0  ;;  %v539_v54 = vsel %vm7188_vm1, %v535_v42, 0.0 }
 0x125   : > { %v6353_v43 = vunpack.i.h.bf16 %v6351_v36  ;;  %v6352_v47 = vunpack.i.l.bf16 %v6351_v36  ;;  %v601_v5 = vrot.slane %v538_v53, 7  ;;  %v602_v6 = vrot.slane %v539_v54, 7 }
 0x127   : > { %v547_v61 = vsel %vm7970_vm6, %v541_v29, %v6352_v47  ;;  %v548_v62 = vsel %vm7970_vm6, %v6352_v47, %v6353_v43  ;;  %vm8009_vm6 = vcmask 1041408  }
 0x128   : > { %v6356_v44 = vpop.permute.xlu1 %6355  ;;  %v6341_v45 = vpop.permute.xlu0 %6340  ;;  %v551_v9 = vsel %vm7196_vm4, %v547_v61, 0.0  ;;  %v552_v12 = vsel %vm7200_vm5, %v548_v62, 0.0 }
 0x129   : > { %v6358_v48 = vunpack.i.h.bf16 %v6356_v44  ;;  %v6357_v49 = vunpack.i.l.bf16 %v6356_v44  ;;  %v6343_v50 = vunpack.i.h.bf16 %v6341_v45  ;;  %v6342_v51 = vunpack.i.l.bf16 %v6341_v45 }
 0x12a   : > { %v622_v30 = vrot.slane %v552_v12, 1  ;;  %v682_v44 = vsel %vm7974_vm0, %v681_v22, 0 }
 0x12b   : > { %v560_v55 = vsel %vm7968_vm7, %v554_v35, %v6357_v49  ;;  %v561_v56 = vsel %vm7968_vm7, %v6357_v49, %v6358_v48  ;;  %v521_v57 = vsel %vm7976_vm8, %v515_v27, %v6342_v51  ;;  %v522_v58 = vsel %vm7976_vm8, %v6342_v51, %v6343_v50 }
 0x12c   : > { %v583_v59 = vpop.permute.xlu1 %582  ;;  %v609_v60 = vpop.permute.xlu0 %608  ;;  %v526_v63 = vsel %vm7200_vm5, %v522_v58, 0.0  ;;  %v525_v0 = vsel %vm7196_vm4, %v521_v57, 0.0  ;;  %vm7977_vm7 = vcmask 1042432   ;;  %v564_v2 = vsel %vm7192_vm3, %v560_v55, 0.0 }
 0x12d   : > { %v596_v1 = vrot.slane %v526_v63, 2  ;;  %v565_v3 = vsel %vm7188_vm1, %v561_v56, 0.0  ;;  %v595_v4 = vrot.slane %v525_v0, 2  ;;  %v627_v17 = vrot.slane %v564_v2, 6 }
 0x12e   : > { %v628_v18 = vrot.slane %v565_v3, 6  ;;  %v621_v27 = vrot.slane %v551_v9, 1 }
 0x12f   : > { %v653_v19 = vsel %vm7978_vm11, %v596_v1, %v602_v6  ;;  %v652_v26 = vsel %vm7978_vm11, %v595_v4, %v601_v5 }
 0x130   : > { %v6361_v10 = vpop.permute.xlu1 %6360  ;;  %v6371_v11 = vpop.permute.xlu0 %6370  ;;  %v661_v41 = vsel %vm8009_vm6, %v621_v27, %v627_v17 }
 0x131   : > { %v6363_v13 = vunpack.i.h.bf16 %v6361_v10  ;;  %v6362_v14 = vunpack.i.l.bf16 %v6361_v10  ;;  %v6373_v15 = vunpack.i.h.bf16 %v6371_v11  ;;  %v6372_v16 = vunpack.i.l.bf16 %v6371_v11 }
 0x133   : > { %v574_v23 = vsel %vm7992_vm9, %v6362_v14, %v6363_v13  ;;  %v615_v24 = vsel %vm7971_vm10, %v609_v60, %v6372_v16  ;;  %v616_v25 = vsel %vm7971_vm10, %v6372_v16, %v6373_v15  ;;  %vm8010_vm10 = vmmov %vm8009_vm6  ;;  %vm677_vm6 = vcmask 220160  }
 0x134   : > { %v6376_v28 = vpop.permute.xlu0 %6375  ;;  %v6366_v29 = vpop.permute.xlu1 %6365  ;;  %v656_v31 = vsel %vm7979_vm14, %v653_v19, %v616_v25  ;;  %v655_v32 = vsel %vm7979_vm14, %v652_v26, %v615_v24  ;;  %v578_v42 = vsel %vm7200_vm5, %v574_v23, 0.0  ;;  %v662_v43 = vsel %vm8010_vm10, %v622_v30, %v628_v18  ;;  %v850_v23 = vld [vmem:[%s7955_s4] sm:$0xff]  ;;  %v851_v24 = vld [vmem:[%s7955_s4 + $0x8] sm:$0xff] }
 0x135   : > { %v6378_v33 = vunpack.i.h.bf16 %v6376_v28  ;;  %v6377_v34 = vunpack.i.l.bf16 %v6376_v28  ;;  %v6368_v35 = vunpack.i.h.bf16 %v6366_v29  ;;  %v6367_v36 = vunpack.i.l.bf16 %v6366_v29  ;;  %v6603_v25 = vld [vmem:[#allocation2 + $0x40] sm:$0xff]   ;;  %v6608_v28 = vld [vmem:[#allocation2 + $0x8] sm:$0xff]   ;;  %v6611_v29 = vld [vmem:[#allocation2 + $0x50] sm:$0xff]  }
 0x136   : > { %v659_v49 = vsel %vm7972_vm12, %v656_v31, %v622_v30  ;;  %v658_v55 = vsel %vm7972_vm12, %v655_v32, %v621_v27  ;;  %vm8011_vm10 = vcmask 138240   ;;  %v6604_v26 = vld [vmem:[#allocation2] sm:$0xff]   ;;  %v6607_v27 = vld [vmem:[#allocation2 + $0x48] sm:$0xff]   ;;  %v6612_v30 = vld [vmem:[#allocation2 + $0x10] sm:$0xff]  }
 0x137   : > { %v642_v45 = vsel %vm7993_vm15, %v6377_v34, %v6378_v33  ;;  %v589_v47 = vsel %vm7973_vm2, %v583_v59, %v6367_v36  ;;  %v590_v48 = vsel %vm7973_vm2, %v6367_v36, %v6368_v35  ;;  %v6615_v31 = vld [vmem:[#allocation2 + $0x58] sm:$0xff]   ;;  %v6619_v33 = vld [vmem:[#allocation2 + $0x60] sm:$0xff]   ;;  %v6623_v35 = vld [vmem:[#allocation2 + $0x68] sm:$0xff]  }
 0x138   : > { %v635_v50 = vpop.permute.xlu0 %634  ;;  %v567_v51 = vpop.permute.xlu1 %566  ;;  %v647_v53 = vsel %vm7977_vm7, %v507_v46, %v590_v48  ;;  %v646_v54 = vsel %vm7977_vm7, %v506_v52, %v589_v47  ;;  %v665_v56 = vsel %vm7975_vm13, %v662_v43, %v642_v45  ;;  %v6616_v32 = vld [vmem:[#allocation2 + $0x18] sm:$0xff]   ;;  %v6624_v36 = vld [vmem:[#allocation2 + $0x28] sm:$0xff]   ;;  %vm8022_vm7 = vcmask 900096  }
 0x139   : > { %v641_v57 = vsel %vm7993_vm15, %v635_v50, %v6377_v34  ;;  %v573_v58 = vsel %vm7992_vm9, %v567_v51, %v6362_v14  ;;  %v650_v59 = vsel %vm7974_vm0, %v647_v53, %v596_v1  ;;  %v649_v7 = vsel %vm7974_vm0, %v646_v54, %v595_v4  ;;  %v666_v1 = vld [vmem:[%s7952_s1] sm:$0xf]  ;;  %vm8023_vm11 = vmmov %vm8022_vm7 }
 0x13a   : > { %v664_v46 = vsel %vm7975_vm13, %v661_v41, %v641_v57  ;;  %v577_v60 = vsel %vm7196_vm4, %v573_v58, 0.0  ;;  %v668_v8 = vpack.c.bf16 %v659_v49, %v650_v59  ;;  %v667_v61 = vpack.c.bf16 %v658_v55, %v649_v7  ;;  %v6620_v34 = vld [vmem:[#allocation2 + $0x20] sm:$0xff]   ;;  %vm7991_vm13 = vmpackc.low %vm7188_vm1, %vm7200_vm5 }
 0x13b   : > { %v669_v52 = vpack.c.bf16 %v577_v60, %v664_v46  ;;  %v670_v62 = vpack.c.bf16 %v578_v42, %v665_v56 }
 0x13c   : > { %689 = vmatprep.subr.bf16.mxu0 %v668_v8 }
 0x13d   : > { %690 = vmatpush1.bf16.msra.mxu0 %v667_v61  ;;  %v687_v63 = vand.u32 %v682_v44, %v670_v62  ;;  %v684_v0 = vand.u32 %v682_v44, %v669_v52 }
 0x13f   : > { %691 = vmatprep.subr.bf16.mxu0 %v687_v63 }
 0x141   : > { %692 = vmatpush1.bf16.msra.mxu0 %v684_v0 }
 0x142   : > { %5949 = vmatprep.subr.bf16.mxu0 %v6603_v25 }
 0x144   : > { %5454 = vmatmul.mubr.msk.bf16.vlgmr.msra.gmra.mrb[0].mxu0 %vm677_vm6, %v666_v1  ;;  %vm8012_vm6 = vmmov %vm8011_vm10 }
 0x145   : > { %vm8013_vm12 = vmmov %vm8012_vm6  ;;  %5950 = vmatpush3.bf16.msra.mxu0 %v6604_v26 }
 0x146   : > { %5951 = vmatprep.subr.bf16.mxu0 %v6607_v27 }
 0x149   : > { %v675_v2 = vpop.permute.xlu1 %674  ;;  %5952 = vmatpush3.bf16.msra.mxu0 %v6608_v28 }
 0x14a   : > { %5953 = vmatprep.subr.bf16.mxu0 %v6611_v29 }
 0x14d   : > { %5954 = vmatpush3.bf16.msra.mxu0 %v6612_v30 }
 0x14e   : > { %5955 = vmatprep.subr.bf16.mxu0 %v6615_v31 }
 0x151   : > { %5956 = vmatpush3.bf16.msra.mxu0 %v6616_v32 }
 0x152   : > { %5957 = vmatprep.subr.bf16.mxu0 %v6619_v33 }
 0x155   : > { %5958 = vmatpush3.bf16.msra.mxu0 %v6620_v34 }
 0x156   : > { %5959 = vmatprep.subr.bf16.mxu0 %v6623_v35 }
 0x159   : > { %5960 = vmatpush3.bf16.msra.mxu0 %v6624_v36 }
 0x217   : > { %v723_v3 = vpop.f32.mrb[0].mxu0 }
 0x218   : > { %v724_v4 = vadd.f32 %v723_v3, %v675_v2  ;;  %v725_v5 = vpop.f32.mrb[1].mxu0 }
 0x219   : > { %v726_v6 = vadd.f32 %v725_v5, %v675_v2  ;;  %v727_v9 = vpop.f32.mrb[2].mxu0 }
 0x21a   : > { %v730_v10 = vmax.f32 %v724_v4, 0.0  ;;  %v728_v11 = vpop.f32.mrb[3].mxu0 }
 0x21b   : > { %v731_v12 = vmax.f32 %v726_v6, 0.0 }
 0x21d   : > { %v6380_v13 = vpack.i.bf16 %v731_v12, %v730_v10 }
 0x21f   : > { %6381 = vrot.lane.b32.xlu0 %v6380_v13, %s7008_s15 }
 0x291   : > { %v6382_v14 = vpop.permute.xlu0 %6381 }
 0x292   : > { %v6383_v15 = vunpack.i.l.bf16 %v6382_v14  ;;  %v6384_v17 = vunpack.i.h.bf16 %v6382_v14 }
 0x294   : > { %v7275_v16 = vsel %vm8011_vm10, 0.0, %v6383_v15  ;;  %v743_v18 = vsel %vm8012_vm6, %v6384_v17, 0.0  ;;  %v7287_v19 = vsel %vm8013_vm12, %v6383_v15, %v6384_v17  ;;  %vm7019_vm12 = vmmov 1  }
 0x295   : > { %748 = vrot.lane.b32.xlu1 %v7275_v16, %s7010_s17  ;;  %808 = vrot.lane.b32.xlu0 %v7275_v16, %s7013_s20  ;;  %v6385_v20 = vpack.i.bf16 %v743_v18, %v7287_v19  ;;  %v6420_v22 = vpack.i.bf16 %v7287_v19, %v7275_v16  ;;  %vm7317_vm10 = vmpackc.low %vm7019_vm12, %vm7188_vm1  ;;  %v8024_v15 = vmov 0 }
 0x296   : > { %vm7326_vm6 = vmpackc.low %vm7019_vm12, %vm7192_vm3 }
 0x297   : > { %vm7364_vm14 = vmpackc.low %vm7200_vm5, %vm7019_vm12 }
 0x298   : > { %v8025_v15 = vsel %vm7364_vm14, 4294967295, %v8024_v15 }
 0x299   : > { %772 = vrot.lane.b32.xlu1 %v7275_v16, %s7987_s18  ;;  %760 = vrot.lane.b32.xlu0 %v7275_v16, %s7009_s16 }
 0x29d   : > { %784 = vrot.lane.b32.xlu1 %v7275_v16, %s7985_s19  ;;  %818 = vrot.lane.b32.xlu0 %v7275_v16, %s7014_s21 }
 0x2a1   : > { %828 = vrot.lane.b32.xlu0 %v7275_v16, %s7983_s23  ;;  %6386 = vrot.lane.b32.xlu1 %v6385_v20, %s7013_s20 }
 0x2a5   : > { %6396 = vrot.lane.b32.xlu0 %v6385_v20, %s7009_s16  ;;  %6391 = vrot.lane.b32.xlu1 %v6385_v20, %s7010_s17 }
 0x2a9   : > { %6406 = vrot.lane.b32.xlu0 %v6385_v20, %s7014_s21  ;;  %6401 = vrot.lane.b32.xlu1 %v6385_v20, %s7987_s18 }
 0x2ad   : > { %6416 = vrot.lane.b32.xlu0 %v6385_v20, %s7983_s23  ;;  %6411 = vrot.lane.b32.xlu1 %v6385_v20, %s7985_s19  ;;  %v8026_v20 = vmov 0  ;;  %s8071_s23 = smov 96   ;;  %s8073_s19 = smov 94  }
 0x2b1   : > { %800 = vrot.lane.b32.xlu0 %v743_v18, %s7981_s22  ;;  %6421 = vrot.lane.b32.xlu1 %v6420_v22, %s7981_s22  ;;  %s8070_s22 = smov 110  }
 0x2b5   : > { %854 = vperm.xlu1 %6379, %v850_v23   ;;  %859 = vperm.xlu0 %6425, %v851_v24  }
 0x307   : > { %v749_v41 = vpop.permute.xlu1 %748  ;;  %v809_v42 = vpop.permute.xlu0 %808 }
 0x30b   : > { %v773_v43 = vpop.permute.xlu1 %772  ;;  %v761_v44 = vpop.permute.xlu0 %760 }
 0x30f   : > { %v785_v45 = vpop.permute.xlu1 %784  ;;  %v819_v47 = vpop.permute.xlu0 %818 }
 0x313   : > { %v829_v48 = vpop.permute.xlu0 %828  ;;  %v6387_v49 = vpop.permute.xlu1 %6386 }
 0x314   : > { %v6389_v50 = vunpack.i.h.bf16 %v6387_v49  ;;  %v6388_v51 = vunpack.i.l.bf16 %v6387_v49  ;;  %v6602_v49 = vld [vmem:[%s7954_s3] sm:$0xff]  }
 0x316   : > { %v815_v53 = vsel %vm7973_vm2, %v6388_v51, %v6389_v50  ;;  %v814_v55 = vsel %vm7973_vm2, %v809_v42, %v6388_v51  ;;  %vm8018_vm2 = vcmask 916480   ;;  %v6606_v50 = vld [vmem:[#allocation2 + $0x80] sm:$0xff]   ;;  %v6609_v51 = vld [vmem:[#allocation2 + $0xc8] sm:$0xff]  }
 0x317   : > { %v6397_v56 = vpop.permute.xlu0 %6396  ;;  %v6392_v57 = vpop.permute.xlu1 %6391  ;;  %v5457_v58 = vpack.c.bf16 %v815_v53, %v7287_v19  ;;  %v5460_v7 = vpack.c.bf16 %v814_v55, %v7275_v16  ;;  %vm8019_vm0 = vmmov %vm8018_vm2  ;;  %v6610_v53 = vld [vmem:[#allocation2 + $0x88] sm:$0xff]   ;;  %v6613_v55 = vld [vmem:[#allocation2 + $0xd0] sm:$0xff]  }
 0x318   : > { %v6399_v46 = vunpack.i.h.bf16 %v6397_v56  ;;  %v6398_v60 = vunpack.i.l.bf16 %v6397_v56  ;;  %v6394_v8 = vunpack.i.h.bf16 %v6392_v57  ;;  %v6393_v61 = vunpack.i.l.bf16 %v6392_v57  ;;  %v6614_v56 = vld [vmem:[#allocation2 + $0x90] sm:$0xff]   ;;  %v6617_v57 = vld [vmem:[#allocation2 + $0xd8] sm:$0xff]  }
 0x319   : > { %5458 = vmatprep.subr.msk.bf16.mxu1 %vm7317_vm10, %v5457_v58  ;;  %v6618_v58 = vld [vmem:[#allocation2 + $0x98] sm:$0xff]  }
 0x31a   : > { %v766_v52 = vsel %vm8018_vm2, %v761_v44, %v6398_v60  ;;  %v767_v62 = vsel %vm8019_vm0, %v6398_v60, %v6399_v46  ;;  %v754_v63 = vsel %vm7976_vm8, %v749_v41, %v6393_v61  ;;  %v755_v0 = vsel %vm7976_vm8, %v6393_v61, %v6394_v8  ;;  %5461 = vmatpush1.bf16.msk.msra.mxu1 %vm7326_vm6, %v5460_v7  ;;  %vm7990_vm0 = vmpackc.low %vm7192_vm3, %vm7196_vm4  ;;  %v6621_v7 = vld [vmem:[#allocation2 + $0xe0] sm:$0xff]   ;;  %v6625_v60 = vld [vmem:[#allocation2 + $0xe8] sm:$0xff]  }
 0x31b   : > { %v5463_v1 = vpack.c.bf16 %v767_v62, %v755_v0  ;;  %v5466_v2 = vpack.c.bf16 %v766_v52, %v754_v63  ;;  %v6407_v3 = vpop.permute.xlu0 %6406  ;;  %v6402_v4 = vpop.permute.xlu1 %6401  ;;  %vm8020_vm2 = vcmask 908288   ;;  %v6622_v46 = vld [vmem:[#allocation2 + $0xa0] sm:$0xff]   ;;  %v6626_v8 = vld [vmem:[#allocation2 + $0xa8] sm:$0xff]   ;;  %v6627_v61 = vld [vmem:[#allocation2 + $0x70] sm:$0xff]  }
 0x31c   : > { %v6409_v5 = vunpack.i.h.bf16 %v6407_v3  ;;  %v6408_v6 = vunpack.i.l.bf16 %v6407_v3  ;;  %v6404_v9 = vunpack.i.h.bf16 %v6402_v4  ;;  %v6403_v10 = vunpack.i.l.bf16 %v6402_v4  ;;  %vm8021_vm8 = vmmov %vm8020_vm2  ;;  %v6628_v52 = vld [vmem:[#allocation2 + $0x30] sm:$0xff]   ;;  %5961 = vmatprep.subr.bf16.mxu0 %v6627_v61  ;;  %v6631_v0 = vld [vmem:[#allocation2 + $0x78] sm:$0xff]  }
 0x31d   : > { %5464 = vmatprep.subr.msk.bf16.mxu1 %vm7991_vm13, %v5463_v1  ;;  %v6629_v62 = vld [vmem:[#allocation2 + $0xf0] sm:$0xff]   ;;  %5962 = vmatpush3.bf16.msra.mxu0 %v6628_v52  ;;  %v6632_v1 = vld [vmem:[#allocation2 + $0x38] sm:$0xff]   ;;  %v6635_v4 = vld [vmem:[#allocation2 + $0x140] sm:$0xff]   ;;  %vm8052_vm13 = vcmask 1043456  }
 0x31e   : > { %v824_v11 = vsel %vm8020_vm2, %v819_v47, %v6408_v6  ;;  %v825_v12 = vsel %vm8021_vm8, %v6408_v6, %v6409_v5  ;;  %v778_v13 = vsel %vm8022_vm7, %v773_v43, %v6403_v10  ;;  %v779_v14 = vsel %vm8023_vm11, %v6403_v10, %v6404_v9  ;;  %5467 = vmatpush1.bf16.msk.msra.mxu1 %vm7990_vm0, %v5466_v2  ;;  %vm7371_vm7 = vmpackc.low %vm7196_vm4, %vm7019_vm12  ;;  %v6605_v47 = vld [vmem:[#allocation2 + $0xc0] sm:$0xff]   ;;  %v6630_v63 = vld [vmem:[#allocation2 + $0xb0] sm:$0xff]  }
 0x31f   : > { %v5469_v16 = vpack.c.bf16 %v779_v14, %v825_v12  ;;  %v5472_v17 = vpack.c.bf16 %v778_v13, %v824_v11  ;;  %v6417_v18 = vpop.permute.xlu0 %6416  ;;  %v6412_v19 = vpop.permute.xlu1 %6411  ;;  %v8027_v20 = vsel %vm7371_vm7, 4294967295, %v8026_v20  ;;  %vm8028_vm8 = vcmask 785408   ;;  %v6633_v2 = vld [vmem:[#allocation2 + $0xf8] sm:$0xff]   ;;  %5963 = vmatprep.subr.bf16.mxu0 %v6631_v0  ;;  %v6637_v5 = vld [vmem:[#allocation2 + $0x1c0] sm:$0xff]   ;;  %v6662_v52 = vld [vmem:[#allocation2 + $0x1b0] sm:$0xff]  }
 0x320   : > { %v6419_v22 = vunpack.i.h.bf16 %v6417_v18  ;;  %v6418_v23 = vunpack.i.l.bf16 %v6417_v18  ;;  %v6414_v24 = vunpack.i.h.bf16 %v6412_v19  ;;  %v6413_v25 = vunpack.i.l.bf16 %v6412_v19  ;;  %vm8029_vm11 = vmmov %vm8028_vm8  ;;  %v6634_v3 = vld [vmem:[#allocation2 + $0xb8] sm:$0xff]   ;;  %v6667_v0 = vld [vmem:[#allocation2 + $0x240] sm:$0xff]  }
 0x321   : > { %5470 = vmatprep.subr.msk.bf16.mxu1 %vm7364_vm14, %v5469_v16  ;;  %vm8030_vm12 = vcmask 1043456   ;;  %5964 = vmatpush3.bf16.msra.mxu0 %v6632_v1  ;;  %v6663_v61 = vld [vmem:[#allocation2 + $0x178] sm:$0xff]   ;;  %vm8040_vm0 = vcmask 1044480  }
 0x322   : > { %v834_v26 = vsel %vm7993_vm15, %v829_v48, %v6418_v23  ;;  %v835_v27 = vsel %vm7993_vm15, %v6418_v23, %v6419_v22  ;;  %v790_v28 = vsel %vm8028_vm8, %v785_v45, %v6413_v25  ;;  %v791_v29 = vsel %vm8029_vm11, %v6413_v25, %v6414_v24  ;;  %5473 = vmatpush1.bf16.msk.msra.mxu1 %vm7371_vm7, %v5472_v17  ;;  %vm8031_vm2 = vmmov %vm8030_vm12  ;;  %v6666_v1 = vld [vmem:[#allocation2 + $0x1b8] sm:$0xff]  }
 0x323   : > { %v5475_v30 = vpack.c.bf16 %v835_v27, %v791_v29  ;;  %v5478_v31 = vpack.c.bf16 %v834_v26, %v790_v28  ;;  %v6422_v32 = vpop.permute.xlu1 %6421  ;;  %v801_v35 = vpop.permute.xlu0 %800  ;;  %vm7989_vm8 = vcmask 588800   ;;  %5993 = vmatprep.subr.bf16.mxu0 %v6635_v4  ;;  %v6636_v27 = vld [vmem:[#allocation2 + $0x100] sm:$0xff]   ;;  %vm3737_vm11 = vcmask 261120   ;;  %vm7812_vm15 = vmpackc.low %vm7200_vm5, %vm7200_vm5 }
 0x324   : > { %v6424_v33 = vunpack.i.h.bf16 %v6422_v32  ;;  %v6423_v34 = vunpack.i.l.bf16 %v6422_v32 }
 0x325   : > { %5476 = vmatprep.subr.msk.bf16.mxu1 %vm7317_vm10, %v5475_v30  ;;  %v6638_v30 = vld [vmem:[#allocation2 + $0x180] sm:$0xff]  }
 0x326   : > { %v803_v36 = vsel %vm7992_vm9, %v6424_v33, %v801_v35  ;;  %5479 = vmatpush1.bf16.msk.msra.mxu1 %vm7326_vm6, %v5478_v31  ;;  %v802_v41 = vsel %vm7992_vm9, %v6423_v34, %v6424_v33  ;;  %v6639_v31 = vld [vmem:[#allocation2 + $0x148] sm:$0xff]   ;;  %vm8053_vm9 = vmmov %vm8052_vm13 }
 0x327   : > { %v807_v42 = vsel %vm7200_vm5, %v803_v36, 0.0  ;;  %v806_v43 = vsel %vm7196_vm4, %v802_v41, 0.0  ;;  %v6641_v33 = vld [vmem:[#allocation2 + $0x1c8] sm:$0xff]   ;;  %v6643_v36 = vld [vmem:[#allocation2 + $0x150] sm:$0xff]  }
 0x328   : > { %v849_v44 = vpack.c.bf16 %v807_v42, %v807_v42  ;;  %v848_v45 = vpack.c.bf16 %v806_v43, %v806_v43  ;;  %v6640_v35 = vld [vmem:[#allocation2 + $0x108] sm:$0xff]   ;;  %v6645_v42 = vld [vmem:[#allocation2 + $0x1d0] sm:$0xff]  }
 0x329   : > { %v6642_v41 = vld [vmem:[#allocation2 + $0x188] sm:$0xff]   ;;  %v6644_v43 = vld [vmem:[#allocation2 + $0x110] sm:$0xff]  }
 0x32a   : > { %5480 = vmatprep.subr.msk.bf16.mxu1 %vm8030_vm12, %v849_v44  ;;  %v872_v48 = vsel %vm8031_vm2, %v848_v45, 0  ;;  %v6647_v44 = vld [vmem:[#allocation2 + $0x158] sm:$0xff]   ;;  %v6646_v45 = vld [vmem:[#allocation2 + $0x190] sm:$0xff]   ;;  %vm8032_vm12 = vcmask 1040384  }
 0x32b   : > { %886 = vmatpush1.bf16.msra.mxu1 %v872_v48  ;;  %v6648_v48 = vld [vmem:[#allocation2 + $0x118] sm:$0xff]   ;;  %vm8033_vm2 = vmmov %vm8032_vm12 }
 0x32c   : > { %5971 = vmatprep.subr.bf16.mxu1 %v6605_v47  ;;  %v6649_v47 = vld [vmem:[#allocation2 + $0x1d8] sm:$0xff]  }
 0x32e   : > { %5481 = vmatmul.mubr.msk.bf16.vlgmr.msra.gmra.mrb[0].mxu1 %vm7989_vm8, %v6602_v49  ;;  %v6651_v49 = vld [vmem:[#allocation2 + $0x160] sm:$0xff]  }
 0x32f   : > { %5972 = vmatpush3.bf16.msra.mxu1 %v6606_v50  ;;  %v6650_v50 = vld [vmem:[#allocation2 + $0x198] sm:$0xff]  }
 0x330   : > { %5973 = vmatprep.subr.bf16.mxu1 %v6609_v51  ;;  %v6653_v51 = vld [vmem:[#allocation2 + $0x1e0] sm:$0xff]  }
 0x333   : > { %5974 = vmatpush3.bf16.msra.mxu1 %v6610_v53  ;;  %v6652_v53 = vld [vmem:[#allocation2 + $0x120] sm:$0xff]  }
 0x334   : > { %5975 = vmatprep.subr.bf16.mxu1 %v6613_v55  ;;  %v855_v6 = vpop.permute.xlu1 %854  ;;  %v860_v10 = vpop.permute.xlu0 %859  ;;  %v6655_v55 = vld [vmem:[#allocation2 + $0x168] sm:$0xff]  }
 0x337   : > { %5976 = vmatpush3.bf16.msra.mxu1 %v6614_v56  ;;  %v6654_v56 = vld [vmem:[#allocation2 + $0x1a0] sm:$0xff]  }
 0x338   : > { %5977 = vmatprep.subr.bf16.mxu1 %v6617_v57  ;;  %v6657_v57 = vld [vmem:[#allocation2 + $0x1e8] sm:$0xff]  }
 0x33b   : > { %5978 = vmatpush3.bf16.msra.mxu1 %v6618_v58  ;;  %v6656_v58 = vld [vmem:[#allocation2 + $0x128] sm:$0xff]  }
 0x33c   : > { %5979 = vmatprep.subr.bf16.mxu1 %v6621_v7  ;;  %v6659_v7 = vld [vmem:[#allocation2 + $0x170] sm:$0xff]  }
 0x33f   : > { %5980 = vmatpush3.bf16.msra.mxu1 %v6622_v46  ;;  %v6658_v46 = vld [vmem:[#allocation2 + $0x1a8] sm:$0xff]  }
 0x340   : > { %5981 = vmatprep.subr.bf16.mxu1 %v6625_v60  ;;  %v6661_v60 = vld [vmem:[#allocation2 + $0x1f0] sm:$0xff]  }
 0x343   : > { %5982 = vmatpush3.bf16.msra.mxu1 %v6626_v8  ;;  %v6660_v8 = vld [vmem:[#allocation2 + $0x130] sm:$0xff]  }
 0x344   : > { %5983 = vmatprep.subr.bf16.mxu1 %v6629_v62  ;;  %v6665_v62 = vld [vmem:[#allocation2 + $0x1f8] sm:$0xff]  }
 0x347   : > { %5984 = vmatpush3.bf16.msra.mxu1 %v6630_v63  ;;  %v6664_v63 = vld [vmem:[#allocation2 + $0x138] sm:$0xff]  }
 0x348   : > { %5985 = vmatprep.subr.bf16.mxu1 %v6633_v2  ;;  %v6669_v2 = vld [vmem:[#allocation2 + $0x2c0] sm:$0xff]  }
 0x34b   : > { %5986 = vmatpush3.bf16.msra.mxu1 %v6634_v3  ;;  %v6668_v3 = vld [vmem:[#allocation2 + $0x200] sm:$0xff]  }
 0x34c   : > { %6015 = vmatprep.subr.bf16.mxu1 %v6637_v5  ;;  %v6671_v5 = vld [vmem:[#allocation2 + $0x248] sm:$0xff]  }
 0x401   : > { %v911_v9 = vpop.f32.mrb[0].mxu1 }
 0x402   : > { %v912_v11 = vadd.f32 %v911_v9, %v855_v6  ;;  %v913_v12 = vpop.f32.mrb[1].mxu1  ;;  %v6670_v9 = vld [vmem:[#allocation2 + $0x280] sm:$0xff]  }
 0x403   : > { %v914_v13 = vadd.f32 %v913_v12, %v855_v6  ;;  %v915_v14 = vpop.f32.mrb[2].mxu1 }
 0x404   : > { %v916_v16 = vadd.f32 %v915_v14, %v860_v10  ;;  %v917_v17 = vpop.f32.mrb[3].mxu1  ;;  %v920_v19 = vmax.f32 %v912_v11, 0.0  ;;  %v6673_v11 = vld [vmem:[#allocation2 + $0x2c8] sm:$0xff]   ;;  %v6675_v14 = vld [vmem:[#allocation2 + $0x250] sm:$0xff]  }
 0x405   : > { %v918_v18 = vadd.f32 %v917_v17, %v860_v10  ;;  %v921_v23 = vmax.f32 %v914_v13, 0.0  ;;  %v6672_v13 = vld [vmem:[#allocation2 + $0x208] sm:$0xff]   ;;  %v6677_v17 = vld [vmem:[#allocation2 + $0x2d0] sm:$0xff]  }
 0x406   : > { %v922_v22 = vmax.f32 %v916_v16, 0.0  ;;  %v6674_v16 = vld [vmem:[#allocation2 + $0x288] sm:$0xff]  }
 0x407   : > { %v923_v24 = vmax.f32 %v918_v18, 0.0  ;;  %v6676_v18 = vld [vmem:[#allocation2 + $0x210] sm:$0xff]  }
 0x408   : > { %v7399_v25 = vpack.c.bf16 %v922_v22, %v920_v19  ;;  %v6679_v19 = vld [vmem:[#allocation2 + $0x258] sm:$0xff]   ;;  %v6678_v22 = vld [vmem:[#allocation2 + $0x290] sm:$0xff]  }
 0x409   : > { %v7401_v26 = vpack.c.bf16 %v923_v24, %v921_v23  ;;  %v6681_v23 = vld [vmem:[#allocation2 + $0x2d8] sm:$0xff]  }
 0x40a   : > { %v7410_v32 = vshrl.u32 %v7399_v25, 16  ;;  %v1309_v4 = vrot.slane %v7399_v25, 1  ;;  %v6680_v24 = vld [vmem:[#allocation2 + $0x218] sm:$0xff]  }
 0x40b   : > { %1087 = vmatprep.mubr.bf16.mxu0 %v7401_v26  ;;  %v7405_v28 = vshrl.u32 %v7401_v26, 16  ;;  %v1310_v29 = vrot.slane %v7401_v26, 1  ;;  %v1658_v6 = vrot.slane %v7401_v26, 2 }
 0x40c   : > { %1088 = vmatmul.mubr.bf16.vlgmr.msra.gmra.mrb[4].mxu0 %v7399_v25  ;;  %v1483_v10 = vrot.slane %v7410_v32, 1 }
 0x40d   : > { %5994 = vmatpush3.bf16.msra.mxu0 %v6636_v27  ;;  %1265 = vmatprep.mubr.bf16.mxu1 %v7405_v28  ;;  %v1484_v34 = vrot.slane %v7405_v28, 1  ;;  %v1832_v12 = vrot.slane %v7405_v28, 2  ;;  %v6683_v27 = vld [vmem:[#allocation2 + $0x260] sm:$0xff]  }
 0x40e   : > { %1441 = vmatprep.mubr.bf16.mxu0 %v1310_v29  ;;  %1266 = vmatmul.mubr.bf16.vlgmr.msra.gmra.mrb[4].mxu1 %v7410_v32  ;;  %v6682_v29 = vld [vmem:[#allocation2 + $0x298] sm:$0xff]  }
 0x40f   : > { %6016 = vmatpush3.bf16.msra.mxu1 %v6638_v30  ;;  %5995 = vmatprep.subr.bf16.mxu0 %v6639_v31  ;;  %v6685_v30 = vld [vmem:[#allocation2 + $0x2e0] sm:$0xff]  }
 0x410   : > { %1615 = vmatprep.mubr.bf16.mxu1 %v1484_v34  ;;  %6017 = vmatprep.subr.bf16.mxu1 %v6641_v33  ;;  %v6684_v31 = vld [vmem:[#allocation2 + $0x220] sm:$0xff]   ;;  %v6687_v33 = vld [vmem:[#allocation2 + $0x268] sm:$0xff]  }
 0x411   : > { %5996 = vmatpush3.bf16.msra.mxu0 %v6640_v35  ;;  %v6686_v34 = vld [vmem:[#allocation2 + $0x2a0] sm:$0xff]   ;;  %v6689_v35 = vld [vmem:[#allocation2 + $0x2e8] sm:$0xff]  }
 0x412   : > { %5997 = vmatprep.subr.bf16.mxu0 %v6643_v36  ;;  %v6688_v36 = vld [vmem:[#allocation2 + $0x228] sm:$0xff]  }
 0x413   : > { %6018 = vmatpush3.bf16.msra.mxu1 %v6642_v41  ;;  %v6691_v41 = vld [vmem:[#allocation2 + $0x270] sm:$0xff]  }
 0x414   : > { %6019 = vmatprep.subr.bf16.mxu1 %v6645_v42  ;;  %v6690_v42 = vld [vmem:[#allocation2 + $0x2a8] sm:$0xff]  }
 0x415   : > { %5998 = vmatpush3.bf16.msra.mxu0 %v6644_v43  ;;  %v6693_v43 = vld [vmem:[#allocation2 + $0x2f0] sm:$0xff]  }
 0x416   : > { %5999 = vmatprep.subr.bf16.mxu0 %v6647_v44  ;;  %v6692_v44 = vld [vmem:[#allocation2 + $0x230] sm:$0xff]  }
 0x417   : > { %6020 = vmatpush3.bf16.msra.mxu1 %v6646_v45  ;;  %v6695_v45 = vld [vmem:[#allocation2 + $0x278] sm:$0xff]  }
 0x418   : > { %6021 = vmatprep.subr.bf16.mxu1 %v6649_v47  ;;  %v6694_v47 = vld [vmem:[#allocation2 + $0x2b0] sm:$0xff]  }
 0x419   : > { %6000 = vmatpush3.bf16.msra.mxu0 %v6648_v48  ;;  %v6697_v48 = vld [vmem:[#allocation2 + $0x2f8] sm:$0xff]  }
 0x41a   : > { %6001 = vmatprep.subr.bf16.mxu0 %v6651_v49  ;;  %v6696_v49 = vld [vmem:[#allocation2 + $0x238] sm:$0xff]  }
 0x41b   : > { %6022 = vmatpush3.bf16.msra.mxu1 %v6650_v50  ;;  %v6699_v50 = vld [vmem:[#allocation2 + $0x340] sm:$0xff]  }
 0x41c   : > { %6023 = vmatprep.subr.bf16.mxu1 %v6653_v51  ;;  %v6698_v51 = vld [vmem:[#allocation2 + $0x2b8] sm:$0xff]  }
 0x41d   : > { %6002 = vmatpush3.bf16.msra.mxu0 %v6652_v53  ;;  %v6701_v53 = vld [vmem:[#allocation2 + $0x3c0] sm:$0xff]  }
 0x41e   : > { %6003 = vmatprep.subr.bf16.mxu0 %v6655_v55  ;;  %v6700_v55 = vld [vmem:[#allocation2 + $0x300] sm:$0xff]  }
 0x41f   : > { %6024 = vmatpush3.bf16.msra.mxu1 %v6654_v56  ;;  %v1657_v56 = vrot.slane %v7399_v25, 2 }
 0x420   : > { %6025 = vmatprep.subr.bf16.mxu1 %v6657_v57  ;;  %v6703_v57 = vld [vmem:[#allocation2 + $0x348] sm:$0xff]  }
 0x421   : > { %6004 = vmatpush3.bf16.msra.mxu0 %v6656_v58  ;;  %v2006_v58 = vrot.slane %v7401_v26, 3 }
 0x422   : > { %6005 = vmatprep.subr.bf16.mxu0 %v6659_v7  ;;  %v6702_v7 = vld [vmem:[#allocation2 + $0x380] sm:$0xff]  }
 0x423   : > { %6026 = vmatpush3.bf16.msra.mxu1 %v6658_v46  ;;  %v1831_v46 = vrot.slane %v7410_v32, 2 }
 0x424   : > { %6027 = vmatprep.subr.bf16.mxu1 %v6661_v60  ;;  %v6705_v60 = vld [vmem:[#allocation2 + $0x3c8] sm:$0xff]  }
 0x425   : > { %6006 = vmatpush3.bf16.msra.mxu0 %v6660_v8  ;;  %v2180_v8 = vrot.slane %v7405_v28, 3 }
 0x426   : > { %6007 = vmatprep.subr.bf16.mxu0 %v6663_v61  ;;  %v6704_v61 = vld [vmem:[#allocation2 + $0x308] sm:$0xff]  }
 0x427   : > { %6028 = vmatpush3.bf16.msra.mxu1 %v6662_v52  ;;  %v6707_v52 = vld [vmem:[#allocation2 + $0x350] sm:$0xff]  }
 0x428   : > { %6029 = vmatprep.subr.bf16.mxu1 %v6665_v62  ;;  %v6706_v62 = vld [vmem:[#allocation2 + $0x388] sm:$0xff]  }
 0x429   : > { %6008 = vmatpush3.bf16.msra.mxu0 %v6664_v63  ;;  %v6709_v63 = vld [vmem:[#allocation2 + $0x3d0] sm:$0xff]  }
 0x42a   : > { %6037 = vmatprep.subr.bf16.mxu0 %v6667_v0  ;;  %v6708_v0 = vld [vmem:[#allocation2 + $0x310] sm:$0xff]  }
 0x42b   : > { %6030 = vmatpush3.bf16.msra.mxu1 %v6666_v1  ;;  %v6711_v1 = vld [vmem:[#allocation2 + $0x358] sm:$0xff]  }
 0x42c   : > { %1442 = vmatmul.mubr.bf16.vlgmr.msra.gmra.mrb[8].mxu0 %v1309_v4  ;;  %6059 = vmatprep.subr.bf16.mxu1 %v6669_v2  ;;  %v6710_v2 = vld [vmem:[#allocation2 + $0x390] sm:$0xff]   ;;  %v6712_v4 = vld [vmem:[#allocation2 + $0x318] sm:$0xff]  }
 0x42d   : > { %6038 = vmatpush3.bf16.msra.mxu0 %v6668_v3  ;;  %1789 = vmatprep.mubr.bf16.mxu0 %v1658_v6  ;;  %v6713_v3 = vld [vmem:[#allocation2 + $0x3d8] sm:$0xff]  }
 0x42e   : > { %1616 = vmatmul.mubr.bf16.vlgmr.msra.gmra.mrb[8].mxu1 %v1483_v10  ;;  %6039 = vmatprep.subr.bf16.mxu0 %v6671_v5  ;;  %v6715_v5 = vld [vmem:[#allocation2 + $0x360] sm:$0xff]   ;;  %v6714_v6 = vld [vmem:[#allocation2 + $0x398] sm:$0xff]  }
 0x42f   : > { %6060 = vmatpush3.bf16.msra.mxu1 %v6670_v9  ;;  %1963 = vmatprep.mubr.bf16.mxu1 %v1832_v12  ;;  %v6717_v9 = vld [vmem:[#allocation2 + $0x3e0] sm:$0xff]  }
 0x430   : > { %6061 = vmatprep.subr.bf16.mxu1 %v6673_v11  ;;  %v6716_v10 = vld [vmem:[#allocation2 + $0x320] sm:$0xff]   ;;  %v6719_v11 = vld [vmem:[#allocation2 + $0x368] sm:$0xff]  }
 0x431   : > { %6040 = vmatpush3.bf16.msra.mxu0 %v6672_v13  ;;  %v6718_v12 = vld [vmem:[#allocation2 + $0x3a0] sm:$0xff]   ;;  %v6721_v13 = vld [vmem:[#allocation2 + $0x3e8] sm:$0xff]  }
 0x432   : > { %6041 = vmatprep.subr.bf16.mxu0 %v6675_v14  ;;  %v6720_v14 = vld [vmem:[#allocation2 + $0x328] sm:$0xff]  }
 0x433   : > { %6062 = vmatpush3.bf16.msra.mxu1 %v6674_v16  ;;  %v6723_v16 = vld [vmem:[#allocation2 + $0x370] sm:$0xff]  }
 0x434   : > { %6063 = vmatprep.subr.bf16.mxu1 %v6677_v17  ;;  %v6722_v17 = vld [vmem:[#allocation2 + $0x3a8] sm:$0xff]  }
 0x435   : > { %6042 = vmatpush3.bf16.msra.mxu0 %v6676_v18  ;;  %v6725_v18 = vld [vmem:[#allocation2 + $0x3f0] sm:$0xff]  }
 0x436   : > { %6043 = vmatprep.subr.bf16.mxu0 %v6679_v19  ;;  %v6724_v19 = vld [vmem:[#allocation2 + $0x330] sm:$0xff]  }
 0x437   : > { %6064 = vmatpush3.bf16.msra.mxu1 %v6678_v22  ;;  %v6727_v22 = vld [vmem:[#allocation2 + $0x378] sm:$0xff]  }
 0x438   : > { %6065 = vmatprep.subr.bf16.mxu1 %v6681_v23  ;;  %v6726_v23 = vld [vmem:[#allocation2 + $0x3b0] sm:$0xff]  }
 0x439   : > { %6044 = vmatpush3.bf16.msra.mxu0 %v6680_v24  ;;  %v6729_v24 = vld [vmem:[#allocation2 + $0x3f8] sm:$0xff]  }
 0x43a   : > { %6045 = vmatprep.subr.bf16.mxu0 %v6683_v27  ;;  %v6728_v27 = vld [vmem:[#allocation2 + $0x338] sm:$0xff]  }
 0x43b   : > { %6066 = vmatpush3.bf16.msra.mxu1 %v6682_v29  ;;  %v6731_v29 = vld [vmem:[#allocation2 + $0x440] sm:$0xff]  }
 0x43c   : > { %6067 = vmatprep.subr.bf16.mxu1 %v6685_v30  ;;  %v6730_v30 = vld [vmem:[#allocation2 + $0x3b8] sm:$0xff]  }
 0x43d   : > { %6046 = vmatpush3.bf16.msra.mxu0 %v6684_v31  ;;  %v6733_v31 = vld [vmem:[#allocation2 + $0x4c0] sm:$0xff]  }
 0x43e   : > { %6047 = vmatprep.subr.bf16.mxu0 %v6687_v33  ;;  %v6732_v33 = vld [vmem:[#allocation2 + $0x400] sm:$0xff]  }
 0x43f   : > { %6068 = vmatpush3.bf16.msra.mxu1 %v6686_v34  ;;  %v2005_v34 = vrot.slane %v7399_v25, 3 }
 0x440   : > { %6069 = vmatprep.subr.bf16.mxu1 %v6689_v35  ;;  %v6735_v35 = vld [vmem:[#allocation2 + $0x448] sm:$0xff]  }
 0x441   : > { %6048 = vmatpush3.bf16.msra.mxu0 %v6688_v36  ;;  %v2354_v36 = vrot.slane %v7401_v26, 4 }
 0x442   : > { %6049 = vmatprep.subr.bf16.mxu0 %v6691_v41  ;;  %v6734_v41 = vld [vmem:[#allocation2 + $0x480] sm:$0xff]  }
 0x443   : > { %6070 = vmatpush3.bf16.msra.mxu1 %v6690_v42  ;;  %v2179_v42 = vrot.slane %v7410_v32, 3 }
 0x444   : > { %6071 = vmatprep.subr.bf16.mxu1 %v6693_v43  ;;  %v6737_v43 = vld [vmem:[#allocation2 + $0x4c8] sm:$0xff]  }
 0x445   : > { %6050 = vmatpush3.bf16.msra.mxu0 %v6692_v44  ;;  %v2528_v44 = vrot.slane %v7405_v28, 4 }
 0x446   : > { %6051 = vmatprep.subr.bf16.mxu0 %v6695_v45  ;;  %v6736_v45 = vld [vmem:[#allocation2 + $0x408] sm:$0xff]  }
 0x447   : > { %6072 = vmatpush3.bf16.msra.mxu1 %v6694_v47  ;;  %v6739_v47 = vld [vmem:[#allocation2 + $0x450] sm:$0xff]  }
 0x448   : > { %6073 = vmatprep.subr.bf16.mxu1 %v6697_v48  ;;  %v6738_v48 = vld [vmem:[#allocation2 + $0x488] sm:$0xff]  }
 0x449   : > { %6052 = vmatpush3.bf16.msra.mxu0 %v6696_v49  ;;  %v6741_v49 = vld [vmem:[#allocation2 + $0x4d0] sm:$0xff]  }
 0x44a   : > { %6081 = vmatprep.subr.bf16.mxu0 %v6699_v50  ;;  %v6740_v50 = vld [vmem:[#allocation2 + $0x410] sm:$0xff]  }
 0x44b   : > { %6074 = vmatpush3.bf16.msra.mxu1 %v6698_v51  ;;  %v6743_v51 = vld [vmem:[#allocation2 + $0x458] sm:$0xff]  }
 0x44c   : > { %1790 = vmatmul.mubr.bf16.vlgmr.msra.gmra.mrb[12].mxu0 %v1657_v56  ;;  %6103 = vmatprep.subr.bf16.mxu1 %v6701_v53  ;;  %v6742_v53 = vld [vmem:[#allocation2 + $0x490] sm:$0xff]   ;;  %v6744_v56 = vld [vmem:[#allocation2 + $0x418] sm:$0xff]  }
 0x44d   : > { %6082 = vmatpush3.bf16.msra.mxu0 %v6700_v55  ;;  %2137 = vmatprep.mubr.bf16.mxu0 %v2006_v58  ;;  %v6745_v55 = vld [vmem:[#allocation2 + $0x4d8] sm:$0xff]  }
 0x44e   : > { %1964 = vmatmul.mubr.bf16.vlgmr.msra.gmra.mrb[12].mxu1 %v1831_v46  ;;  %6083 = vmatprep.subr.bf16.mxu0 %v6703_v57  ;;  %v6747_v57 = vld [vmem:[#allocation2 + $0x460] sm:$0xff]   ;;  %v6746_v58 = vld [vmem:[#allocation2 + $0x498] sm:$0xff]  }
 0x44f   : > { %6104 = vmatpush3.bf16.msra.mxu1 %v6702_v7  ;;  %2311 = vmatprep.mubr.bf16.mxu1 %v2180_v8  ;;  %v6749_v7 = vld [vmem:[#allocation2 + $0x4e0] sm:$0xff]  }
 0x450   : > { %6105 = vmatprep.subr.bf16.mxu1 %v6705_v60  ;;  %v6748_v46 = vld [vmem:[#allocation2 + $0x420] sm:$0xff]   ;;  %v6751_v60 = vld [vmem:[#allocation2 + $0x468] sm:$0xff]  }
 0x451   : > { %6084 = vmatpush3.bf16.msra.mxu0 %v6704_v61  ;;  %v6750_v8 = vld [vmem:[#allocation2 + $0x4a0] sm:$0xff]   ;;  %v6753_v61 = vld [vmem:[#allocation2 + $0x4e8] sm:$0xff]  }
 0x452   : > { %6085 = vmatprep.subr.bf16.mxu0 %v6707_v52  ;;  %v6752_v52 = vld [vmem:[#allocation2 + $0x428] sm:$0xff]  }
 0x453   : > { %6106 = vmatpush3.bf16.msra.mxu1 %v6706_v62  ;;  %v6755_v62 = vld [vmem:[#allocation2 + $0x470] sm:$0xff]  }
 0x454   : > { %6107 = vmatprep.subr.bf16.mxu1 %v6709_v63  ;;  %v6754_v63 = vld [vmem:[#allocation2 + $0x4a8] sm:$0xff]  }
 0x455   : > { %6086 = vmatpush3.bf16.msra.mxu0 %v6708_v0  ;;  %v6757_v0 = vld [vmem:[#allocation2 + $0x4f0] sm:$0xff]  }
 0x456   : > { %6087 = vmatprep.subr.bf16.mxu0 %v6711_v1  ;;  %v6756_v1 = vld [vmem:[#allocation2 + $0x430] sm:$0xff]  }
 0x457   : > { %6108 = vmatpush3.bf16.msra.mxu1 %v6710_v2  ;;  %v6759_v2 = vld [vmem:[#allocation2 + $0x478] sm:$0xff]  }
 0x458   : > { %6109 = vmatprep.subr.bf16.mxu1 %v6713_v3  ;;  %v6758_v3 = vld [vmem:[#allocation2 + $0x4b0] sm:$0xff]  }
 0x459   : > { %6088 = vmatpush3.bf16.msra.mxu0 %v6712_v4  ;;  %v6761_v4 = vld [vmem:[#allocation2 + $0x4f8] sm:$0xff]  }
 0x45a   : > { %6089 = vmatprep.subr.bf16.mxu0 %v6715_v5  ;;  %v6760_v5 = vld [vmem:[#allocation2 + $0x438] sm:$0xff]  }
 0x45b   : > { %6110 = vmatpush3.bf16.msra.mxu1 %v6714_v6  ;;  %v6763_v6 = vld [vmem:[#allocation2 + $0x540] sm:$0xff]  }
 0x45c   : > { %6111 = vmatprep.subr.bf16.mxu1 %v6717_v9  ;;  %v6762_v9 = vld [vmem:[#allocation2 + $0x4b8] sm:$0xff]  }
 0x45d   : > { %6090 = vmatpush3.bf16.msra.mxu0 %v6716_v10  ;;  %v6765_v10 = vld [vmem:[#allocation2 + $0x5c0] sm:$0xff]  }
 0x45e   : > { %6091 = vmatprep.subr.bf16.mxu0 %v6719_v11  ;;  %v6764_v11 = vld [vmem:[#allocation2 + $0x500] sm:$0xff]  }
 0x45f   : > { %6112 = vmatpush3.bf16.msra.mxu1 %v6718_v12  ;;  %v2353_v12 = vrot.slane %v7399_v25, 4 }
 0x460   : > { %6113 = vmatprep.subr.bf16.mxu1 %v6721_v13  ;;  %v6767_v13 = vld [vmem:[#allocation2 + $0x548] sm:$0xff]  }
 0x461   : > { %6092 = vmatpush3.bf16.msra.mxu0 %v6720_v14  ;;  %v2702_v14 = vrot.slane %v7401_v26, 5 }
 0x462   : > { %6093 = vmatprep.subr.bf16.mxu0 %v6723_v16  ;;  %v6766_v16 = vld [vmem:[#allocation2 + $0x580] sm:$0xff]  }
 0x463   : > { %6114 = vmatpush3.bf16.msra.mxu1 %v6722_v17  ;;  %v2527_v17 = vrot.slane %v7410_v32, 4 }
 0x464   : > { %6115 = vmatprep.subr.bf16.mxu1 %v6725_v18  ;;  %v6769_v18 = vld [vmem:[#allocation2 + $0x5c8] sm:$0xff]  }
 0x465   : > { %6094 = vmatpush3.bf16.msra.mxu0 %v6724_v19  ;;  %v2876_v19 = vrot.slane %v7405_v28, 5 }
 0x466   : > { %6095 = vmatprep.subr.bf16.mxu0 %v6727_v22  ;;  %v6768_v22 = vld [vmem:[#allocation2 + $0x508] sm:$0xff]  }
 0x467   : > { %6116 = vmatpush3.bf16.msra.mxu1 %v6726_v23  ;;  %v6771_v23 = vld [vmem:[#allocation2 + $0x550] sm:$0xff]  }
 0x468   : > { %6117 = vmatprep.subr.bf16.mxu1 %v6729_v24  ;;  %v6770_v24 = vld [vmem:[#allocation2 + $0x588] sm:$0xff]  }
 0x469   : > { %6096 = vmatpush3.bf16.msra.mxu0 %v6728_v27  ;;  %v6773_v27 = vld [vmem:[#allocation2 + $0x5d0] sm:$0xff]  }
 0x46a   : > { %6125 = vmatprep.subr.bf16.mxu0 %v6731_v29  ;;  %v6772_v29 = vld [vmem:[#allocation2 + $0x510] sm:$0xff]  }
 0x46b   : > { %6118 = vmatpush3.bf16.msra.mxu1 %v6730_v30  ;;  %v6775_v30 = vld [vmem:[#allocation2 + $0x558] sm:$0xff]  }
 0x46c   : > { %2138 = vmatmul.mubr.bf16.vlgmr.msra.gmra.mrb[16].mxu0 %v2005_v34  ;;  %6147 = vmatprep.subr.bf16.mxu1 %v6733_v31  ;;  %v6774_v31 = vld [vmem:[#allocation2 + $0x590] sm:$0xff]   ;;  %v6776_v34 = vld [vmem:[#allocation2 + $0x518] sm:$0xff]  }
 0x46d   : > { %6126 = vmatpush3.bf16.msra.mxu0 %v6732_v33  ;;  %2485 = vmatprep.mubr.bf16.mxu0 %v2354_v36  ;;  %v6777_v33 = vld [vmem:[#allocation2 + $0x5d8] sm:$0xff]  }
 0x46e   : > { %2312 = vmatmul.mubr.bf16.vlgmr.msra.gmra.mrb[16].mxu1 %v2179_v42  ;;  %6127 = vmatprep.subr.bf16.mxu0 %v6735_v35  ;;  %v6779_v35 = vld [vmem:[#allocation2 + $0x560] sm:$0xff]   ;;  %v6778_v36 = vld [vmem:[#allocation2 + $0x598] sm:$0xff]  }
 0x46f   : > { %6148 = vmatpush3.bf16.msra.mxu1 %v6734_v41  ;;  %2659 = vmatprep.mubr.bf16.mxu1 %v2528_v44  ;;  %v6781_v41 = vld [vmem:[#allocation2 + $0x5e0] sm:$0xff]  }
 0x470   : > { %6149 = vmatprep.subr.bf16.mxu1 %v6737_v43  ;;  %v6780_v42 = vld [vmem:[#allocation2 + $0x520] sm:$0xff]   ;;  %v6783_v43 = vld [vmem:[#allocation2 + $0x568] sm:$0xff]  }
 0x471   : > { %6128 = vmatpush3.bf16.msra.mxu0 %v6736_v45  ;;  %v6782_v44 = vld [vmem:[#allocation2 + $0x5a0] sm:$0xff]   ;;  %v6785_v45 = vld [vmem:[#allocation2 + $0x5e8] sm:$0xff]  }
 0x472   : > { %6129 = vmatprep.subr.bf16.mxu0 %v6739_v47  ;;  %v6784_v47 = vld [vmem:[#allocation2 + $0x528] sm:$0xff]  }
 0x473   : > { %6150 = vmatpush3.bf16.msra.mxu1 %v6738_v48  ;;  %v6787_v48 = vld [vmem:[#allocation2 + $0x570] sm:$0xff]  }
 0x474   : > { %6151 = vmatprep.subr.bf16.mxu1 %v6741_v49  ;;  %v6786_v49 = vld [vmem:[#allocation2 + $0x5a8] sm:$0xff]  }
 0x475   : > { %6130 = vmatpush3.bf16.msra.mxu0 %v6740_v50  ;;  %v6789_v50 = vld [vmem:[#allocation2 + $0x5f0] sm:$0xff]  }
 0x476   : > { %6131 = vmatprep.subr.bf16.mxu0 %v6743_v51  ;;  %v6788_v51 = vld [vmem:[#allocation2 + $0x530] sm:$0xff]  }
 0x477   : > { %6152 = vmatpush3.bf16.msra.mxu1 %v6742_v53  ;;  %v6791_v53 = vld [vmem:[#allocation2 + $0x578] sm:$0xff]  }
 0x478   : > { %6153 = vmatprep.subr.bf16.mxu1 %v6745_v55  ;;  %v6790_v55 = vld [vmem:[#allocation2 + $0x5b0] sm:$0xff]  }
 0x479   : > { %6132 = vmatpush3.bf16.msra.mxu0 %v6744_v56  ;;  %v6793_v56 = vld [vmem:[#allocation2 + $0x5f8] sm:$0xff]  }
 0x47a   : > { %6133 = vmatprep.subr.bf16.mxu0 %v6747_v57  ;;  %v6792_v57 = vld [vmem:[#allocation2 + $0x538] sm:$0xff]  }
 0x47b   : > { %6154 = vmatpush3.bf16.msra.mxu1 %v6746_v58  ;;  %v6795_v58 = vld [vmem:[#allocation2 + $0x640] sm:$0xff]  }
 0x47c   : > { %6155 = vmatprep.subr.bf16.mxu1 %v6749_v7  ;;  %v6794_v7 = vld [vmem:[#allocation2 + $0x5b8] sm:$0xff]  }
 0x47d   : > { %6134 = vmatpush3.bf16.msra.mxu0 %v6748_v46  ;;  %v6797_v46 = vld [vmem:[#allocation2 + $0x6c0] sm:$0xff]  }
 0x47e   : > { %6135 = vmatprep.subr.bf16.mxu0 %v6751_v60  ;;  %v6796_v60 = vld [vmem:[#allocation2 + $0x600] sm:$0xff]  }
 0x47f   : > { %6156 = vmatpush3.bf16.msra.mxu1 %v6750_v8  ;;  %v2701_v8 = vrot.slane %v7399_v25, 5 }
 0x480   : > { %6157 = vmatprep.subr.bf16.mxu1 %v6753_v61  ;;  %v6799_v61 = vld [vmem:[#allocation2 + $0x648] sm:$0xff]  }
 0x481   : > { %6136 = vmatpush3.bf16.msra.mxu0 %v6752_v52  ;;  %v3050_v52 = vrot.slane %v7401_v26, 6 }
 0x482   : > { %6137 = vmatprep.subr.bf16.mxu0 %v6755_v62  ;;  %v6798_v62 = vld [vmem:[#allocation2 + $0x680] sm:$0xff]  }
 0x483   : > { %6158 = vmatpush3.bf16.msra.mxu1 %v6754_v63  ;;  %v2875_v63 = vrot.slane %v7410_v32, 5 }
 0x484   : > { %6159 = vmatprep.subr.bf16.mxu1 %v6757_v0  ;;  %v6801_v0 = vld [vmem:[#allocation2 + $0x6c8] sm:$0xff]  }
 0x485   : > { %6138 = vmatpush3.bf16.msra.mxu0 %v6756_v1  ;;  %v3224_v1 = vrot.slane %v7405_v28, 6 }
 0x486   : > { %6139 = vmatprep.subr.bf16.mxu0 %v6759_v2  ;;  %v6800_v2 = vld [vmem:[#allocation2 + $0x608] sm:$0xff]  }
 0x487   : > { %6160 = vmatpush3.bf16.msra.mxu1 %v6758_v3  ;;  %v6803_v3 = vld [vmem:[#allocation2 + $0x650] sm:$0xff]  }
 0x488   : > { %6161 = vmatprep.subr.bf16.mxu1 %v6761_v4  ;;  %v6802_v4 = vld [vmem:[#allocation2 + $0x688] sm:$0xff]  }
 0x489   : > { %6140 = vmatpush3.bf16.msra.mxu0 %v6760_v5  ;;  %v6805_v5 = vld [vmem:[#allocation2 + $0x6d0] sm:$0xff]  }
 0x48a   : > { %6169 = vmatprep.subr.bf16.mxu0 %v6763_v6  ;;  %v6804_v6 = vld [vmem:[#allocation2 + $0x610] sm:$0xff]  }
 0x48b   : > { %6162 = vmatpush3.bf16.msra.mxu1 %v6762_v9  ;;  %v6807_v9 = vld [vmem:[#allocation2 + $0x658] sm:$0xff]  }
 0x48c   : > { %2486 = vmatmul.mubr.bf16.vlgmr.msra.gmra.mrb[20].mxu0 %v2353_v12  ;;  %6191 = vmatprep.subr.bf16.mxu1 %v6765_v10  ;;  %v6806_v10 = vld [vmem:[#allocation2 + $0x690] sm:$0xff]   ;;  %v6808_v12 = vld [vmem:[#allocation2 + $0x618] sm:$0xff]  }
 0x48d   : > { %6170 = vmatpush3.bf16.msra.mxu0 %v6764_v11  ;;  %2833 = vmatprep.mubr.bf16.mxu0 %v2702_v14  ;;  %v6809_v11 = vld [vmem:[#allocation2 + $0x6d8] sm:$0xff]  }
 0x48e   : > { %2660 = vmatmul.mubr.bf16.vlgmr.msra.gmra.mrb[20].mxu1 %v2527_v17  ;;  %6171 = vmatprep.subr.bf16.mxu0 %v6767_v13  ;;  %v6811_v13 = vld [vmem:[#allocation2 + $0x660] sm:$0xff]   ;;  %v6810_v14 = vld [vmem:[#allocation2 + $0x698] sm:$0xff]  }
 0x48f   : > { %6192 = vmatpush3.bf16.msra.mxu1 %v6766_v16  ;;  %3007 = vmatprep.mubr.bf16.mxu1 %v2876_v19  ;;  %v6813_v16 = vld [vmem:[#allocation2 + $0x6e0] sm:$0xff]  }
 0x490   : > { %6193 = vmatprep.subr.bf16.mxu1 %v6769_v18  ;;  %v6812_v17 = vld [vmem:[#allocation2 + $0x620] sm:$0xff]   ;;  %v6815_v18 = vld [vmem:[#allocation2 + $0x668] sm:$0xff]  }
 0x491   : > { %6172 = vmatpush3.bf16.msra.mxu0 %v6768_v22  ;;  %v6814_v19 = vld [vmem:[#allocation2 + $0x6a0] sm:$0xff]   ;;  %v6817_v22 = vld [vmem:[#allocation2 + $0x6e8] sm:$0xff]  }
 0x492   : > { %6173 = vmatprep.subr.bf16.mxu0 %v6771_v23  ;;  %v6816_v23 = vld [vmem:[#allocation2 + $0x628] sm:$0xff]  }
 0x493   : > { %6194 = vmatpush3.bf16.msra.mxu1 %v6770_v24  ;;  %v6819_v24 = vld [vmem:[#allocation2 + $0x670] sm:$0xff]  }
 0x494   : > { %6195 = vmatprep.subr.bf16.mxu1 %v6773_v27  ;;  %v6818_v27 = vld [vmem:[#allocation2 + $0x6a8] sm:$0xff]  }
 0x495   : > { %6174 = vmatpush3.bf16.msra.mxu0 %v6772_v29  ;;  %v6821_v29 = vld [vmem:[#allocation2 + $0x6f0] sm:$0xff]  }
 0x496   : > { %6175 = vmatprep.subr.bf16.mxu0 %v6775_v30  ;;  %v6820_v30 = vld [vmem:[#allocation2 + $0x630] sm:$0xff]  }
 0x497   : > { %6196 = vmatpush3.bf16.msra.mxu1 %v6774_v31  ;;  %v6823_v31 = vld [vmem:[#allocation2 + $0x678] sm:$0xff]  }
 0x498   : > { %6197 = vmatprep.subr.bf16.mxu1 %v6777_v33  ;;  %v6822_v33 = vld [vmem:[#allocation2 + $0x6b0] sm:$0xff]  }
 0x499   : > { %6176 = vmatpush3.bf16.msra.mxu0 %v6776_v34  ;;  %v6825_v34 = vld [vmem:[#allocation2 + $0x6f8] sm:$0xff]  }
 0x49a   : > { %6177 = vmatprep.subr.bf16.mxu0 %v6779_v35  ;;  %v6824_v35 = vld [vmem:[#allocation2 + $0x638] sm:$0xff]  }
 0x49b   : > { %6198 = vmatpush3.bf16.msra.mxu1 %v6778_v36  ;;  %v6827_v36 = vld [vmem:[#allocation2 + $0x740] sm:$0xff]  }
 0x49c   : > { %6199 = vmatprep.subr.bf16.mxu1 %v6781_v41  ;;  %v6826_v41 = vld [vmem:[#allocation2 + $0x6b8] sm:$0xff]  }
 0x49d   : > { %6178 = vmatpush3.bf16.msra.mxu0 %v6780_v42  ;;  %v6829_v42 = vld [vmem:[#allocation2 + $0x7c0] sm:$0xff]  }
 0x49e   : > { %6179 = vmatprep.subr.bf16.mxu0 %v6783_v43  ;;  %v6828_v43 = vld [vmem:[#allocation2 + $0x700] sm:$0xff]  }
 0x49f   : > { %6200 = vmatpush3.bf16.msra.mxu1 %v6782_v44  ;;  %v3049_v44 = vrot.slane %v7399_v25, 6 }
 0x4a0   : > { %6201 = vmatprep.subr.bf16.mxu1 %v6785_v45  ;;  %v6831_v45 = vld [vmem:[#allocation2 + $0x748] sm:$0xff]  }
 0x4a1   : > { %6180 = vmatpush3.bf16.msra.mxu0 %v6784_v47  ;;  %v3398_v47 = vrot.slane %v7401_v26, 7  ;;  %v6836_v26 = vld [vmem:[#allocation2 + $0x710] sm:$0xff]  }
 0x4a2   : > { %6181 = vmatprep.subr.bf16.mxu0 %v6787_v48  ;;  %v6830_v48 = vld [vmem:[#allocation2 + $0x780] sm:$0xff]  }
 0x4a3   : > { %6202 = vmatpush3.bf16.msra.mxu1 %v6786_v49  ;;  %v3223_v49 = vrot.slane %v7410_v32, 6 }
 0x4a4   : > { %6203 = vmatprep.subr.bf16.mxu1 %v6789_v50  ;;  %v6833_v50 = vld [vmem:[#allocation2 + $0x7c8] sm:$0xff]  }
 0x4a5   : > { %6182 = vmatpush3.bf16.msra.mxu0 %v6788_v51  ;;  %v3572_v51 = vrot.slane %v7405_v28, 7  ;;  %v6843_v28 = vld [vmem:[#allocation2 + $0x760] sm:$0xff]  }
 0x4a6   : > { %6183 = vmatprep.subr.bf16.mxu0 %v6791_v53  ;;  %v6832_v53 = vld [vmem:[#allocation2 + $0x708] sm:$0xff]  }
 0x4a7   : > { %6204 = vmatpush3.bf16.msra.mxu1 %v6790_v55  ;;  %v6835_v55 = vld [vmem:[#allocation2 + $0x750] sm:$0xff]  }
 0x4a8   : > { %6205 = vmatprep.subr.bf16.mxu1 %v6793_v56  ;;  %v6834_v56 = vld [vmem:[#allocation2 + $0x788] sm:$0xff]  }
 0x4a9   : > { %6184 = vmatpush3.bf16.msra.mxu0 %v6792_v57  ;;  %v6837_v57 = vld [vmem:[#allocation2 + $0x7d0] sm:$0xff]  }
 0x4aa   : > { %6213 = vmatprep.subr.bf16.mxu0 %v6795_v58  ;;  %v6839_v58 = vld [vmem:[#allocation2 + $0x758] sm:$0xff]  }
 0x4ab   : > { %6206 = vmatpush3.bf16.msra.mxu1 %v6794_v7  ;;  %v6838_v7 = vld [vmem:[#allocation2 + $0x790] sm:$0xff]  }
 0x4ac   : > { %2834 = vmatmul.mubr.bf16.vlgmr.msra.gmra.mrb[24].mxu0 %v2701_v8  ;;  %6235 = vmatprep.subr.bf16.mxu1 %v6797_v46  ;;  %v6841_v46 = vld [vmem:[#allocation2 + $0x7d8] sm:$0xff]  }
 0x4ad   : > { %6214 = vmatpush3.bf16.msra.mxu0 %v6796_v60  ;;  %3181 = vmatprep.mubr.bf16.mxu0 %v3050_v52  ;;  %v6840_v60 = vld [vmem:[#allocation2 + $0x718] sm:$0xff]   ;;  %v6844_v52 = vld [vmem:[#allocation2 + $0x720] sm:$0xff]  }
 0x4ae   : > { %3008 = vmatmul.mubr.bf16.vlgmr.msra.gmra.mrb[24].mxu1 %v2875_v63  ;;  %6215 = vmatprep.subr.bf16.mxu0 %v6799_v61  ;;  %v6842_v8 = vld [vmem:[#allocation2 + $0x798] sm:$0xff]   ;;  %v6845_v61 = vld [vmem:[#allocation2 + $0x7e0] sm:$0xff]  }
 0x4af   : > { %6236 = vmatpush3.bf16.msra.mxu1 %v6798_v62  ;;  %3355 = vmatprep.mubr.bf16.mxu1 %v3224_v1  ;;  %v6847_v62 = vld [vmem:[#allocation2 + $0x768] sm:$0xff]   ;;  %v6846_v63 = vld [vmem:[#allocation2 + $0x7a0] sm:$0xff]  }
 0x4b0   : > { %6237 = vmatprep.subr.bf16.mxu1 %v6801_v0  ;;  %v6849_v0 = vld [vmem:[#allocation2 + $0x7e8] sm:$0xff]  }
 0x4b1   : > { %6216 = vmatpush3.bf16.msra.mxu0 %v6800_v2  ;;  %v6848_v1 = vld [vmem:[#allocation2 + $0x728] sm:$0xff]   ;;  %v6851_v2 = vld [vmem:[#allocation2 + $0x770] sm:$0xff]  }
 0x4b2   : > { %6217 = vmatprep.subr.bf16.mxu0 %v6803_v3 }
 0x4b3   : > { %6238 = vmatpush3.bf16.msra.mxu1 %v6802_v4  ;;  %v6850_v4 = vld [vmem:[#allocation2 + $0x7a8] sm:$0xff]  }
 0x4b4   : > { %6239 = vmatprep.subr.bf16.mxu1 %v6805_v5  ;;  %v926_v5 = vld [vmem:[%s7957_s6] sm:$0x1] }
 0x4b5   : > { %6218 = vmatpush3.bf16.msra.mxu0 %v6804_v6 }
 0x4b6   : > { %6219 = vmatprep.subr.bf16.mxu0 %v6807_v9  ;;  %v6853_v9 = vld [vmem:[#allocation2 + $0x7f0] sm:$0xff]  }
 0x4b7   : > { %6240 = vmatpush3.bf16.msra.mxu1 %v6806_v10 }
 0x4b8   : > { %6241 = vmatprep.subr.bf16.mxu1 %v6809_v11 }
 0x4b9   : > { %6220 = vmatpush3.bf16.msra.mxu0 %v6808_v12 }
 0x4ba   : > { %6221 = vmatprep.subr.bf16.mxu0 %v6811_v13  ;;  %v6852_v13 = vld [vmem:[#allocation2 + $0x730] sm:$0xff]  }
 0x4bb   : > { %6242 = vmatpush3.bf16.msra.mxu1 %v6810_v14 }
 0x4bc   : > { %6243 = vmatprep.subr.bf16.mxu1 %v6813_v16 }
 0x4bd   : > { %6222 = vmatpush3.bf16.msra.mxu0 %v6812_v17  ;;  %v6855_v17 = vld [vmem:[#allocation2 + $0x778] sm:$0xff]  }
 0x4be   : > { %6223 = vmatprep.subr.bf16.mxu0 %v6815_v18 }
 0x4bf   : > { %6244 = vmatpush3.bf16.msra.mxu1 %v6814_v19 }
 0x4c0   : > { %6245 = vmatprep.subr.bf16.mxu1 %v6817_v22 }
 0x4c1   : > { %6224 = vmatpush3.bf16.msra.mxu0 %v6816_v23  ;;  %v6854_v23 = vld [vmem:[#allocation2 + $0x7b0] sm:$0xff]  }
 0x4c2   : > { %6225 = vmatprep.subr.bf16.mxu0 %v6819_v24 }
 0x4c3   : > { %6246 = vmatpush3.bf16.msra.mxu1 %v6818_v27  ;;  %v6857_v27 = vld [vmem:[#allocation2 + $0x7f8] sm:$0xff]  }
 0x4c4   : > { %6247 = vmatprep.subr.bf16.mxu1 %v6821_v29 }
 0x4c5   : > { %6226 = vmatpush3.bf16.msra.mxu0 %v6820_v30  ;;  %v6856_v30 = vld [vmem:[#allocation2 + $0x738] sm:$0xff]  }
 0x4c6   : > { %6227 = vmatprep.subr.bf16.mxu0 %v6823_v31  ;;  %v6858_v31 = vld [vmem:[#allocation2 + $0x7b8] sm:$0xff]  }
 0x4c7   : > { %6248 = vmatpush3.bf16.msra.mxu1 %v6822_v33  ;;  %v3397_v33 = vrot.slane %v7399_v25, 7 }
 0x4c8   : > { %6249 = vmatprep.subr.bf16.mxu1 %v6825_v34  ;;  %v3571_v34 = vrot.slane %v7410_v32, 7 }
 0x4c9   : > { %6228 = vmatpush3.bf16.msra.mxu0 %v6824_v35 }
 0x4ca   : > { %6257 = vmatprep.subr.bf16.mxu0 %v6827_v36 }
 0x4cb   : > { %6250 = vmatpush3.bf16.msra.mxu1 %v6826_v41 }
 0x4cc   : > { %3182 = vmatmul.mubr.bf16.vlgmr.msra.gmra.mrb[28].mxu0 %v3049_v44  ;;  %6279 = vmatprep.subr.bf16.mxu1 %v6829_v42 }
 0x4cd   : > { %6258 = vmatpush3.bf16.msra.mxu0 %v6828_v43  ;;  %3529 = vmatprep.mubr.bf16.mxu0 %v3398_v47 }
 0x4ce   : > { %3356 = vmatmul.mubr.bf16.vlgmr.msra.gmra.mrb[28].mxu1 %v3223_v49  ;;  %6259 = vmatprep.subr.bf16.mxu0 %v6831_v45 }
 0x4cf   : > { %6280 = vmatpush3.bf16.msra.mxu1 %v6830_v48  ;;  %3703 = vmatprep.mubr.bf16.mxu1 %v3572_v51 }
 0x4d0   : > { %6281 = vmatprep.subr.bf16.mxu1 %v6833_v50 }
 0x4d1   : > { %6260 = vmatpush3.bf16.msra.mxu0 %v6832_v53 }
 0x4d2   : > { %6261 = vmatprep.subr.bf16.mxu0 %v6835_v55 }
 0x4d3   : > { %6282 = vmatpush3.bf16.msra.mxu1 %v6834_v56 }
 0x4d4   : > { %6283 = vmatprep.subr.bf16.mxu1 %v6837_v57 }
 0x4d5   : > { %6262 = vmatpush3.bf16.msra.mxu0 %v6836_v26 }
 0x4d6   : > { %6263 = vmatprep.subr.bf16.mxu0 %v6839_v58 }
 0x4d7   : > { %6284 = vmatpush3.bf16.msra.mxu1 %v6838_v7 }
 0x4d8   : > { %6285 = vmatprep.subr.bf16.mxu1 %v6841_v46 }
 0x4d9   : > { %6264 = vmatpush3.bf16.msra.mxu0 %v6840_v60 }
 0x4da   : > { %6265 = vmatprep.subr.bf16.mxu0 %v6843_v28 }
 0x4db   : > { %6286 = vmatpush3.bf16.msra.mxu1 %v6842_v8 }
 0x4dc   : > { %6287 = vmatprep.subr.bf16.mxu1 %v6845_v61 }
 0x4dd   : > { %6266 = vmatpush3.bf16.msra.mxu0 %v6844_v52 }
 0x4de   : > { %6267 = vmatprep.subr.bf16.mxu0 %v6847_v62 }
 0x4df   : > { %6288 = vmatpush3.bf16.msra.mxu1 %v6846_v63  ;;  %v5965_v3 = vpop.f32.mrb[4].mxu0 }
 0x4e0   : > { %v5966_v6 = vpop.f32.mrb[5].mxu0  ;;  %6289 = vmatprep.subr.bf16.mxu1 %v6849_v0 }
 0x4e1   : > { %v5967_v10 = vadd.f32 %v5966_v6, %v5965_v3  ;;  %6268 = vmatpush3.bf16.msra.mxu0 %v6848_v1  ;;  %v5968_v11 = vpop.f32.mrb[6].mxu0  ;;  %v5987_v12 = vpop.f32.mrb[4].mxu1  ;;  %v6861_v6 = vld [vmem:[%s7958_s7 + $0x4] ss:$8 sps:$4 sm:$0xff]  }
 0x4e2   : > { %v5969_v14 = vpop.f32.mrb[7].mxu0  ;;  %v5988_v16 = vpop.f32.mrb[5].mxu1  ;;  %6269 = vmatprep.subr.bf16.mxu0 %v6851_v2  ;;  %v6864_v11 = vld [vmem:[%s7958_s7 + $0x84] ss:$8 sps:$4 sm:$0xff]  }
 0x4e3   : > { %v1095_v18 = vadd.f32 %v5967_v10, %v926_v5  ;;  %v5989_v19 = vadd.f32 %v5988_v16, %v5987_v12  ;;  %6290 = vmatpush3.bf16.msra.mxu1 %v6850_v4  ;;  %v5990_v22 = vpop.f32.mrb[6].mxu1  ;;  %v6859_v5 = vld [vmem:[%s7958_s7] ss:$8 sps:$4 sm:$0xff]   ;;  %v6867_v14 = vld [vmem:[%s7958_s7 + $0x14] ss:$8 sps:$4 sm:$0xff]  }
 0x4e4   : > { %v5991_v24 = vpop.f32.mrb[7].mxu1  ;;  %6291 = vmatprep.subr.bf16.mxu1 %v6853_v9  ;;  %v6862_v10 = vld [vmem:[%s7958_s7 + $0x80] ss:$8 sps:$4 sm:$0xff]   ;;  %v6868_v16 = vld [vmem:[%s7958_s7 + $0x90] ss:$8 sps:$4 sm:$0xff]  }
 0x4e5   : > { %v1273_v29 = vadd.f32 %v5989_v19, %v1095_v18  ;;  %6270 = vmatpush3.bf16.msra.mxu0 %v6852_v13  ;;  %v6865_v13 = vld [vmem:[%s7958_s7 + $0x10] ss:$8 sps:$4 sm:$0xff]   ;;  %v6873_v18 = vld [vmem:[%s7958_s7 + $0x24] ss:$8 sps:$4 sm:$0xff]  }
 0x4e6   : > { %6271 = vmatprep.subr.bf16.mxu0 %v6855_v17  ;;  %v6870_v17 = vld [vmem:[%s7958_s7 + $0x94] ss:$8 sps:$4 sm:$0xff]   ;;  %v6876_v19 = vld [vmem:[%s7958_s7 + $0xc4] ss:$8 sps:$4 sm:$0xff]  }
 0x4e7   : > { %6292 = vmatpush3.bf16.msra.mxu1 %v6854_v23 }
 0x4e8   : > { %6293 = vmatprep.subr.bf16.mxu1 %v6857_v27 }
 0x4e9   : > { %6272 = vmatpush3.bf16.msra.mxu0 %v6856_v30 }
 0x4ea   : > { %3741 = vmatprep.subr.bf16.mxu0 %v6861_v6 }
 0x4eb   : > { %6294 = vmatpush3.bf16.msra.mxu1 %v6858_v31 }
 0x4ec   : > { %3530 = vmatmul.mubr.bf16.vlgmr.msra.gmra.mrb[32].mxu0 %v3397_v33  ;;  %4005 = vmatprep.subr.bf16.mxu1 %v6864_v11 }
 0x4ed   : > { %3773 = vmatprep.mubr.bf16.mxu0 %v7017_v21  ;;  %3742 = vmatpush1.bf16.msra.mxu0 %v6859_v5 }
 0x4ee   : > { %3704 = vmatmul.mubr.bf16.vlgmr.msra.gmra.mrb[32].mxu1 %v3571_v34  ;;  %3743 = vmatprep.subr.bf16.mxu0 %v6867_v14 }
 0x4ef   : > { %4037 = vmatprep.mubr.bf16.mxu1 %v7017_v21  ;;  %4006 = vmatpush1.bf16.msra.mxu1 %v6862_v10 }
 0x4f0   : > { %4007 = vmatprep.subr.bf16.mxu1 %v6870_v17  ;;  %v6882_v17 = vld [vmem:[%s7958_s7 + $0xd4] ss:$8 sps:$4 sm:$0xff]  }
 0x4f1   : > { %3744 = vmatpush1.bf16.msra.mxu0 %v6865_v13  ;;  %v6874_v13 = vld [vmem:[%s7958_s7 + $0xc0] ss:$8 sps:$4 sm:$0xff]  }
 0x4f2   : > { %3807 = vmatprep.subr.bf16.mxu0 %v6873_v18  ;;  %v6877_v18 = vld [vmem:[%s7958_s7 + $0x30] ss:$8 sps:$4 sm:$0xff]  }
 0x4f3   : > { %4008 = vmatpush1.bf16.msra.mxu1 %v6868_v16  ;;  %v6879_v16 = vld [vmem:[%s7958_s7 + $0x34] ss:$8 sps:$4 sm:$0xff]  }
 0x4f4   : > { %4137 = vmatprep.subr.bf16.mxu1 %v6876_v19  ;;  %v6880_v19 = vld [vmem:[%s7958_s7 + $0xd0] ss:$8 sps:$4 sm:$0xff]  }
 0x4ff   : > { %v6009_v35 = vpop.f32.mrb[8].mxu0 }
 0x500   : > { %v6010_v36 = vpop.f32.mrb[9].mxu0 }
 0x501   : > { %v6011_v41 = vadd.f32 %v6010_v36, %v6009_v35  ;;  %v6012_v42 = vpop.f32.mrb[10].mxu0  ;;  %v6031_v43 = vpop.f32.mrb[8].mxu1 }
 0x502   : > { %v6013_v44 = vpop.f32.mrb[11].mxu0  ;;  %v6032_v45 = vpop.f32.mrb[9].mxu1 }
 0x503   : > { %v1449_v47 = vadd.f32 %v6011_v41, %v1273_v29  ;;  %v6033_v48 = vadd.f32 %v6032_v45, %v6031_v43  ;;  %v6034_v49 = vpop.f32.mrb[10].mxu1 }
 0x504   : > { %v6035_v25 = vpop.f32.mrb[11].mxu1 }
 0x505   : > { %v1623_v50 = vadd.f32 %v6033_v48, %v1449_v47 }
 0x51f   : > { %v6053_v51 = vpop.f32.mrb[12].mxu0 }
 0x520   : > { %v6054_v53 = vpop.f32.mrb[13].mxu0 }
 0x521   : > { %v6055_v32 = vadd.f32 %v6054_v53, %v6053_v51  ;;  %v6056_v55 = vpop.f32.mrb[14].mxu0  ;;  %v6075_v56 = vpop.f32.mrb[12].mxu1 }
 0x522   : > { %v6057_v57 = vpop.f32.mrb[15].mxu0  ;;  %v6076_v26 = vpop.f32.mrb[13].mxu1 }
 0x523   : > { %v1797_v58 = vadd.f32 %v6055_v32, %v1623_v50  ;;  %v6077_v7 = vadd.f32 %v6076_v26, %v6075_v56  ;;  %v6078_v46 = vpop.f32.mrb[14].mxu1 }
 0x524   : > { %v6079_v60 = vpop.f32.mrb[15].mxu1 }
 0x525   : > { %v1971_v28 = vadd.f32 %v6077_v7, %v1797_v58 }
 0x53f   : > { %v6097_v8 = vpop.f32.mrb[16].mxu0 }
 0x540   : > { %v6098_v61 = vpop.f32.mrb[17].mxu0 }
 0x541   : > { %v6099_v52 = vadd.f32 %v6098_v61, %v6097_v8  ;;  %v6100_v62 = vpop.f32.mrb[18].mxu0  ;;  %v6119_v63 = vpop.f32.mrb[16].mxu1 }
 0x542   : > { %v6101_v0 = vpop.f32.mrb[19].mxu0  ;;  %v6120_v1 = vpop.f32.mrb[17].mxu1 }
 0x543   : > { %v2145_v2 = vadd.f32 %v6099_v52, %v1971_v28  ;;  %v6121_v3 = vadd.f32 %v6120_v1, %v6119_v63  ;;  %v6122_v4 = vpop.f32.mrb[18].mxu1 }
 0x544   : > { %v6123_v9 = vpop.f32.mrb[19].mxu1 }
 0x545   : > { %v2319_v12 = vadd.f32 %v6121_v3, %v2145_v2 }
 0x55f   : > { %v6141_v22 = vpop.f32.mrb[20].mxu0 }
 0x560   : > { %v6142_v23 = vpop.f32.mrb[21].mxu0 }
 0x561   : > { %v6143_v24 = vadd.f32 %v6142_v23, %v6141_v22  ;;  %v6144_v27 = vpop.f32.mrb[22].mxu0  ;;  %v6163_v29 = vpop.f32.mrb[20].mxu1  ;;  %v6885_v22 = vld [vmem:[%s7958_s7 + $0x44] ss:$8 sps:$4 sm:$0xff]  }
 0x562   : > { %v6145_v30 = vpop.f32.mrb[23].mxu0  ;;  %v6164_v31 = vpop.f32.mrb[21].mxu1  ;;  %v6888_v23 = vld [vmem:[%s7958_s7 + $0x104] ss:$8 sps:$4 sm:$0xff]   ;;  %v6886_v27 = vld [vmem:[%s7958_s7 + $0x100] ss:$8 sps:$4 sm:$0xff]  }
 0x563   : > { %v2493_v33 = vadd.f32 %v6143_v24, %v2319_v12  ;;  %v6165_v34 = vadd.f32 %v6164_v31, %v6163_v29  ;;  %v6166_v35 = vpop.f32.mrb[22].mxu1  ;;  %v6871_v12 = vld [vmem:[%s7958_s7 + $0x20] ss:$8 sps:$4 sm:$0xff]   ;;  %v6891_v29 = vld [vmem:[%s7958_s7 + $0x54] ss:$8 sps:$4 sm:$0xff]  }
 0x564   : > { %v6167_v36 = vpop.f32.mrb[23].mxu1  ;;  %v6883_v24 = vld [vmem:[%s7958_s7 + $0x40] ss:$8 sps:$4 sm:$0xff]   ;;  %v6894_v30 = vld [vmem:[%s7958_s7 + $0x114] ss:$8 sps:$4 sm:$0xff]  }
 0x565   : > { %v2667_v41 = vadd.f32 %v6165_v34, %v2493_v33  ;;  %v6889_v31 = vld [vmem:[%s7958_s7 + $0x50] ss:$8 sps:$4 sm:$0xff]   ;;  %v6897_v34 = vld [vmem:[%s7958_s7 + $0x64] ss:$8 sps:$4 sm:$0xff]   ;;  %v6895_v36 = vld [vmem:[%s7958_s7 + $0x60] ss:$8 sps:$4 sm:$0xff]  }
 0x566   : > { %v6892_v33 = vld [vmem:[%s7958_s7 + $0x110] ss:$8 sps:$4 sm:$0xff]   ;;  %v6900_v35 = vld [vmem:[%s7958_s7 + $0x144] ss:$8 sps:$4 sm:$0xff]  }
 0x57f   : > { %v6185_v42 = vpop.f32.mrb[24].mxu0 }
 0x580   : > { %v6186_v43 = vpop.f32.mrb[25].mxu0 }
 0x581   : > { %v6187_v44 = vadd.f32 %v6186_v43, %v6185_v42  ;;  %v6188_v45 = vpop.f32.mrb[26].mxu0  ;;  %v6207_v47 = vpop.f32.mrb[24].mxu1  ;;  %v6903_v42 = vld [vmem:[%s7958_s7 + $0x74] ss:$8 sps:$4 sm:$0xff]  }
 0x582   : > { %v6189_v48 = vpop.f32.mrb[27].mxu0  ;;  %v6208_v49 = vpop.f32.mrb[25].mxu1  ;;  %v6906_v43 = vld [vmem:[%s7958_s7 + $0x154] ss:$8 sps:$4 sm:$0xff]   ;;  %v6904_v45 = vld [vmem:[%s7958_s7 + $0x150] ss:$8 sps:$4 sm:$0xff]  }
 0x583   : > { %v2841_v25 = vadd.f32 %v6187_v44, %v2667_v41  ;;  %v6209_v50 = vadd.f32 %v6208_v49, %v6207_v47  ;;  %v6210_v51 = vpop.f32.mrb[26].mxu1  ;;  %v6898_v41 = vld [vmem:[%s7958_s7 + $0x140] ss:$8 sps:$4 sm:$0xff]   ;;  %v6901_v44 = vld [vmem:[%s7958_s7 + $0x70] ss:$8 sps:$4 sm:$0xff]  }
 0x584   : > { %v6211_v53 = vpop.f32.mrb[27].mxu1  ;;  %v6909_v47 = vld [vmem:[%s7958_s7 + $0xa4] ss:$8 sps:$4 sm:$0xff]   ;;  %v6907_v49 = vld [vmem:[%s7958_s7 + $0xa0] ss:$8 sps:$4 sm:$0xff]  }
 0x585   : > { %v3015_v32 = vadd.f32 %v6209_v50, %v2841_v25  ;;  %v6912_v48 = vld [vmem:[%s7958_s7 + $0x184] ss:$8 sps:$4 sm:$0xff]   ;;  %v6910_v25 = vld [vmem:[%s7958_s7 + $0x180] ss:$8 sps:$4 sm:$0xff]   ;;  %v6915_v50 = vld [vmem:[%s7958_s7 + $0xb4] ss:$8 sps:$4 sm:$0xff]  }
 0x586   : > { %v6918_v51 = vld [vmem:[%s7958_s7 + $0x194] ss:$8 sps:$4 sm:$0xff]   ;;  %v6913_v53 = vld [vmem:[%s7958_s7 + $0xb0] ss:$8 sps:$4 sm:$0xff]  }
 0x59f   : > { %v6229_v55 = vpop.f32.mrb[28].mxu0 }
 0x5a0   : > { %v6230_v56 = vpop.f32.mrb[29].mxu0 }
 0x5a1   : > { %v6231_v57 = vadd.f32 %v6230_v56, %v6229_v55  ;;  %v6232_v26 = vpop.f32.mrb[30].mxu0  ;;  %v6251_v58 = vpop.f32.mrb[28].mxu1  ;;  %v6921_v55 = vld [vmem:[%s7958_s7 + $0xe4] ss:$8 sps:$4 sm:$0xff]  }
 0x5a2   : > { %v6233_v7 = vpop.f32.mrb[31].mxu0  ;;  %v6252_v46 = vpop.f32.mrb[29].mxu1  ;;  %v6924_v56 = vld [vmem:[%s7958_s7 + $0x1c4] ss:$8 sps:$4 sm:$0xff]   ;;  %v6922_v26 = vld [vmem:[%s7958_s7 + $0x1c0] ss:$8 sps:$4 sm:$0xff]  }
 0x5a3   : > { %v3189_v60 = vadd.f32 %v6231_v57, %v3015_v32  ;;  %v6253_v28 = vadd.f32 %v6252_v46, %v6251_v58  ;;  %v6254_v8 = vpop.f32.mrb[30].mxu1  ;;  %v6916_v32 = vld [vmem:[%s7958_s7 + $0x190] ss:$8 sps:$4 sm:$0xff]   ;;  %v6919_v57 = vld [vmem:[%s7958_s7 + $0xe0] ss:$8 sps:$4 sm:$0xff]  }
 0x5a4   : > { %v6255_v61 = vpop.f32.mrb[31].mxu1  ;;  %v6927_v58 = vld [vmem:[%s7958_s7 + $0xf4] ss:$8 sps:$4 sm:$0xff]   ;;  %v6925_v46 = vld [vmem:[%s7958_s7 + $0xf0] ss:$8 sps:$4 sm:$0xff]  }
 0x5a5   : > { %v3363_v52 = vadd.f32 %v6253_v28, %v3189_v60  ;;  %v6930_v7 = vld [vmem:[%s7958_s7 + $0x1d4] ss:$8 sps:$4 sm:$0xff]   ;;  %v6928_v60 = vld [vmem:[%s7958_s7 + $0x1d0] ss:$8 sps:$4 sm:$0xff]   ;;  %v6933_v28 = vld [vmem:[%s7958_s7 + $0x124] ss:$8 sps:$4 sm:$0xff]  }
 0x5a6   : > { %v6931_v8 = vld [vmem:[%s7958_s7 + $0x120] ss:$8 sps:$4 sm:$0xff]   ;;  %v6936_v61 = vld [vmem:[%s7958_s7 + $0x134] ss:$8 sps:$4 sm:$0xff]  }
 0x5bf   : > { %v6273_v62 = vpop.f32.mrb[32].mxu0 }
 0x5c0   : > { %v6274_v63 = vpop.f32.mrb[33].mxu0 }
 0x5c1   : > { %v6275_v0 = vadd.f32 %v6274_v63, %v6273_v62  ;;  %v6276_v1 = vpop.f32.mrb[34].mxu0  ;;  %v6295_v2 = vpop.f32.mrb[32].mxu1  ;;  %v6939_v62 = vld [vmem:[%s7958_s7 + $0x164] ss:$8 sps:$4 sm:$0xff]   ;;  %v6937_v63 = vld [vmem:[%s7958_s7 + $0x160] ss:$8 sps:$4 sm:$0xff]  }
 0x5c2   : > { %v6277_v3 = vpop.f32.mrb[35].mxu0  ;;  %v6296_v4 = vpop.f32.mrb[33].mxu1  ;;  %v6940_v1 = vld [vmem:[%s7958_s7 + $0x170] ss:$8 sps:$4 sm:$0xff]  }
 0x5c3   : > { %v3537_v5 = vadd.f32 %v6275_v0, %v3363_v52  ;;  %v6297_v6 = vadd.f32 %v6296_v4, %v6295_v2  ;;  %v6298_v9 = vpop.f32.mrb[34].mxu1  ;;  %v6934_v52 = vld [vmem:[%s7958_s7 + $0x130] ss:$8 sps:$4 sm:$0xff]   ;;  %v6942_v0 = vld [vmem:[%s7958_s7 + $0x174] ss:$8 sps:$4 sm:$0xff]  }
 0x5c4   : > { %v6299_v10 = vpop.f32.mrb[35].mxu1  ;;  %v6945_v2 = vld [vmem:[%s7958_s7 + $0x1a4] ss:$8 sps:$4 sm:$0xff]   ;;  %v6943_v3 = vld [vmem:[%s7958_s7 + $0x1a0] ss:$8 sps:$4 sm:$0xff]  }
 0x5c5   : > { %v3711_v11 = vadd.f32 %v6297_v6, %v3537_v5  ;;  %v6948_v4 = vld [vmem:[%s7958_s7 + $0x1b4] ss:$8 sps:$4 sm:$0xff]   ;;  %v6946_v5 = vld [vmem:[%s7958_s7 + $0x1b0] ss:$8 sps:$4 sm:$0xff]   ;;  %v6951_v6 = vld [vmem:[%s7958_s7 + $0x1e4] ss:$8 sps:$4 sm:$0xff]  }
 0x5c6   : > { %v6949_v9 = vld [vmem:[%s7958_s7 + $0x1e0] ss:$8 sps:$4 sm:$0xff]   ;;  %v6954_v10 = vld [vmem:[%s7958_s7 + $0x1f4] ss:$8 sps:$4 sm:$0xff]  }
 0x5c7   : > { %v7482_v14 = vpack.c.bf16 %v3711_v11, %v3711_v11  ;;  %v6952_v11 = vld [vmem:[%s7958_s7 + $0x1f0] ss:$8 sps:$4 sm:$0xff]  }
 0x5c9   : > { %5742 = vmatmul.mubr.msk.bf16.vlgmr.msra.gmra.mrb[36].mxu0 %vm3737_vm11, %v7482_v14  ;;  %5778 = vmatmul.mubr.msk.bf16.vlgmr.msra.gmra.mrb[36].mxu1 %vm3737_vm11, %v7482_v14 }
 0x5ca   : > { %3808 = vmatpush1.bf16.msra.mxu0 %v6871_v12  ;;  %4138 = vmatpush1.bf16.msra.mxu1 %v6874_v13 }
 0x5cb   : > { %3809 = vmatprep.subr.bf16.mxu0 %v6879_v16  ;;  %4139 = vmatprep.subr.bf16.mxu1 %v6882_v17 }
 0x5cc   : > { %3839 = vmatprep.mubr.bf16.mxu0 %v7017_v21  ;;  %4169 = vmatprep.mubr.bf16.mxu1 %v7017_v21 }
 0x5ce   : > { %3810 = vmatpush1.bf16.msra.mxu0 %v6877_v18  ;;  %4140 = vmatpush1.bf16.msra.mxu1 %v6880_v19 }
 0x5cf   : > { %3873 = vmatprep.subr.bf16.mxu0 %v6885_v22  ;;  %4269 = vmatprep.subr.bf16.mxu1 %v6888_v23 }
 0x5d1   : > { %5751 = vmatmul.mubr.msk.bf16.vlgmr.msra.gmra.mrb[40].mxu0 %vm3737_vm11, %v7482_v14  ;;  %5796 = vmatmul.mubr.msk.bf16.vlgmr.msra.gmra.mrb[40].mxu1 %vm3737_vm11, %v7482_v14 }
 0x5d2   : > { %3874 = vmatpush1.bf16.msra.mxu0 %v6883_v24  ;;  %4270 = vmatpush1.bf16.msra.mxu1 %v6886_v27 }
 0x5d3   : > { %3875 = vmatprep.subr.bf16.mxu0 %v6891_v29  ;;  %4271 = vmatprep.subr.bf16.mxu1 %v6894_v30 }
 0x5d4   : > { %3905 = vmatprep.mubr.bf16.mxu0 %v7017_v21  ;;  %4301 = vmatprep.mubr.bf16.mxu1 %v7017_v21 }
 0x5d6   : > { %3876 = vmatpush1.bf16.msra.mxu0 %v6889_v31  ;;  %4272 = vmatpush1.bf16.msra.mxu1 %v6892_v33 }
 0x5d7   : > { %3939 = vmatprep.subr.bf16.mxu0 %v6897_v34  ;;  %4401 = vmatprep.subr.bf16.mxu1 %v6900_v35 }
 0x5d9   : > { %5760 = vmatmul.mubr.msk.bf16.vlgmr.msra.gmra.mrb[44].mxu0 %vm3737_vm11, %v7482_v14  ;;  %5814 = vmatmul.mubr.msk.bf16.vlgmr.msra.gmra.mrb[44].mxu1 %vm3737_vm11, %v7482_v14 }
 0x5da   : > { %3940 = vmatpush1.bf16.msra.mxu0 %v6895_v36  ;;  %4402 = vmatpush1.bf16.msra.mxu1 %v6898_v41 }
 0x5db   : > { %3941 = vmatprep.subr.bf16.mxu0 %v6903_v42  ;;  %4403 = vmatprep.subr.bf16.mxu1 %v6906_v43 }
 0x5dc   : > { %3971 = vmatprep.mubr.bf16.mxu0 %v7017_v21  ;;  %4433 = vmatprep.mubr.bf16.mxu1 %v7017_v21 }
 0x5de   : > { %3942 = vmatpush1.bf16.msra.mxu0 %v6901_v44  ;;  %4404 = vmatpush1.bf16.msra.mxu1 %v6904_v45 }
 0x5df   : > { %4071 = vmatprep.subr.bf16.mxu0 %v6909_v47  ;;  %4533 = vmatprep.subr.bf16.mxu1 %v6912_v48 }
 0x5e1   : > { %5769 = vmatmul.mubr.msk.bf16.vlgmr.msra.gmra.mrb[48].mxu0 %vm3737_vm11, %v7482_v14  ;;  %5832 = vmatmul.mubr.msk.bf16.vlgmr.msra.gmra.mrb[48].mxu1 %vm3737_vm11, %v7482_v14 }
 0x5e2   : > { %4072 = vmatpush1.bf16.msra.mxu0 %v6907_v49  ;;  %4534 = vmatpush1.bf16.msra.mxu1 %v6910_v25 }
 0x5e3   : > { %4073 = vmatprep.subr.bf16.mxu0 %v6915_v50  ;;  %4535 = vmatprep.subr.bf16.mxu1 %v6918_v51 }
 0x5e4   : > { %4103 = vmatprep.mubr.bf16.mxu0 %v7017_v21  ;;  %4565 = vmatprep.mubr.bf16.mxu1 %v7017_v21 }
 0x5e6   : > { %4074 = vmatpush1.bf16.msra.mxu0 %v6913_v53  ;;  %4536 = vmatpush1.bf16.msra.mxu1 %v6916_v32 }
 0x5e7   : > { %4203 = vmatprep.subr.bf16.mxu0 %v6921_v55  ;;  %4665 = vmatprep.subr.bf16.mxu1 %v6924_v56 }
 0x5e9   : > { %5787 = vmatmul.mubr.msk.bf16.vlgmr.msra.gmra.mrb[52].mxu0 %vm3737_vm11, %v7482_v14  ;;  %5850 = vmatmul.mubr.msk.bf16.vlgmr.msra.gmra.mrb[52].mxu1 %vm3737_vm11, %v7482_v14 }
 0x5ea   : > { %4204 = vmatpush1.bf16.msra.mxu0 %v6919_v57  ;;  %4666 = vmatpush1.bf16.msra.mxu1 %v6922_v26 }
 0x5eb   : > { %4205 = vmatprep.subr.bf16.mxu0 %v6927_v58  ;;  %4667 = vmatprep.subr.bf16.mxu1 %v6930_v7 }
 0x5ec   : > { %4235 = vmatprep.mubr.bf16.mxu0 %v7017_v21  ;;  %4697 = vmatprep.mubr.bf16.mxu1 %v7017_v21 }
 0x5ee   : > { %4206 = vmatpush1.bf16.msra.mxu0 %v6925_v46  ;;  %4668 = vmatpush1.bf16.msra.mxu1 %v6928_v60 }
 0x5ef   : > { %4335 = vmatprep.subr.bf16.mxu0 %v6933_v28 }
 0x5f1   : > { %5805 = vmatmul.mubr.msk.bf16.vlgmr.msra.gmra.mrb[56].mxu0 %vm3737_vm11, %v7482_v14  ;;  %5868 = vmatmul.mubr.msk.bf16.vlgmr.msra.gmra.mrb[56].mxu1 %vm3737_vm11, %v7482_v14 }
 0x5f2   : > { %4336 = vmatpush1.bf16.msra.mxu0 %v6931_v8  ;;  %4367 = vmatprep.mubr.bf16.mxu0 %v7017_v21 }
 0x5f3   : > { %4337 = vmatprep.subr.bf16.mxu0 %v6936_v61 }
 0x5f6   : > { %4338 = vmatpush1.bf16.msra.mxu0 %v6934_v52 }
 0x5f7   : > { %4467 = vmatprep.subr.bf16.mxu0 %v6939_v62 }
 0x5f9   : > { %5823 = vmatmul.mubr.msk.bf16.vlgmr.msra.gmra.mrb[60].mxu0 %vm3737_vm11, %v7482_v14 }
 0x5fa   : > { %4468 = vmatpush1.bf16.msra.mxu0 %v6937_v63  ;;  %4499 = vmatprep.mubr.bf16.mxu0 %v7017_v21 }
 0x5fb   : > { %4469 = vmatprep.subr.bf16.mxu0 %v6942_v0 }
 0x5fe   : > { %4470 = vmatpush1.bf16.msra.mxu0 %v6940_v1 }
 0x5ff   : > { %4599 = vmatprep.subr.bf16.mxu0 %v6945_v2 }
 0x601   : > { %5841 = vmatmul.mubr.msk.bf16.vlgmr.msra.gmra.mrb[64].mxu0 %vm3737_vm11, %v7482_v14 }
 0x602   : > { %4600 = vmatpush1.bf16.msra.mxu0 %v6943_v3  ;;  %4631 = vmatprep.mubr.bf16.mxu0 %v7017_v21 }
 0x603   : > { %4601 = vmatprep.subr.bf16.mxu0 %v6948_v4 }
 0x606   : > { %4602 = vmatpush1.bf16.msra.mxu0 %v6946_v5 }
 0x607   : > { %4731 = vmatprep.subr.bf16.mxu0 %v6951_v6 }
 0x609   : > { %5859 = vmatmul.mubr.msk.bf16.vlgmr.msra.gmra.mrb[68].mxu0 %vm3737_vm11, %v7482_v14 }
 0x60a   : > { %4732 = vmatpush1.bf16.msra.mxu0 %v6949_v9  ;;  %4763 = vmatprep.mubr.bf16.mxu0 %v7017_v21 }
 0x60b   : > { %4733 = vmatprep.subr.bf16.mxu0 %v6954_v10 }
 0x60e   : > { %4734 = vmatpush1.bf16.msra.mxu0 %v6952_v11 }
 0x611   : > { %5877 = vmatmul.mubr.msk.bf16.vlgmr.msra.gmra.mrb[72].mxu0 %vm3737_vm11, %v7482_v14  ;;  %vm8034_vm11 = vcmask 1041408  }
 0x612   : > { %5350 = vmatprep.mubr.bf16.mxu0 %v7017_v21  ;;  %vm8035_vm8 = vmmov %vm8034_vm11 }
 0x69c   : > { %v3775_v12 = vpop.f32.mrb[36].mxu0  ;;  %v4039_v13 = vpop.f32.mrb[36].mxu1 }
 0x69d   : > { %v3777_v16 = vpop.f32.mrb[37].mxu0  ;;  %v4041_v17 = vpop.f32.mrb[37].mxu1  ;;  %v4792_v7 = vrot.slane %v4039_v13, 4 }
 0x69e   : > { %v3779_v18 = vpop.f32.mrb[38].mxu0  ;;  %v4043_v19 = vpop.f32.mrb[38].mxu1  ;;  %v4793_v8 = vrot.slane %v4041_v17, 4 }
 0x69f   : > { %v3780_v22 = vpop.f32.mrb[39].mxu0  ;;  %v4044_v23 = vpop.f32.mrb[39].mxu1 }
 0x6a4   : > { %v3841_v24 = vpop.f32.mrb[40].mxu0  ;;  %v4171_v27 = vpop.f32.mrb[40].mxu1 }
 0x6a5   : > { %v4774_v29 = vrot.slane %v3841_v24, 7  ;;  %v3843_v30 = vpop.f32.mrb[41].mxu0  ;;  %v4173_v31 = vpop.f32.mrb[41].mxu1  ;;  %v4804_v9 = vrot.slane %v4171_v27, 2  ;;  %v4884_v27 = vld [vmem:[%s7959_s8] sm:$0xff] }
 0x6a6   : > { %v4775_v33 = vrot.slane %v3843_v30, 7  ;;  %v3845_v34 = vpop.f32.mrb[42].mxu0  ;;  %v4175_v35 = vpop.f32.mrb[42].mxu1  ;;  %v4805_v13 = vrot.slane %v4173_v31, 2 }
 0x6a7   : > { %v4856_v14 = vsel %vm8032_vm12, %v3775_v12, %v4774_v29  ;;  %v3846_v36 = vpop.f32.mrb[43].mxu0  ;;  %v4176_v21 = vpop.f32.mrb[43].mxu1  ;;  %vm8036_vm12 = vcmask 1042432   ;;  %v4885_v35 = vld [vmem:[%s7959_s8 + $0x8] sm:$0xff] }
 0x6a8   : > { %v4857_v41 = vsel %vm8033_vm2, %v3777_v16, %v4775_v33  ;;  %vm8037_vm2 = vmmov %vm8036_vm12 }
 0x6ac   : > { %v3907_v42 = vpop.f32.mrb[44].mxu0  ;;  %v7689_v43 = vpop.f32.mrb[44].mxu1 }
 0x6ad   : > { %v4780_v44 = vrot.slane %v3907_v42, 6  ;;  %v3909_v45 = vpop.f32.mrb[45].mxu0  ;;  %v7691_v47 = vpop.f32.mrb[45].mxu1 }
 0x6ae   : > { %v4781_v48 = vrot.slane %v3909_v45, 6  ;;  %v3911_v49 = vpop.f32.mrb[46].mxu0  ;;  %v4307_v25 = vpop.f32.mrb[46].mxu1 }
 0x6af   : > { %v4858_v50 = vsel %vm8034_vm11, %v4856_v14, %v4780_v44  ;;  %v3912_v51 = vpop.f32.mrb[47].mxu0  ;;  %v4308_v53 = vpop.f32.mrb[47].mxu1  ;;  %vm8038_vm11 = vcmask 1043456  }
 0x6b0   : > { %v4859_v32 = vsel %vm8035_vm8, %v4857_v41, %v4781_v48  ;;  %vm8039_vm8 = vmmov %vm8038_vm11 }
 0x6b4   : > { %v3973_v55 = vpop.f32.mrb[48].mxu0  ;;  %v7695_v56 = vpop.f32.mrb[48].mxu1 }
 0x6b5   : > { %v4786_v57 = vrot.slane %v3973_v55, 5  ;;  %v3975_v26 = vpop.f32.mrb[49].mxu0  ;;  %v4437_v58 = vpop.f32.mrb[49].mxu1  ;;  %v4822_v55 = vrot.slane %v7695_v56, 6 }
 0x6b6   : > { %v4787_v46 = vrot.slane %v3975_v26, 5  ;;  %v3977_v60 = vpop.f32.mrb[50].mxu0  ;;  %v4439_v28 = vpop.f32.mrb[50].mxu1 }
 0x6b7   : > { %v4860_v61 = vsel %vm8036_vm12, %v4858_v50, %v4786_v57  ;;  %v3978_v52 = vpop.f32.mrb[51].mxu0  ;;  %v4440_v62 = vpop.f32.mrb[51].mxu1  ;;  %vm8041_vm12 = vmmov %vm8040_vm0 }
 0x6b8   : > { %v4861_v63 = vsel %vm8037_vm2, %v4859_v32, %v4787_v46  ;;  %v4862_v0 = vsel %vm8038_vm11, %v4860_v61, %v4792_v7  ;;  %vm8042_vm2 = vcmask 1045504   ;;  %v4823_v7 = vrot.slane %v4437_v58, 6 }
 0x6b9   : > { %v4863_v1 = vsel %vm8039_vm8, %v4861_v63, %v4793_v8  ;;  %vm8043_vm11 = vmmov %vm8042_vm2 }
 0x6bc   : > { %v4105_v2 = vpop.f32.mrb[52].mxu0  ;;  %v4567_v3 = vpop.f32.mrb[52].mxu1 }
 0x6bd   : > { %v4798_v4 = vrot.slane %v4105_v2, 3  ;;  %v4107_v5 = vpop.f32.mrb[53].mxu0  ;;  %v4569_v6 = vpop.f32.mrb[53].mxu1  ;;  %v4834_v56 = vrot.slane %v4567_v3, 4 }
 0x6be   : > { %v4799_v10 = vrot.slane %v4107_v5, 3  ;;  %v4109_v11 = vpop.f32.mrb[54].mxu0  ;;  %v4571_v12 = vpop.f32.mrb[54].mxu1  ;;  %v4835_v58 = vrot.slane %v4569_v6, 4 }
 0x6bf   : > { %v4864_v16 = vsel %vm8040_vm0, %v4862_v0, %v4798_v4  ;;  %v4110_v17 = vpop.f32.mrb[55].mxu0  ;;  %v4572_v18 = vpop.f32.mrb[55].mxu1  ;;  %vm8044_vm0 = vcmask 1046528  }
 0x6c0   : > { %v4865_v19 = vsel %vm8041_vm12, %v4863_v1, %v4799_v10  ;;  %v4866_v22 = vsel %vm8042_vm2, %v4864_v16, %v4804_v9  ;;  %vm8045_vm8 = vmmov %vm8044_vm0  ;;  %vm8046_vm12 = vcmask 1040384  }
 0x6c1   : > { %v4867_v23 = vsel %vm8043_vm11, %v4865_v19, %v4805_v13  ;;  %vm8047_vm2 = vmmov %vm8046_vm12  ;;  %vm8048_vm11 = vcmask 1041408  }
 0x6c4   : > { %v4237_v24 = vpop.f32.mrb[56].mxu0  ;;  %v4699_v29 = vpop.f32.mrb[56].mxu1 }
 0x6c5   : > { %v4810_v30 = vrot.slane %v4237_v24, 1  ;;  %v4239_v33 = vpop.f32.mrb[57].mxu0  ;;  %v4701_v34 = vpop.f32.mrb[57].mxu1  ;;  %v4846_v12 = vrot.slane %v4699_v29, 2 }
 0x6c6   : > { %v4811_v31 = vrot.slane %v4239_v33, 1  ;;  %v4241_v14 = vpop.f32.mrb[58].mxu0  ;;  %v4703_v36 = vpop.f32.mrb[58].mxu1  ;;  %v4847_v17 = vrot.slane %v4701_v34, 2  ;;  %v4887_v33 = vld [vmem:[%s7959_s8 + $0x18] sm:$0xff] }
 0x6c7   : > { %v4868_v21 = vsel %vm8044_vm0, %v4866_v22, %v4810_v30  ;;  %v4242_v41 = vpop.f32.mrb[59].mxu0  ;;  %v4704_v42 = vpop.f32.mrb[59].mxu1  ;;  %vm8049_vm0 = vmmov %vm8048_vm11  ;;  %v4886_v30 = vld [vmem:[%s7959_s8 + $0x10] sm:$0xff] }
 0x6c8   : > { %v4888_v44 = vadd.f32 %v4884_v27, %v4868_v21  ;;  %v4869_v45 = vsel %vm8045_vm8, %v4867_v23, %v4811_v31  ;;  %vm8050_vm8 = vcmask 1042432  }
 0x6c9   : > { %v4889_v48 = vadd.f32 %v4885_v35, %v4869_v45 }
 0x6ca   : > { %v4892_v49 = vmax.f32 %v4888_v44, 0.0 }
 0x6cb   : > { %v4893_v25 = vmax.f32 %v4889_v48, 0.0 }
 0x6cc   : > { %v4369_v50 = vpop.f32.mrb[60].mxu0 }
 0x6cd   : > { %v4816_v51 = vrot.slane %v4369_v50, 7  ;;  %v4371_v53 = vpop.f32.mrb[61].mxu0  ;;  %v6426_v32 = vpack.i.bf16 %v4893_v25, %v4892_v49 }
 0x6ce   : > { %v4817_v57 = vrot.slane %v4371_v53, 7  ;;  %v4373_v26 = vpop.f32.mrb[62].mxu0 }
 0x6cf   : > { %v4870_v46 = vsel %vm8046_vm12, %v7689_v43, %v4816_v51  ;;  %6427 = vrot.lane.b32.xlu1 %v6426_v32, %s7008_s15  ;;  %v4374_v60 = vpop.f32.mrb[63].mxu0  ;;  %vm8051_vm12 = vmmov %vm8050_vm8 }
 0x6d0   : > { %v4871_v28 = vsel %vm8047_vm2, %v7691_v47, %v4817_v57  ;;  %v4872_v8 = vsel %vm8048_vm11, %v4870_v46, %v4822_v55  ;;  %vm8054_vm2 = vcmask 1044480  }
 0x6d1   : > { %v4873_v61 = vsel %vm8049_vm0, %v4871_v28, %v4823_v7  ;;  %vm8055_vm11 = vmmov %vm8054_vm2  ;;  %vm8056_vm0 = vcmask 1045504  }
 0x6d4   : > { %v4501_v52 = vpop.f32.mrb[64].mxu0 }
 0x6d5   : > { %v4828_v62 = vrot.slane %v4501_v52, 5  ;;  %v4503_v63 = vpop.f32.mrb[65].mxu0 }
 0x6d6   : > { %v4829_v0 = vrot.slane %v4503_v63, 5  ;;  %v4505_v1 = vpop.f32.mrb[66].mxu0  ;;  %v7785_v63 = vld [vmem:[%s7960_s9] sm:$0xff] }
 0x6d7   : > { %v4874_v2 = vsel %vm8050_vm8, %v4872_v8, %v4828_v62  ;;  %v4506_v43 = vpop.f32.mrb[67].mxu0  ;;  %vm8057_vm8 = vmmov %vm8056_vm0 }
 0x6d8   : > { %v4875_v4 = vsel %vm8051_vm12, %v4873_v61, %v4829_v0  ;;  %v4876_v5 = vsel %vm8052_vm13, %v4874_v2, %v4834_v56  ;;  %vm8060_vm12 = vcmask 138240   ;;  %v5879_v56 = vcombine.high %v7785_v63, %v7785_v63  ;;  %v5127_v0 = vld [vmem:[%s7961_s10] sm:$0xff] }
 0x6d9   : > { %v4877_v47 = vsel %vm8053_vm9, %v4875_v4, %v4835_v58  ;;  %vm8058_vm9 = vcmask 1046528  }
 0x6da   : > { %vm8059_vm13 = vmmov %vm8058_vm9 }
 0x6dc   : > { %v4633_v9 = vpop.f32.mrb[68].mxu0 }
 0x6dd   : > { %v4840_v10 = vrot.slane %v4633_v9, 3  ;;  %v4635_v11 = vpop.f32.mrb[69].mxu0 }
 0x6de   : > { %v4841_v13 = vrot.slane %v4635_v11, 3  ;;  %v4637_v16 = vpop.f32.mrb[70].mxu0 }
 0x6df   : > { %v4878_v3 = vsel %vm8054_vm2, %v4876_v5, %v4840_v10  ;;  %v4638_v18 = vpop.f32.mrb[71].mxu0  ;;  %vm8061_vm2 = vmmov %vm8060_vm12 }
 0x6e0   : > { %v4879_v6 = vsel %vm8055_vm11, %v4877_v47, %v4841_v13  ;;  %v4880_v19 = vsel %vm8056_vm0, %v4878_v3, %v4846_v12  ;;  %vm8062_vm11 = vmmov %vm8061_vm2 }
 0x6e1   : > { %v4881_v22 = vsel %vm8057_vm8, %v4879_v6, %v4847_v17  ;;  %vm8063_vm0 = vmmov %vm8061_vm2 }
 0x6e2   : > { %vm8064_vm8 = vmmov %vm8063_vm0 }
 0x6e4   : > { %v4765_v23 = vpop.f32.mrb[72].mxu0 }
 0x6e5   : > { %v4852_v24 = vrot.slane %v4765_v23, 1  ;;  %v4767_v27 = vpop.f32.mrb[73].mxu0 }
 0x6e6   : > { %v4853_v29 = vrot.slane %v4767_v27, 1  ;;  %v4769_v34 = vpop.f32.mrb[74].mxu0 }
 0x6e7   : > { %v4882_v31 = vsel %vm8058_vm9, %v4880_v19, %v4852_v24  ;;  %v4770_v35 = vpop.f32.mrb[75].mxu0  ;;  %vm7750_vm9 = vmpackc.low %vm7188_vm1, %vm7188_vm1 }
 0x6e8   : > { %v4890_v14 = vadd.f32 %v4886_v30, %v4882_v31  ;;  %v4883_v36 = vsel %vm8059_vm13, %v4881_v22, %v4853_v29  ;;  %vm8067_vm13 = vmmov %vm8063_vm0 }
 0x6e9   : > { %v4891_v21 = vadd.f32 %v4887_v33, %v4883_v36 }
 0x6ea   : > { %v4894_v41 = vmax.f32 %v4890_v14, 0.0 }
 0x6eb   : > { %v4895_v42 = vmax.f32 %v4891_v21, 0.0 }
 0x6ed   : > { %v6431_v44 = vpack.i.bf16 %v4895_v42, %v4894_v41 }
 0x6ef   : > { %6432 = vrot.lane.b32.xlu1 %v6431_v44, %s7008_s15 }
 0x741   : > { %v6428_v45 = vpop.permute.xlu1 %6427 }
 0x742   : > { %v6430_v48 = vunpack.i.h.bf16 %v6428_v45  ;;  %v6429_v49 = vunpack.i.l.bf16 %v6428_v45 }
 0x744   : > { %v4918_v25 = vsel %vm8060_vm12, %v6430_v48, 0.0  ;;  %v4908_v50 = vsel %vm8061_vm2, %v6429_v49, %v6430_v48  ;;  %v4916_v57 = vsel %vm8062_vm11, 0.0, %v6429_v49  ;;  %vm7758_vm12 = vmpackc.low %vm7192_vm3, %vm7192_vm3  ;;  %vm5139_vm2 = vcmask 130048  }
 0x745   : > { %v6436_v51 = vpack.i.bf16 %v4918_v25, %v4908_v50  ;;  %5916 = vmatprep.mubr.msk.bf16.mxu1 %vm5139_vm2, %v5879_v56  ;;  %vm8074_vm11 = vcmask 1039360   ;;  %vm8078_vm2 = vcmask 1031168  }
 0x747   : > { %6437 = vrot.lane.b32.xlu0 %v6436_v51, %s7013_s20  ;;  %6442 = vrot.lane.b32.xlu1 %v6436_v51, %s7010_s17 }
 0x74b   : > { %6447 = vrot.lane.b32.xlu0 %v6436_v51, %s7009_s16  ;;  %6452 = vrot.lane.b32.xlu1 %v6436_v51, %s7014_s21 }
 0x761   : > { %v6433_v53 = vpop.permute.xlu1 %6432 }
 0x762   : > { %v6435_v32 = vunpack.i.h.bf16 %v6433_v53  ;;  %v6434_v55 = vunpack.i.l.bf16 %v6433_v53 }
 0x764   : > { %v4909_v26 = vsel %vm8063_vm0, %v6434_v55, %v6435_v32  ;;  %v4917_v7 = vsel %vm8064_vm8, 0.0, %v6434_v55  ;;  %v4919_v61 = vsel %vm8067_vm13, %v6435_v32, 0.0  ;;  %vm8075_vm0 = vmmov %vm8074_vm11 }
 0x765   : > { %v6461_v46 = vpack.i.bf16 %v4917_v7, %v4916_v57  ;;  %v5881_v28 = vpack.c.bf16 %v4909_v26, %v4908_v50  ;;  %v5884_v8 = vpack.c.bf16 %v4917_v7, %v4916_v57  ;;  %v6471_v62 = vpack.i.bf16 %v4919_v61, %v4909_v26  ;;  %vm8076_vm8 = vmmov %vm8075_vm0 }
 0x766   : > { %vm8077_vm13 = vmmov %vm8075_vm0 }
 0x767   : > { %6462 = vrot.lane.b32.xlu1 %v6461_v46, %s7010_s17  ;;  %6457 = vrot.lane.b32.xlu0 %v6461_v46, %s7013_s20 }
 0x768   : > { %5882 = vmatprep.subr.msk.bf16.mxu1 %vm7750_vm9, %v5881_v28 }
 0x769   : > { %5885 = vmatpush1.bf16.msk.msra.mxu1 %vm7758_vm12, %v5884_v8 }
 0x76b   : > { %6467 = vrot.lane.b32.xlu0 %v6461_v46, %s7009_s16  ;;  %6472 = vrot.lane.b32.xlu1 %v6471_v62, %s7013_s20 }
 0x76f   : > { %6482 = vrot.lane.b32.xlu0 %v6436_v51, %s8070_s22  ;;  %6477 = vrot.lane.b32.xlu1 %v6461_v46, %s7014_s21 }
 0x773   : > { %6487 = vrot.lane.b32.xlu0 %v6471_v62, %s7010_s17  ;;  %6497 = vrot.lane.b32.xlu1 %v6471_v62, %s7009_s16 }
 0x777   : > { %6492 = vrot.lane.b32.xlu0 %v6461_v46, %s8070_s22  ;;  %6502 = vrot.lane.b32.xlu1 %v6436_v51, %s8071_s23 }
 0x77b   : > { %6507 = vrot.lane.b32.xlu0 %v6471_v62, %s7014_s21  ;;  %6512 = vrot.lane.b32.xlu1 %v6471_v62, %s8070_s22 }
 0x77f   : > { %6522 = vrot.lane.b32.xlu0 %v6436_v51, %s8072_s14  ;;  %6517 = vrot.lane.b32.xlu1 %v6461_v46, %s8071_s23 }
 0x783   : > { %6527 = vrot.lane.b32.xlu0 %v6471_v62, %s8071_s23  ;;  %6537 = vrot.lane.b32.xlu1 %v6471_v62, %s8072_s14 }
 0x787   : > { %6532 = vrot.lane.b32.xlu0 %v6461_v46, %s8072_s14  ;;  %6542 = vrot.lane.b32.xlu1 %v6436_v51, %s8073_s19 }
 0x78b   : > { %6547 = vrot.lane.b32.xlu0 %v6471_v62, %s8073_s19  ;;  %6552 = vrot.lane.b32.xlu1 %v6461_v46, %s8073_s19 }
 0x78f   : > { %5130 = vperm.xlu0 %6425, %v5127_v0  }
 0x7b9   : > { %v6438_v1 = vpop.permute.xlu0 %6437  ;;  %v6443_v58 = vpop.permute.xlu1 %6442 }
 0x7ba   : > { %v6440_v47 = vunpack.i.h.bf16 %v6438_v1  ;;  %v6439_v9 = vunpack.i.l.bf16 %v6438_v1  ;;  %v6445_v27 = vunpack.i.h.bf16 %v6443_v58  ;;  %v6444_v29 = vunpack.i.l.bf16 %v6443_v58 }
 0x7bc   : > { %v5061_v6 = vsel %vm8076_vm8, %v6439_v9, %v6440_v47  ;;  %v4941_v45 = vsel %vm8078_vm2, %v6444_v29, %v6445_v27 }
 0x7bd   : > { %v6448_v2 = vpop.permute.xlu0 %6447  ;;  %v7796_v43 = vpop.permute.xlu1 %6452 }
 0x7be   : > { %v6450_v34 = vunpack.i.h.bf16 %v6448_v2  ;;  %v6449_v31 = vunpack.i.l.bf16 %v6448_v2  ;;  %v6455_v61 = vunpack.i.h.bf16 %v7796_v43  ;;  %v6454_v62 = vunpack.i.l.bf16 %v7796_v43 }
 0x7d9   : > { %v6463_v4 = vpop.permute.xlu1 %6462  ;;  %v6458_v5 = vpop.permute.xlu0 %6457 }
 0x7da   : > { %v6459_v10 = vunpack.i.l.bf16 %v6458_v5  ;;  %v6460_v13 = vunpack.i.h.bf16 %v6458_v5  ;;  %v6464_v33 = vunpack.i.l.bf16 %v6463_v4  ;;  %v6465_v35 = vunpack.i.h.bf16 %v6463_v4 }
 0x7dc   : > { %v5060_v3 = vsel %vm8074_vm11, %v6459_v10, %v6439_v9  ;;  %vm8079_vm11 = vmmov %vm8078_vm2 }
 0x7dd   : > { %v6468_v11 = vpop.permute.xlu0 %6467  ;;  %v6473_v12 = vpop.permute.xlu1 %6472  ;;  %v4940_v48 = vsel %vm8079_vm11, %v6464_v33, %v6444_v29 }
 0x7de   : > { %v6475_v16 = vunpack.i.h.bf16 %v6473_v12  ;;  %v6474_v17 = vunpack.i.l.bf16 %v6473_v12  ;;  %v6470_v49 = vunpack.i.h.bf16 %v6468_v11  ;;  %v6469_v25 = vunpack.i.l.bf16 %v6468_v11 }
 0x7e0   : > { %v5062_v18 = vsel %vm8075_vm0, %v6460_v13, %v6474_v17  ;;  %v5063_v19 = vsel %vm8077_vm13, %v6474_v17, %v6475_v16  ;;  %vm8080_vm0 = vmmov %vm8078_vm2  ;;  %vm8082_vm13 = vcmask 916480  }
 0x7e1   : > { %v5111_v22 = vpack.c.bf16 %v5062_v18, %v5060_v3  ;;  %v7802_v23 = vpop.permute.xlu0 %6482  ;;  %v6478_v24 = vpop.permute.xlu1 %6477  ;;  %v5112_v30 = vpack.c.bf16 %v5063_v19, %v5061_v6  ;;  %vm8081_vm8 = vmmov %vm8080_vm0 }
 0x7e2   : > { %vm7819_vm2 = vmpackc.low %vm7196_vm4, %vm7196_vm4  ;;  %v6479_v56 = vunpack.i.l.bf16 %v6478_v24  ;;  %v6485_v58 = vunpack.i.h.bf16 %v7802_v23  ;;  %v6484_v2 = vunpack.i.l.bf16 %v7802_v23  ;;  %v6480_v4 = vunpack.i.h.bf16 %v6478_v24 }
 0x7e3   : > { %5145 = vmatprep.subr.bf16.mxu1 %v5112_v30  ;;  %vm8087_vm11 = vmmov %vm8082_vm13 }
 0x7e4   : > { %5146 = vmatpush1.bf16.msra.mxu1 %v5111_v22  ;;  %v4965_v28 = vsel %vm8087_vm11, %v6449_v31, %v6450_v34 }
 0x7e5   : > { %v6488_v14 = vpop.permute.xlu0 %6487  ;;  %v6498_v36 = vpop.permute.xlu1 %6497 }
 0x7e6   : > { %v6490_v21 = vunpack.i.h.bf16 %v6488_v14  ;;  %v6489_v41 = vunpack.i.l.bf16 %v6488_v14  ;;  %v6500_v42 = vunpack.i.h.bf16 %v6498_v36  ;;  %v6499_v44 = vunpack.i.l.bf16 %v6498_v36 }
 0x7e8   : > { %v4942_v50 = vsel %vm8080_vm0, %v6465_v35, %v6489_v41  ;;  %v4943_v51 = vsel %vm8081_vm8, %v6489_v41, %v6490_v21  ;;  %v4967_v53 = vsel %vm8082_vm13, %v6499_v44, %v6500_v42  ;;  %vm8088_vm0 = vmmov %vm8087_vm11  ;;  %vm8090_vm13 = vcmask 908288  }
 0x7e9   : > { %v5887_v55 = vpack.c.bf16 %v4943_v51, %v4941_v45  ;;  %v5890_v57 = vpack.c.bf16 %v4942_v50, %v4940_v48  ;;  %v6493_v26 = vpop.permute.xlu0 %6492  ;;  %v6503_v7 = vpop.permute.xlu1 %6502  ;;  %v4966_v8 = vsel %vm8088_vm0, %v6470_v49, %v6499_v44  ;;  %v5893_v0 = vpack.c.bf16 %v4967_v53, %v4965_v28  ;;  %vm8089_vm8 = vmmov %vm8088_vm0 }
 0x7ea   : > { %v4964_v1 = vsel %vm8089_vm8, %v6469_v25, %v6449_v31  ;;  %v5080_v13 = vsel %vm8090_vm13, %v6479_v56, %v6454_v62  ;;  %v6495_v16 = vunpack.i.h.bf16 %v6493_v26  ;;  %vm8091_vm11 = vmmov %vm8090_vm13  ;;  %v6494_v3 = vunpack.i.l.bf16 %v6493_v26 }
 0x7eb   : > { %5888 = vmatprep.subr.msk.bf16.mxu1 %vm7812_vm15, %v5887_v55  ;;  %v5896_v5 = vpack.c.bf16 %v4966_v8, %v4964_v1  ;;  %v5081_v17 = vsel %vm8091_vm11, %v6454_v62, %v6455_v61  ;;  %vm8092_vm0 = vmmov %vm8091_vm11  ;;  %vm8093_vm8 = vcmask 900096   ;;  %v6505_v33 = vunpack.i.h.bf16 %v6503_v7 }
 0x7ec   : > { %5891 = vmatpush1.bf16.msk.msra.mxu1 %vm7819_vm2, %v5890_v57  ;;  %vm8094_vm7 = vmmov %vm8092_vm0  ;;  %v6504_v34 = vunpack.i.l.bf16 %v6503_v7 }
 0x7ed   : > { %v6508_v47 = vpop.permute.xlu0 %6507  ;;  %v6513_v9 = vpop.permute.xlu1 %6512  ;;  %5894 = vmatprep.subr.msk.bf16.mxu1 %vm7750_vm9, %v5893_v0  ;;  %vm8095_vm14 = vmmov %vm8093_vm8 }
 0x7ee   : > { %v6510_v43 = vunpack.i.h.bf16 %v6508_v47  ;;  %v6509_v10 = vunpack.i.l.bf16 %v6508_v47  ;;  %v6515_v11 = vunpack.i.h.bf16 %v6513_v9  ;;  %v6514_v12 = vunpack.i.l.bf16 %v6513_v9  ;;  %vm8096_vm13 = vmmov %vm8093_vm8 }
 0x7ef   : > { %v4989_v27 = vsel %vm8095_vm14, %v6484_v2, %v6485_v58  ;;  %vm8097_vm11 = vmmov %vm8093_vm8  ;;  %vm8098_vm14 = vcmask 785408  }
 0x7f0   : > { %v5082_v18 = vsel %vm8092_vm0, %v6480_v4, %v6509_v10  ;;  %v4991_v6 = vsel %vm8093_vm8, %v6514_v12, %v6515_v11  ;;  %5897 = vmatpush1.bf16.msk.msra.mxu1 %vm7758_vm12, %v5896_v5  ;;  %v5083_v19 = vsel %vm8094_vm7, %v6509_v10, %v6510_v43  ;;  %v4990_v29 = vsel %vm8096_vm13, %v6495_v16, %v6514_v12  ;;  %vm8099_vm7 = vmmov %vm8098_vm14 }
 0x7f1   : > { %v5117_v22 = vpack.c.bf16 %v5082_v18, %v5080_v13  ;;  %v6523_v23 = vpop.permute.xlu0 %6522  ;;  %v6518_v24 = vpop.permute.xlu1 %6517  ;;  %v5118_v30 = vpack.c.bf16 %v5083_v19, %v5081_v17  ;;  %v5899_v31 = vpack.c.bf16 %v4991_v6, %v4989_v27  ;;  %v4988_v35 = vsel %vm8097_vm11, %v6494_v3, %v6484_v2  ;;  %vm8100_vm0 = vmmov %vm8099_vm7 }
 0x7f2   : > { %v6519_v14 = vunpack.i.l.bf16 %v6518_v24  ;;  %v5902_v36 = vpack.c.bf16 %v4990_v29, %v4988_v35  ;;  %v6525_v21 = vunpack.i.h.bf16 %v6523_v23  ;;  %v6524_v41 = vunpack.i.l.bf16 %v6523_v23  ;;  %vm8101_vm8 = vmmov %vm8100_vm0 }
 0x7f3   : > { %5151 = vmatprep.subr.bf16.mxu1 %v5118_v30  ;;  %v6520_v42 = vunpack.i.h.bf16 %v6518_v24  ;;  %v5013_v51 = vsel %vm8098_vm14, %v6504_v34, %v6505_v33  ;;  %vm8102_vm13 = vcmask 777216   ;;  %v5878_v6 = vcombine.low %v7785_v63, %v7785_v63 }
 0x7f4   : > { %5152 = vmatpush1.bf16.msra.mxu1 %v5117_v22  ;;  %v5012_v53 = vsel %vm8099_vm7, %v6519_v14, %v6504_v34  ;;  %vm8103_vm11 = vmmov %vm8102_vm13 }
 0x7f5   : > { %v6528_v44 = vpop.permute.xlu0 %6527  ;;  %v6538_v45 = vpop.permute.xlu1 %6537  ;;  %5900 = vmatprep.subr.msk.bf16.mxu1 %vm7812_vm15, %v5899_v31  ;;  %v5101_v0 = vsel %vm8103_vm11, %v6524_v41, %v6525_v21  ;;  %vm8104_vm14 = vmmov %vm8103_vm11 }
 0x7f6   : > { %v6530_v48 = vunpack.i.h.bf16 %v6528_v44  ;;  %v6529_v49 = vunpack.i.l.bf16 %v6528_v44  ;;  %v6540_v25 = vunpack.i.h.bf16 %v6538_v45  ;;  %v6539_v50 = vunpack.i.l.bf16 %v6538_v45  ;;  %vm8105_vm7 = vmmov %vm8103_vm11 }
 0x7f7   : > { %vm8113_vm11 = vcmask 1039360  }
 0x7f8   : > { %v5014_v55 = vsel %vm8100_vm0, %v6520_v42, %v6529_v49  ;;  %v5015_v57 = vsel %vm8101_vm8, %v6529_v49, %v6530_v48  ;;  %5903 = vmatpush1.bf16.msk.msra.mxu1 %vm7819_vm2, %v5902_v36  ;;  %v5103_v26 = vsel %vm8102_vm13, %v6539_v50, %v6540_v25  ;;  %vm8106_vm0 = vcmask 769024   ;;  %v5303_v42 = vld [vmem:[%s7963_s12] sm:$0x7] }
 0x7f9   : > { %v5905_v7 = vpack.c.bf16 %v5015_v57, %v5013_v51  ;;  %v5908_v28 = vpack.c.bf16 %v5014_v55, %v5012_v53  ;;  %v6533_v8 = vpop.permute.xlu0 %6532  ;;  %v6543_v61 = vpop.permute.xlu1 %6542  ;;  %v5124_v1 = vpack.c.bf16 %v5103_v26, %v5101_v0  ;;  %vm8108_vm8 = vmmov %vm8106_vm0 }
 0x7fa   : > { %v6535_v62 = vunpack.i.h.bf16 %v6533_v8  ;;  %v6534_v56 = vunpack.i.l.bf16 %v6533_v8  ;;  %v6545_v4 = vunpack.i.h.bf16 %v6543_v61  ;;  %v6544_v5 = vunpack.i.l.bf16 %v6543_v61  ;;  %vm8109_vm13 = vmmov %vm8106_vm0 }
 0x7fb   : > { %5906 = vmatprep.subr.msk.bf16.mxu1 %vm7750_vm9, %v5905_v7  ;;  %vm8107_vm9 = vmmov %vm8106_vm0 }
 0x7fc   : > { %v5100_v58 = vsel %vm8104_vm14, %v6534_v56, %v6524_v41  ;;  %v5102_v2 = vsel %vm8105_vm7, %v6535_v62, %v6539_v50  ;;  %5909 = vmatpush1.bf16.msk.msra.mxu1 %vm7758_vm12, %v5908_v28  ;;  %v5037_v60 = vsel %vm8106_vm0, %v6544_v5, %v6545_v4  ;;  %vm8114_vm14 = vmmov %vm8113_vm11  ;;  %vm8115_vm7 = vcmask 916480  }
 0x7fd   : > { %v5123_v47 = vpack.c.bf16 %v5102_v2, %v5100_v58  ;;  %v6548_v9 = vpop.permute.xlu0 %6547  ;;  %v6553_v43 = vpop.permute.xlu1 %6552  ;;  %5157 = vmatprep.subr.bf16.mxu1 %v5124_v1  ;;  %vm8116_vm0 = vmmov %vm8115_vm7 }
 0x7fe   : > { %v6550_v10 = vunpack.i.h.bf16 %v6548_v9  ;;  %v6549_v11 = vunpack.i.l.bf16 %v6548_v9  ;;  %v6555_v12 = vunpack.i.h.bf16 %v6553_v43  ;;  %v6554_v13 = vunpack.i.l.bf16 %v6553_v43 }
 0x800   : > { %v5039_v16 = vsel %vm8107_vm9, %v6549_v11, %v6550_v10  ;;  %v5038_v17 = vsel %vm8108_vm8, %v6555_v12, %v6549_v11  ;;  %v5036_v3 = vsel %vm8109_vm13, %v6554_v13, %v6544_v5  ;;  %5158 = vmatpush1.bf16.msra.mxu1 %v5123_v47  ;;  %vm8117_vm9 = vcmask 1031168   ;;  %vm8119_vm13 = vmpackc.low %vm7188_vm1, %vm7200_vm5 }
 0x801   : > { %v5911_v18 = vpack.c.bf16 %v5039_v16, %v5037_v60  ;;  %v5914_v52 = vpack.c.bf16 %v5038_v17, %v5036_v3  ;;  %vm8118_vm8 = vmmov %vm8117_vm9  ;;  %vm8125_vm1 = vnez %v8025_v15 }
 0x803   : > { %5912 = vmatprep.subr.msk.bf16.mxu1 %vm7812_vm15, %v5911_v18  ;;  %vm8110_vm15 = vcmask 138240  }
 0x804   : > { %5915 = vmatpush1.bf16.msk.msra.mxu1 %vm7819_vm2, %v5914_v52  ;;  %vm8111_vm12 = vmmov %vm8110_vm15 }
 0x805   : > { %vm8112_vm2 = vmmov %vm8111_vm12 }
 0x807   : > { %5176 = vmatmul.mubr.bf16.vlgmr.msra.gmra.mrb[60].mxu1 %v5878_v6 }
 0x80e   : > { %v5131_v19 = vpop.permute.xlu0 %5130 }
 0x8da   : > { %v5177_v22 = vpop.f32.mrb[60].mxu1 }
 0x8db   : > { %v5178_v23 = vadd.f32 %v5177_v22, %v5131_v19  ;;  %v5179_v24 = vpop.f32.mrb[61].mxu1 }
 0x8dc   : > { %v5180_v30 = vadd.f32 %v5179_v24, %v5131_v19  ;;  %v5181_v27 = vpop.f32.mrb[62].mxu1 }
 0x8dd   : > { %v5184_v29 = vmax.f32 %v5178_v23, 0.0  ;;  %v5182_v33 = vpop.f32.mrb[63].mxu1 }
 0x8de   : > { %v5185_v34 = vmax.f32 %v5180_v30, 0.0 }
 0x8e0   : > { %v6556_v31 = vpack.i.bf16 %v5185_v34, %v5184_v29 }
 0x8e2   : > { %6557 = vrot.lane.b32.xlu1 %v6556_v31, %s7008_s15 }
 0x954   : > { %v6558_v32 = vpop.permute.xlu1 %6557 }
 0x955   : > { %v6559_v35 = vunpack.i.l.bf16 %v6558_v32  ;;  %v6560_v46 = vunpack.i.h.bf16 %v6558_v32 }
 0x957   : > { %v5196_v63 = vsel %vm8110_vm15, 0.0, %v6559_v35  ;;  %v5197_v14 = vsel %vm8111_vm12, %v6560_v46, 0.0  ;;  %v5192_v36 = vsel %vm8112_vm2, %v6559_v35, %v6560_v46  ;;  %vm8120_vm15 = vcmask 908288  }
 0x958   : > { %5202 = vrot.lane.b32.xlu0 %v5196_v63, %s7010_s17  ;;  %5262 = vrot.lane.b32.xlu1 %v5196_v63, %s7013_s20  ;;  %v6561_v21 = vpack.i.bf16 %v5197_v14, %v5192_v36  ;;  %v6596_v41 = vpack.i.bf16 %v5192_v36, %v5196_v63  ;;  %vm8121_vm12 = vmmov %vm8120_vm15  ;;  %vm8122_vm2 = vcmask 900096  }
 0x95c   : > { %5226 = vrot.lane.b32.xlu0 %v5196_v63, %s8070_s22  ;;  %5214 = vrot.lane.b32.xlu1 %v5196_v63, %s7009_s16 }
 0x960   : > { %5238 = vrot.lane.b32.xlu0 %v5196_v63, %s8071_s23  ;;  %5272 = vrot.lane.b32.xlu1 %v5196_v63, %s7014_s21 }
 0x964   : > { %5282 = vrot.lane.b32.xlu1 %v5196_v63, %s8072_s14  ;;  %6562 = vrot.lane.b32.xlu0 %v6561_v21, %s7013_s20  ;;  %s8136_s20 = sshll.u32 %s8138_s26, 3 }
 0x968   : > { %6572 = vrot.lane.b32.xlu1 %v6561_v21, %s7009_s16  ;;  %6567 = vrot.lane.b32.xlu0 %v6561_v21, %s7010_s17 }
 0x96c   : > { %6582 = vrot.lane.b32.xlu1 %v6561_v21, %s7014_s21  ;;  %6577 = vrot.lane.b32.xlu0 %v6561_v21, %s8070_s22  ;;  %s455_s22 = scalar_lea.vmem %s7964_s13, %s8136_s20 }
 0x970   : > { %6592 = vrot.lane.b32.xlu1 %v6561_v21, %s8072_s14  ;;  %6587 = vrot.lane.b32.xlu0 %v6561_v21, %s8071_s23 }
 0x974   : > { %5254 = vrot.lane.b32.xlu1 %v5197_v14, %s8073_s19  ;;  %6597 = vrot.lane.b32.xlu0 %v6596_v41, %s8073_s19 }
 0x978   : > { %5306 = vperm.xlu0 %6425, %v5303_v42  }
 0x9ca   : > { %v5203_v44 = vpop.permute.xlu0 %5202  ;;  %v5263_v45 = vpop.permute.xlu1 %5262 }
 0x9ce   : > { %v5227_v48 = vpop.permute.xlu0 %5226  ;;  %v5215_v49 = vpop.permute.xlu1 %5214 }
 0x9d2   : > { %v5239_v25 = vpop.permute.xlu0 %5238  ;;  %v5273_v50 = vpop.permute.xlu1 %5272 }
 0x9d6   : > { %v5283_v51 = vpop.permute.xlu1 %5282  ;;  %v6563_v53 = vpop.permute.xlu0 %6562 }
 0x9d7   : > { %v6565_v55 = vunpack.i.h.bf16 %v6563_v53  ;;  %v6564_v57 = vunpack.i.l.bf16 %v6563_v53 }
 0x9d9   : > { %v5268_v26 = vsel %vm8113_vm11, %v5263_v45, %v6564_v57  ;;  %v5269_v7 = vsel %vm8114_vm14, %v6564_v57, %v6565_v55  ;;  %vm8123_vm11 = vmmov %vm8122_vm2 }
 0x9da   : > { %v5918_v28 = vpack.c.bf16 %v5269_v7, %v5192_v36  ;;  %v5921_v8 = vpack.c.bf16 %v5268_v26, %v5196_v63  ;;  %v6573_v61 = vpop.permute.xlu1 %6572  ;;  %v6568_v62 = vpop.permute.xlu0 %6567  ;;  %vm8124_vm14 = vmpackc.low %vm7192_vm3, %vm7196_vm4  ;;  %vm8130_vm3 = vnez %v8027_v20 }
 0x9db   : > { %v6575_v56 = vunpack.i.h.bf16 %v6573_v61  ;;  %v6574_v0 = vunpack.i.l.bf16 %v6573_v61  ;;  %v6570_v1 = vunpack.i.h.bf16 %v6568_v62  ;;  %v6569_v58 = vunpack.i.l.bf16 %v6568_v62 }
 0x9dc   : > { %5919 = vmatprep.subr.msk.bf16.mxu0 %vm7317_vm10, %v5918_v28 }
 0x9dd   : > { %v5220_v2 = vsel %vm8115_vm7, %v5215_v49, %v6574_v0  ;;  %v5221_v4 = vsel %vm8116_vm0, %v6574_v0, %v6575_v56  ;;  %v5208_v5 = vsel %vm8117_vm9, %v5203_v44, %v6569_v58  ;;  %v5209_v47 = vsel %vm8118_vm8, %v6569_v58, %v6570_v1  ;;  %5922 = vmatpush1.bf16.msk.msra.mxu0 %vm7326_vm6, %v5921_v8  ;;  %v5292_v44 = vld [vmem:[%s7962_s11] sm:$0x3] }
 0x9de   : > { %v5924_v9 = vpack.c.bf16 %v5221_v4, %v5209_v47  ;;  %v5927_v43 = vpack.c.bf16 %v5220_v2, %v5208_v5  ;;  %v6583_v10 = vpop.permute.xlu1 %6582  ;;  %v6578_v11 = vpop.permute.xlu0 %6577  ;;  %vm8126_vm7 = vcmask 777216   ;;  %vm8128_vm9 = vcmask 785408  }
 0x9df   : > { %v6585_v12 = vunpack.i.h.bf16 %v6583_v10  ;;  %v6584_v13 = vunpack.i.l.bf16 %v6583_v10  ;;  %v6580_v60 = vunpack.i.h.bf16 %v6578_v11  ;;  %v6579_v16 = vunpack.i.l.bf16 %v6578_v11  ;;  %vm8127_vm0 = vmmov %vm8126_vm7 }
 0x9e0   : > { %5925 = vmatprep.subr.msk.bf16.mxu0 %vm8119_vm13, %v5924_v9  ;;  %vm8129_vm8 = vmmov %vm8128_vm9  ;;  %vm8131_vm13 = vcmask 769024  }
 0x9e1   : > { %v5278_v17 = vsel %vm8120_vm15, %v5273_v50, %v6584_v13  ;;  %v5279_v3 = vsel %vm8121_vm12, %v6584_v13, %v6585_v12  ;;  %v5232_v18 = vsel %vm8122_vm2, %v5227_v48, %v6579_v16  ;;  %v5233_v52 = vsel %vm8123_vm11, %v6579_v16, %v6580_v60  ;;  %5928 = vmatpush1.bf16.msk.msra.mxu0 %vm8124_vm14, %v5927_v43  ;;  %vm8132_vm15 = vmmov %vm8131_vm13 }
 0x9e2   : > { %v5930_v6 = vpack.c.bf16 %v5233_v52, %v5279_v3  ;;  %v5933_v37 = vpack.c.bf16 %v5232_v18, %v5278_v17  ;;  %v6593_v19 = vpop.permute.xlu1 %6592  ;;  %v6588_v22 = vpop.permute.xlu0 %6587  ;;  %vm8133_vm12 = vcmask 1043456  }
 0x9e3   : > { %v6595_v23 = vunpack.i.h.bf16 %v6593_v19  ;;  %v6594_v24 = vunpack.i.l.bf16 %v6593_v19  ;;  %v6590_v30 = vunpack.i.h.bf16 %v6588_v22  ;;  %v6589_v27 = vunpack.i.l.bf16 %v6588_v22  ;;  %vm8134_vm2 = vmmov %vm8133_vm12 }
 0x9e4   : > { %5931 = vmatprep.subr.msk.bf16.mxu0 %vm8125_vm1, %v5930_v6 }
 0x9e5   : > { %v5288_v29 = vsel %vm8126_vm7, %v5283_v51, %v6594_v24  ;;  %v5289_v33 = vsel %vm8127_vm0, %v6594_v24, %v6595_v23  ;;  %v5244_v38 = vsel %vm8128_vm9, %v5239_v25, %v6589_v27  ;;  %v5245_v34 = vsel %vm8129_vm8, %v6589_v27, %v6590_v30  ;;  %5934 = vmatpush1.bf16.msk.msra.mxu0 %vm8130_vm3, %v5933_v37 }
 0x9e6   : > { %v5936_v31 = vpack.c.bf16 %v5289_v33, %v5245_v34  ;;  %v5939_v32 = vpack.c.bf16 %v5288_v29, %v5244_v38  ;;  %v6598_v35 = vpop.permute.xlu0 %6597  ;;  %v5255_v14 = vpop.permute.xlu1 %5254 }
 0x9e7   : > { %v6600_v63 = vunpack.i.h.bf16 %v6598_v35  ;;  %v6599_v46 = vunpack.i.l.bf16 %v6598_v35 }
 0x9e8   : > { %5937 = vmatprep.subr.msk.bf16.mxu0 %vm7317_vm10, %v5936_v31  ;;  %vm8135_vm10 = vcmask 588800  }
 0x9e9   : > { %v5257_v15 = vsel %vm8131_vm13, %v6600_v63, %v5255_v14  ;;  %v5256_v36 = vsel %vm8132_vm15, %v6599_v46, %v6600_v63  ;;  %5940 = vmatpush1.bf16.msk.msra.mxu0 %vm7326_vm6, %v5939_v32 }
 0x9ea   : > { %v5261_v20 = vsel %vm7200_vm5, %v5257_v15, 0.0  ;;  %v5260_v21 = vsel %vm7196_vm4, %v5256_v36, 0.0 }
 0x9eb   : > { %v5302_v41 = vpack.c.bf16 %v5261_v20, %v5261_v20  ;;  %v5301_v42 = vpack.c.bf16 %v5260_v21, %v5260_v21 }
 0x9ed   : > { %5941 = vmatprep.subr.msk.bf16.mxu0 %vm8133_vm12, %v5302_v41  ;;  %v5313_v54 = vsel %vm8134_vm2, %v5301_v42, 0 }
 0x9ee   : > { %5327 = vmatpush1.bf16.msra.mxu0 %v5313_v54 }
 0x9f1   : > { %5942 = vmatmul.mubr.msk.bf16.vlgmr.msra.gmra.mrb[76].mxu0 %vm8135_vm10, %v5292_v44 }
 0x9f7   : > { %v5307_v59 = vpop.permute.xlu0 %5306 }
 0xac4   : > { %v5352_v45 = vpop.f32.mrb[76].mxu0 }
 0xac5   : > { %v5353_v40 = vadd.f32 %v5352_v45, %v5307_v59  ;;  %v5354_v48 = vpop.f32.mrb[77].mxu0 }
 0xac6   : > { %v5355_v39 = vadd.f32 %v5354_v48, %v5307_v59  ;;  %v5356_v49 = vpop.f32.mrb[78].mxu0 }
 0xac7   : > { %v5943_v25 = vmul.f32 -1.442695, %v5353_v40  ;;  %v5357_v50 = vpop.f32.mrb[79].mxu0 }
 0xac8   : > { %v5944_v51 = vmul.f32 -1.442695, %v5355_v39 }
 0xac9   : > { %6957 = vpow2.f32 %v5943_v25 }
 0xaca   : > { %6959 = vpow2.f32 %v5944_v51 }
 0xad3   : > { %v6958_v53 = vpop.eup %6957 }
 0xad4   : > { %v6960_v55 = vpop.eup %6959  ;;  %v5365_v57 = vadd.f32 1.0, %v6958_v53 }
 0xad5   : > { %v5366_v26 = vadd.f32 1.0, %v6960_v55 }
 0xad6   : > { %6961 = vrcp.f32 %v5365_v57 }
 0xad7   : > { %6963 = vrcp.f32 %v5366_v26 }
 0xae0   : > { %v6962_v7 = vpop.eup %6961 }
 0xae1   : > { %v6964_v28 = vpop.eup %6963 }
 0xae2   : > { %v5373_v8 = vcombine.low %v6962_v7, %v6964_v28 }
 0xae4   : > { %5375 = vst [vmem:[%s455_s22] sm:$0x77] %v5373_v8 }
 0xae5 PF: > { %s24_s25 = sadd.s32 1, %s7003_s25  }
 0xae6   : > { %p21_p3 = scmp.ge.s32.totalorder %s24_s25, 4  }
 0xae8   :  { %23 = sbr.rel (!%p21_p3) target bundleno = 1 (0x1), region = 137 }
 0xaef   :  { %5397 = vsyncpa [#allocation3], 1 }
 0xaf0   :  { %5399 = vsyncpa [#allocation3 + $0x1], 1 }

</bundles_post_ra>
